<compile_context>
chip_gen: v5e
topology: v5e:2x2
jax: 0.10.0
libtpu: 0.0.40
codegen_flags: <defaults>
</compile_context>

<pallas_src>
import functools

import jax
import jax.numpy as jnp
from jax import lax
from jax.experimental import pallas as pl
from jax.experimental.pallas import tpu as pltpu


def _round_up(n, m):
    return ((n + m - 1) // m) * m


# ---------------------------------------------------------------------------
# In-kernel helpers
# ---------------------------------------------------------------------------
def _shift_lanes_zero(x, d):
    """y[..., l] = x[..., l + d] if 0 <= l + d < L else 0 (d is a static int).

    Implemented as a lane-aligned concat with a zero slab followed by a static
    slice, so the semantics are explicit (no rotation/wraparound involved).
    """
    if d == 0:
        return x
    L = x.shape[-1]
    pad = _round_up(abs(d), 128)          # keep the concat operands lane-aligned
    z = jnp.zeros(x.shape[:-1] + (pad,), x.dtype)
    if d > 0:
        return jnp.concatenate([x, z], axis=-1)[..., d:d + L]
    return jnp.concatenate([z, x], axis=-1)[..., pad + d:pad + d + L]


def _conv_layer(x, w_ref, b_ref, *, KH, KW, P, H, W, act):
    """Stride-1 'same' conv on a (Cin, H*W) activation -> (Cout, H*W) f32.

    w_ref : (KH, Cout, KW*Cin) bf16, column index = kw*Cin + ci
    b_ref : (Cout, 1) f32
    The lane axis is the flattened spatial extent; taps are zero-filled lane
    shifts and the contraction over (kw, ci) is one MXU matmul per kh.
    """
    Cin, HW = x.shape
    Cout = w_ref.shape[1]
    xb = x.astype(jnp.bfloat16)           # bf16 MXU inputs, f32 accumulation

    # lane l -> spatial (h, w) = (l // W, l % W).  Only the w coordinate needs
    # masking; top/bottom padding falls out of the whole-row zero-filled shift.
    ww = lax.broadcasted_iota(jnp.int32, (1, HW), 1) % W

    # kw-expansion: row kw*Cin + ci holds x[ci] shifted by dw = kw - P, masked
    # so a tap never crosses an image row.
    pieces = []
    for kw in range(KW):
        dw = kw - P
        s = _shift_lanes_zero(xb, dw)
        valid = (ww + dw >= 0) & (ww + dw < W)
        pieces.append(jnp.where(valid, s, jnp.zeros_like(s)))
    xk = jnp.concatenate(pieces, axis=0)   # (KW*Cin, HW)

    # kh taps: a lane shift by dh*W moves whole image rows; the zero fill at
    # the ends of the flattened array is exactly the top/bottom zero padding.
    acc = jnp.zeros((Cout, HW), jnp.float32)
    for kh in range(KH):
        dh = kh - P
        xs = _shift_lanes_zero(xk, dh * W)
        acc = acc + jnp.dot(w_ref[kh], xs, preferred_element_type=jnp.float32)

    acc = acc + b_ref[...]                 # (Cout, 1) broadcasts over lanes
    if act == "leaky":
        acc = jnp.where(acc >= 0, acc, 0.2 * acc)
    elif act == "sigmoid":
        # exp + approximate reciprocal both land on the otherwise-idle EUP.
        acc = pl.reciprocal(1.0 + jnp.exp(-acc), approx=True)
    return acc


def _generator_kernel(x_ref, w1_ref, b1_ref, w2_ref, b2_ref, w3_ref, b3_ref,
                      w4_ref, b4_ref, o_ref, *, H, W):
    """All four conv layers fused; one batch sample per grid step."""
    x = x_ref[0]                                             # (Cin0p, H*W) f32
    a = _conv_layer(x, w1_ref, b1_ref, KH=11, KW=11, P=5, H=H, W=W, act="none")
    a = _conv_layer(a, w2_ref, b2_ref, KH=5, KW=5, P=2, H=H, W=W, act="leaky")
    a = _conv_layer(a, w3_ref, b3_ref, KH=3, KW=3, P=1, H=H, W=W, act="leaky")
    a = _conv_layer(a, w4_ref, b4_ref, KH=3, KW=3, P=1, H=H, W=W, act="sigmoid")
    o_ref[0] = a                                             # (3, H*W), lane-dense


# ---------------------------------------------------------------------------
# Wrapper
# ---------------------------------------------------------------------------
def _prep_weight(w_oihw, b, cin_pad, cout_pad):
    """OIHW conv weight -> (KH, cout_pad, KW*cin_pad) bf16 + (cout_pad, 1) f32.

    Extra input/output channels are zero-weighted, so the padded conv is
    numerically identical to the original one.
    """
    Cout, Cin, KH, KW = w_oihw.shape
    wp = jnp.zeros((cout_pad, cin_pad, KH, KW), jnp.float32)
    wp = wp.at[:Cout, :Cin].set(w_oihw.astype(jnp.float32))
    # [kh, co, kw*cin_pad + ci] == w[co, ci, kh, kw]
    wk = jnp.transpose(wp, (2, 0, 3, 1)).reshape(KH, cout_pad, KW * cin_pad)
    bp = jnp.zeros((cout_pad, 1), jnp.float32).at[:Cout, 0].set(
        b.astype(jnp.float32))
    return wk.astype(jnp.bfloat16), bp


def generator_forward(x_nchw, params, join_num):
    B, C, H, W = x_nchw.shape
    assert C == 3 * join_num
    HW = H * W

    # Channel plan: pad channel counts to multiples of 16 (bf16 sublane tile)
    # with zero weights -- exact math, aligned sublane layouts.
    c0 = _round_up(C, 16)      # conv3d-as-conv2d input channels (12 -> 16)
    c1 = 16                    # layer-1 output channels (3 real + 13 zero)

    x_flat = x_nchw.reshape(B, C, HW).astype(jnp.float32)    # NCHW-flat, no transpose
    if c0 != C:
        x_flat = jnp.pad(x_flat, ((0, 0), (0, c0 - C), (0, 0)))

    w3d, b3d = params["conv3d"]
    # Conv3d(3->3, (jn,11,11), pad=(0,5,5)) == Conv2d(3*jn->3, 11x11, pad=5);
    # channel index c3*join_num + d matches the Unflatten layout.
    w1m, b1m = _prep_weight(w3d.reshape(3, 3 * join_num, 11, 11), b3d, c0, c1)
    w2m, b2m = _prep_weight(params["conv1"][0], params["conv1"][1], c1, 32)
    w3m, b3m = _prep_weight(params["conv2"][0], params["conv2"][1], 32, 16)
    w4m, b4m = _prep_weight(params["conv3"][0], params["conv3"][1], 16, 3)

    kernel = functools.partial(_generator_kernel, H=H, W=W)

    def _full(arr):
        nd = arr.ndim
        return pl.BlockSpec(arr.shape, lambda b, _n=nd: (0,) * _n)

    out = pl.pallas_call(
        kernel,
        out_shape=jax.ShapeDtypeStruct((B, 3, HW), jnp.float32),
        grid_spec=pltpu.PrefetchScalarGridSpec(
            num_scalar_prefetch=0,
            grid=(B,),
            in_specs=[
                pl.BlockSpec((1, c0, HW), lambda b: (b, 0, 0)),
                _full(w1m), _full(b1m),
                _full(w2m), _full(b2m),
                _full(w3m), _full(b3m),
                _full(w4m), _full(b4m),
            ],
            out_specs=pl.BlockSpec((1, 3, HW), lambda b: (b, 0, 0)),
        ),
        compiler_params=pltpu.CompilerParams(
            # Batch samples are independent -> both v7x TensorCores get work.
            dimension_semantics=("parallel",),
        ),
    )(x_flat, w1m, b1m, w2m, b2m, w3m, b3m, w4m, b4m)

    return out.reshape(B, 3, H, W)


# ---------------------------------------------------------------------------
# Pure-JAX reference (for correctness check) and parameter init
# ---------------------------------------------------------------------------
def _reference_forward(x_nchw, params, join_num):
    def conv(x, w, b, p):
        y = lax.conv_general_dilated(
            x, w, window_strides=(1, 1), padding=[(p, p), (p, p)],
            dimension_numbers=("NCHW", "OIHW", "NCHW"))
        return y + b.reshape(1, -1, 1, 1)

    w3d, b3d = params["conv3d"]
    y = conv(x_nchw, w3d.reshape(3, 3 * join_num, 11, 11), b3d, 5)
    y = conv(y, params["conv1"][0], params["conv1"][1], 2)
    y = jnp.where(y >= 0, y, 0.2 * y)
    y = conv(y, params["conv2"][0], params["conv2"][1], 1)
    y = jnp.where(y >= 0, y, 0.2 * y)
    y = conv(y, params["conv3"][0], params["conv3"][1], 1)
    return jax.nn.sigmoid(y)


def init_params(key, join_num):
    ks = jax.random.split(key, 8)
    scale = 0.05
    return {
        "conv3d": (scale * jax.random.normal(ks[0], (3, 3, join_num, 11, 11), jnp.float32),
                   scale * jax.random.normal(ks[1], (3,), jnp.float32)),
        "conv1": (scale * jax.random.normal(ks[2], (32, 3, 5, 5), jnp.float32),
                  scale * jax.random.normal(ks[3], (32,), jnp.float32)),
        "conv2": (scale * jax.random.normal(ks[4], (16, 32, 3, 3), jnp.float32),
                  scale * jax.random.normal(ks[5], (16,), jnp.float32)),
        "conv3": (scale * jax.random.normal(ks[6], (3, 16, 3, 3), jnp.float32),
                  scale * jax.random.normal(ks[7], (3,), jnp.float32)),
    }


if __name__ == "__main__":
    key = jax.random.PRNGKey(0)
    kp, kx = jax.random.split(key)

    join_num = 4
    B, H, W = 2, 16, 16

    params = init_params(kp, join_num)
    x = jax.random.normal(kx, (B, 3 * join_num, H, W), jnp.float32)

    fwd = jax.jit(generator_forward, static_argnums=2)
    out = jax.block_until_ready(fwd(x, params, join_num))

    assert out.shape == (B, 3, H, W), out.shape
    assert bool(jnp.all(jnp.isfinite(out)))
    assert bool(jnp.all((out >= 0.0) & (out <= 1.0)))

    # Cross-check against a pure-JAX reference (bf16 matmuls + approximate
    # reciprocal in the kernel -> loose tolerance).
    ref = _reference_forward(x, params, join_num)
    err = float(jnp.max(jnp.abs(out - ref)))
    assert err < 5e-2, f"max |pallas - reference| = {err}"

    print("KERNEL_OK")
</pallas_src>

<mosaic_0001>
module attributes {stable_mosaic.version = 11 : i64} {
  func.func @_generator_kernel(%arg0: i32, %arg1: memref<1x16x256xf32, #tpu.memory_space<vmem>>, %arg2: memref<11x16x176xbf16, #tpu.memory_space<vmem>>, %arg3: memref<16x1xf32, #tpu.memory_space<vmem>>, %arg4: memref<5x32x80xbf16, #tpu.memory_space<vmem>>, %arg5: memref<32x1xf32, #tpu.memory_space<vmem>>, %arg6: memref<3x16x96xbf16, #tpu.memory_space<vmem>>, %arg7: memref<16x1xf32, #tpu.memory_space<vmem>>, %arg8: memref<3x3x48xbf16, #tpu.memory_space<vmem>>, %arg9: memref<3x1xf32, #tpu.memory_space<vmem>>, %arg10: memref<1x3x256xf32, #tpu.memory_space<vmem>>) attributes {dimension_semantics = [#tpu.dimension_semantics<parallel>], iteration_bounds = array<i64: 2>, scalar_prefetch = 0 : i64, scratch_operands = 0 : i64, tpu.core_type = #tpu.core_type<tc>, window_params = [{transform_indices = @transform_0, window_bounds = array<i64: 1, 16, 256>}, {pipeline_mode = #tpu.pipeline_mode<synchronous>, transform_indices = @transform_1, window_bounds = array<i64: 11, 16, 176>}, {pipeline_mode = #tpu.pipeline_mode<synchronous>, transform_indices = @transform_2, window_bounds = array<i64: 16, 1>}, {pipeline_mode = #tpu.pipeline_mode<synchronous>, transform_indices = @transform_3, window_bounds = array<i64: 5, 32, 80>}, {pipeline_mode = #tpu.pipeline_mode<synchronous>, transform_indices = @transform_4, window_bounds = array<i64: 32, 1>}, {pipeline_mode = #tpu.pipeline_mode<synchronous>, transform_indices = @transform_5, window_bounds = array<i64: 3, 16, 96>}, {pipeline_mode = #tpu.pipeline_mode<synchronous>, transform_indices = @transform_6, window_bounds = array<i64: 16, 1>}, {pipeline_mode = #tpu.pipeline_mode<synchronous>, transform_indices = @transform_7, window_bounds = array<i64: 3, 3, 48>}, {pipeline_mode = #tpu.pipeline_mode<synchronous>, transform_indices = @transform_8, window_bounds = array<i64: 3, 1>}, {transform_indices = @transform_9, window_bounds = array<i64: 1, 3, 256>}]} {
    %c0 = arith.constant 0 : index
    %c0_0 = arith.constant 0 : index
    %c0_1 = arith.constant 0 : index
    %0 = vector.load %arg1[%c0, %c0_0, %c0_1] : memref<1x16x256xf32, #tpu.memory_space<vmem>>, vector<1x16x256xf32>
    %1 = vector.shape_cast %0 : vector<1x16x256xf32> to vector<16x256xf32>
    %2 = arith.truncf %1 : vector<16x256xf32> to vector<16x256xbf16>
    %3 = tpu.iota {dimensions = array<i32: 1>} : vector<1x256xi32>
    %c16_i32 = arith.constant 16 : i32
    %c0_i32 = arith.constant 0 : i32
    %4 = arith.cmpi eq, %c16_i32, %c0_i32 : i32
    %c1_i32 = arith.constant 1 : i32
    %5 = arith.select %4, %c1_i32, %c16_i32 : i32
    %6 = vector.broadcast %5 : i32 to vector<1x256xi32>
    %7 = arith.remsi %3, %6 : vector<1x256xi32>
    %c0_i32_2 = arith.constant 0 : i32
    %8 = vector.broadcast %c0_i32_2 : i32 to vector<1x256xi32>
    %9 = arith.cmpi ne, %7, %8 : vector<1x256xi32>
    %c0_i32_3 = arith.constant 0 : i32
    %10 = vector.broadcast %c0_i32_3 : i32 to vector<1x256xi32>
    %11 = arith.cmpi slt, %7, %10 : vector<1x256xi32>
    %c0_i32_4 = arith.constant 0 : i32
    %12 = arith.cmpi slt, %5, %c0_i32_4 : i32
    %13 = vector.broadcast %12 : i1 to vector<1x256xi1>
    %14 = vector.broadcast %13 : vector<1x256xi1> to vector<1x256xi1>
    %15 = arith.xori %11, %14 : vector<1x256xi1>
    %16 = arith.andi %15, %9 : vector<1x256xi1>
    %17 = vector.broadcast %5 : i32 to vector<1x256xi32>
    %18 = arith.addi %7, %17 : vector<1x256xi32>
    %19 = arith.select %16, %18, %7 : vector<1x256xi1>, vector<1x256xi32>
    %cst = arith.constant 0.000000e+00 : bf16
    %20 = vector.broadcast %cst : bf16 to vector<16x128xbf16>
    %21 = tpu.concatenate %20, %2 in 1 : vector<16x128xbf16>, vector<16x256xbf16> -> vector<16x384xbf16>
    %22 = vector.extract_strided_slice %21 {offsets = [0, 123], sizes = [16, 256], strides = [1, 1]} : vector<16x384xbf16> to vector<16x256xbf16>
    %c-5_i32 = arith.constant -5 : i32
    %23 = vector.broadcast %c-5_i32 : i32 to vector<1x256xi32>
    %24 = arith.addi %19, %23 : vector<1x256xi32>
    %c0_i32_5 = arith.constant 0 : i32
    %25 = vector.broadcast %c0_i32_5 : i32 to vector<1x256xi32>
    %26 = arith.cmpi sge, %24, %25 : vector<1x256xi32>
    %c-5_i32_6 = arith.constant -5 : i32
    %27 = vector.broadcast %c-5_i32_6 : i32 to vector<1x256xi32>
    %28 = arith.addi %19, %27 : vector<1x256xi32>
    %c16_i32_7 = arith.constant 16 : i32
    %29 = vector.broadcast %c16_i32_7 : i32 to vector<1x256xi32>
    %30 = arith.cmpi slt, %28, %29 : vector<1x256xi32>
    %31 = arith.andi %26, %30 : vector<1x256xi1>
    %cst_8 = arith.constant 0.000000e+00 : bf16
    %32 = vector.broadcast %cst_8 : bf16 to vector<16x256xbf16>
    %33 = vector.shape_cast %31 : vector<1x256xi1> to vector<1x256xi1>
    %34 = vector.broadcast %33 : vector<1x256xi1> to vector<16x256xi1>
    %35 = arith.select %34, %22, %32 : vector<16x256xi1>, vector<16x256xbf16>
    %cst_9 = arith.constant 0.000000e+00 : bf16
    %36 = vector.broadcast %cst_9 : bf16 to vector<16x128xbf16>
    %37 = tpu.concatenate %36, %2 in 1 : vector<16x128xbf16>, vector<16x256xbf16> -> vector<16x384xbf16>
    %38 = vector.extract_strided_slice %37 {offsets = [0, 124], sizes = [16, 256], strides = [1, 1]} : vector<16x384xbf16> to vector<16x256xbf16>
    %c-4_i32 = arith.constant -4 : i32
    %39 = vector.broadcast %c-4_i32 : i32 to vector<1x256xi32>
    %40 = arith.addi %19, %39 : vector<1x256xi32>
    %c0_i32_10 = arith.constant 0 : i32
    %41 = vector.broadcast %c0_i32_10 : i32 to vector<1x256xi32>
    %42 = arith.cmpi sge, %40, %41 : vector<1x256xi32>
    %c-4_i32_11 = arith.constant -4 : i32
    %43 = vector.broadcast %c-4_i32_11 : i32 to vector<1x256xi32>
    %44 = arith.addi %19, %43 : vector<1x256xi32>
    %c16_i32_12 = arith.constant 16 : i32
    %45 = vector.broadcast %c16_i32_12 : i32 to vector<1x256xi32>
    %46 = arith.cmpi slt, %44, %45 : vector<1x256xi32>
    %47 = arith.andi %42, %46 : vector<1x256xi1>
    %cst_13 = arith.constant 0.000000e+00 : bf16
    %48 = vector.broadcast %cst_13 : bf16 to vector<16x256xbf16>
    %49 = vector.shape_cast %47 : vector<1x256xi1> to vector<1x256xi1>
    %50 = vector.broadcast %49 : vector<1x256xi1> to vector<16x256xi1>
    %51 = arith.select %50, %38, %48 : vector<16x256xi1>, vector<16x256xbf16>
    %cst_14 = arith.constant 0.000000e+00 : bf16
    %52 = vector.broadcast %cst_14 : bf16 to vector<16x128xbf16>
    %53 = tpu.concatenate %52, %2 in 1 : vector<16x128xbf16>, vector<16x256xbf16> -> vector<16x384xbf16>
    %54 = vector.extract_strided_slice %53 {offsets = [0, 125], sizes = [16, 256], strides = [1, 1]} : vector<16x384xbf16> to vector<16x256xbf16>
    %c-3_i32 = arith.constant -3 : i32
    %55 = vector.broadcast %c-3_i32 : i32 to vector<1x256xi32>
    %56 = arith.addi %19, %55 : vector<1x256xi32>
    %c0_i32_15 = arith.constant 0 : i32
    %57 = vector.broadcast %c0_i32_15 : i32 to vector<1x256xi32>
    %58 = arith.cmpi sge, %56, %57 : vector<1x256xi32>
    %c-3_i32_16 = arith.constant -3 : i32
    %59 = vector.broadcast %c-3_i32_16 : i32 to vector<1x256xi32>
    %60 = arith.addi %19, %59 : vector<1x256xi32>
    %c16_i32_17 = arith.constant 16 : i32
    %61 = vector.broadcast %c16_i32_17 : i32 to vector<1x256xi32>
    %62 = arith.cmpi slt, %60, %61 : vector<1x256xi32>
    %63 = arith.andi %58, %62 : vector<1x256xi1>
    %cst_18 = arith.constant 0.000000e+00 : bf16
    %64 = vector.broadcast %cst_18 : bf16 to vector<16x256xbf16>
    %65 = vector.shape_cast %63 : vector<1x256xi1> to vector<1x256xi1>
    %66 = vector.broadcast %65 : vector<1x256xi1> to vector<16x256xi1>
    %67 = arith.select %66, %54, %64 : vector<16x256xi1>, vector<16x256xbf16>
    %cst_19 = arith.constant 0.000000e+00 : bf16
    %68 = vector.broadcast %cst_19 : bf16 to vector<16x128xbf16>
    %69 = tpu.concatenate %68, %2 in 1 : vector<16x128xbf16>, vector<16x256xbf16> -> vector<16x384xbf16>
    %70 = vector.extract_strided_slice %69 {offsets = [0, 126], sizes = [16, 256], strides = [1, 1]} : vector<16x384xbf16> to vector<16x256xbf16>
    %c-2_i32 = arith.constant -2 : i32
    %71 = vector.broadcast %c-2_i32 : i32 to vector<1x256xi32>
    %72 = arith.addi %19, %71 : vector<1x256xi32>
    %c0_i32_20 = arith.constant 0 : i32
    %73 = vector.broadcast %c0_i32_20 : i32 to vector<1x256xi32>
    %74 = arith.cmpi sge, %72, %73 : vector<1x256xi32>
    %c-2_i32_21 = arith.constant -2 : i32
    %75 = vector.broadcast %c-2_i32_21 : i32 to vector<1x256xi32>
    %76 = arith.addi %19, %75 : vector<1x256xi32>
    %c16_i32_22 = arith.constant 16 : i32
    %77 = vector.broadcast %c16_i32_22 : i32 to vector<1x256xi32>
    %78 = arith.cmpi slt, %76, %77 : vector<1x256xi32>
    %79 = arith.andi %74, %78 : vector<1x256xi1>
    %cst_23 = arith.constant 0.000000e+00 : bf16
    %80 = vector.broadcast %cst_23 : bf16 to vector<16x256xbf16>
    %81 = vector.shape_cast %79 : vector<1x256xi1> to vector<1x256xi1>
    %82 = vector.broadcast %81 : vector<1x256xi1> to vector<16x256xi1>
    %83 = arith.select %82, %70, %80 : vector<16x256xi1>, vector<16x256xbf16>
    %cst_24 = arith.constant 0.000000e+00 : bf16
    %84 = vector.broadcast %cst_24 : bf16 to vector<16x128xbf16>
    %85 = tpu.concatenate %84, %2 in 1 : vector<16x128xbf16>, vector<16x256xbf16> -> vector<16x384xbf16>
    %86 = vector.extract_strided_slice %85 {offsets = [0, 127], sizes = [16, 256], strides = [1, 1]} : vector<16x384xbf16> to vector<16x256xbf16>
    %c-1_i32 = arith.constant -1 : i32
    %87 = vector.broadcast %c-1_i32 : i32 to vector<1x256xi32>
    %88 = arith.addi %19, %87 : vector<1x256xi32>
    %c0_i32_25 = arith.constant 0 : i32
    %89 = vector.broadcast %c0_i32_25 : i32 to vector<1x256xi32>
    %90 = arith.cmpi sge, %88, %89 : vector<1x256xi32>
    %c-1_i32_26 = arith.constant -1 : i32
    %91 = vector.broadcast %c-1_i32_26 : i32 to vector<1x256xi32>
    %92 = arith.addi %19, %91 : vector<1x256xi32>
    %c16_i32_27 = arith.constant 16 : i32
    %93 = vector.broadcast %c16_i32_27 : i32 to vector<1x256xi32>
    %94 = arith.cmpi slt, %92, %93 : vector<1x256xi32>
    %95 = arith.andi %90, %94 : vector<1x256xi1>
    %cst_28 = arith.constant 0.000000e+00 : bf16
    %96 = vector.broadcast %cst_28 : bf16 to vector<16x256xbf16>
    %97 = vector.shape_cast %95 : vector<1x256xi1> to vector<1x256xi1>
    %98 = vector.broadcast %97 : vector<1x256xi1> to vector<16x256xi1>
    %99 = arith.select %98, %86, %96 : vector<16x256xi1>, vector<16x256xbf16>
    %c0_i32_29 = arith.constant 0 : i32
    %100 = vector.broadcast %c0_i32_29 : i32 to vector<1x256xi32>
    %101 = arith.addi %19, %100 : vector<1x256xi32>
    %c0_i32_30 = arith.constant 0 : i32
    %102 = vector.broadcast %c0_i32_30 : i32 to vector<1x256xi32>
    %103 = arith.cmpi sge, %101, %102 : vector<1x256xi32>
    %c0_i32_31 = arith.constant 0 : i32
    %104 = vector.broadcast %c0_i32_31 : i32 to vector<1x256xi32>
    %105 = arith.addi %19, %104 : vector<1x256xi32>
    %c16_i32_32 = arith.constant 16 : i32
    %106 = vector.broadcast %c16_i32_32 : i32 to vector<1x256xi32>
    %107 = arith.cmpi slt, %105, %106 : vector<1x256xi32>
    %108 = arith.andi %103, %107 : vector<1x256xi1>
    %cst_33 = arith.constant 0.000000e+00 : bf16
    %109 = vector.broadcast %cst_33 : bf16 to vector<16x256xbf16>
    %110 = vector.shape_cast %108 : vector<1x256xi1> to vector<1x256xi1>
    %111 = vector.broadcast %110 : vector<1x256xi1> to vector<16x256xi1>
    %112 = arith.select %111, %2, %109 : vector<16x256xi1>, vector<16x256xbf16>
    %cst_34 = arith.constant 0.000000e+00 : bf16
    %113 = vector.broadcast %cst_34 : bf16 to vector<16x128xbf16>
    %114 = tpu.concatenate %2, %113 in 1 : vector<16x256xbf16>, vector<16x128xbf16> -> vector<16x384xbf16>
    %115 = vector.extract_strided_slice %114 {offsets = [0, 1], sizes = [16, 256], strides = [1, 1]} : vector<16x384xbf16> to vector<16x256xbf16>
    %c1_i32_35 = arith.constant 1 : i32
    %116 = vector.broadcast %c1_i32_35 : i32 to vector<1x256xi32>
    %117 = arith.addi %19, %116 : vector<1x256xi32>
    %c0_i32_36 = arith.constant 0 : i32
    %118 = vector.broadcast %c0_i32_36 : i32 to vector<1x256xi32>
    %119 = arith.cmpi sge, %117, %118 : vector<1x256xi32>
    %c1_i32_37 = arith.constant 1 : i32
    %120 = vector.broadcast %c1_i32_37 : i32 to vector<1x256xi32>
    %121 = arith.addi %19, %120 : vector<1x256xi32>
    %c16_i32_38 = arith.constant 16 : i32
    %122 = vector.broadcast %c16_i32_38 : i32 to vector<1x256xi32>
    %123 = arith.cmpi slt, %121, %122 : vector<1x256xi32>
    %124 = arith.andi %119, %123 : vector<1x256xi1>
    %cst_39 = arith.constant 0.000000e+00 : bf16
    %125 = vector.broadcast %cst_39 : bf16 to vector<16x256xbf16>
    %126 = vector.shape_cast %124 : vector<1x256xi1> to vector<1x256xi1>
    %127 = vector.broadcast %126 : vector<1x256xi1> to vector<16x256xi1>
    %128 = arith.select %127, %115, %125 : vector<16x256xi1>, vector<16x256xbf16>
    %cst_40 = arith.constant 0.000000e+00 : bf16
    %129 = vector.broadcast %cst_40 : bf16 to vector<16x128xbf16>
    %130 = tpu.concatenate %2, %129 in 1 : vector<16x256xbf16>, vector<16x128xbf16> -> vector<16x384xbf16>
    %131 = vector.extract_strided_slice %130 {offsets = [0, 2], sizes = [16, 256], strides = [1, 1]} : vector<16x384xbf16> to vector<16x256xbf16>
    %c2_i32 = arith.constant 2 : i32
    %132 = vector.broadcast %c2_i32 : i32 to vector<1x256xi32>
    %133 = arith.addi %19, %132 : vector<1x256xi32>
    %c0_i32_41 = arith.constant 0 : i32
    %134 = vector.broadcast %c0_i32_41 : i32 to vector<1x256xi32>
    %135 = arith.cmpi sge, %133, %134 : vector<1x256xi32>
    %c2_i32_42 = arith.constant 2 : i32
    %136 = vector.broadcast %c2_i32_42 : i32 to vector<1x256xi32>
    %137 = arith.addi %19, %136 : vector<1x256xi32>
    %c16_i32_43 = arith.constant 16 : i32
    %138 = vector.broadcast %c16_i32_43 : i32 to vector<1x256xi32>
    %139 = arith.cmpi slt, %137, %138 : vector<1x256xi32>
    %140 = arith.andi %135, %139 : vector<1x256xi1>
    %cst_44 = arith.constant 0.000000e+00 : bf16
    %141 = vector.broadcast %cst_44 : bf16 to vector<16x256xbf16>
    %142 = vector.shape_cast %140 : vector<1x256xi1> to vector<1x256xi1>
    %143 = vector.broadcast %142 : vector<1x256xi1> to vector<16x256xi1>
    %144 = arith.select %143, %131, %141 : vector<16x256xi1>, vector<16x256xbf16>
    %cst_45 = arith.constant 0.000000e+00 : bf16
    %145 = vector.broadcast %cst_45 : bf16 to vector<16x128xbf16>
    %146 = tpu.concatenate %2, %145 in 1 : vector<16x256xbf16>, vector<16x128xbf16> -> vector<16x384xbf16>
    %147 = vector.extract_strided_slice %146 {offsets = [0, 3], sizes = [16, 256], strides = [1, 1]} : vector<16x384xbf16> to vector<16x256xbf16>
    %c3_i32 = arith.constant 3 : i32
    %148 = vector.broadcast %c3_i32 : i32 to vector<1x256xi32>
    %149 = arith.addi %19, %148 : vector<1x256xi32>
    %c0_i32_46 = arith.constant 0 : i32
    %150 = vector.broadcast %c0_i32_46 : i32 to vector<1x256xi32>
    %151 = arith.cmpi sge, %149, %150 : vector<1x256xi32>
    %c3_i32_47 = arith.constant 3 : i32
    %152 = vector.broadcast %c3_i32_47 : i32 to vector<1x256xi32>
    %153 = arith.addi %19, %152 : vector<1x256xi32>
    %c16_i32_48 = arith.constant 16 : i32
    %154 = vector.broadcast %c16_i32_48 : i32 to vector<1x256xi32>
    %155 = arith.cmpi slt, %153, %154 : vector<1x256xi32>
    %156 = arith.andi %151, %155 : vector<1x256xi1>
    %cst_49 = arith.constant 0.000000e+00 : bf16
    %157 = vector.broadcast %cst_49 : bf16 to vector<16x256xbf16>
    %158 = vector.shape_cast %156 : vector<1x256xi1> to vector<1x256xi1>
    %159 = vector.broadcast %158 : vector<1x256xi1> to vector<16x256xi1>
    %160 = arith.select %159, %147, %157 : vector<16x256xi1>, vector<16x256xbf16>
    %cst_50 = arith.constant 0.000000e+00 : bf16
    %161 = vector.broadcast %cst_50 : bf16 to vector<16x128xbf16>
    %162 = tpu.concatenate %2, %161 in 1 : vector<16x256xbf16>, vector<16x128xbf16> -> vector<16x384xbf16>
    %163 = vector.extract_strided_slice %162 {offsets = [0, 4], sizes = [16, 256], strides = [1, 1]} : vector<16x384xbf16> to vector<16x256xbf16>
    %c4_i32 = arith.constant 4 : i32
    %164 = vector.broadcast %c4_i32 : i32 to vector<1x256xi32>
    %165 = arith.addi %19, %164 : vector<1x256xi32>
    %c0_i32_51 = arith.constant 0 : i32
    %166 = vector.broadcast %c0_i32_51 : i32 to vector<1x256xi32>
    %167 = arith.cmpi sge, %165, %166 : vector<1x256xi32>
    %c4_i32_52 = arith.constant 4 : i32
    %168 = vector.broadcast %c4_i32_52 : i32 to vector<1x256xi32>
    %169 = arith.addi %19, %168 : vector<1x256xi32>
    %c16_i32_53 = arith.constant 16 : i32
    %170 = vector.broadcast %c16_i32_53 : i32 to vector<1x256xi32>
    %171 = arith.cmpi slt, %169, %170 : vector<1x256xi32>
    %172 = arith.andi %167, %171 : vector<1x256xi1>
    %cst_54 = arith.constant 0.000000e+00 : bf16
    %173 = vector.broadcast %cst_54 : bf16 to vector<16x256xbf16>
    %174 = vector.shape_cast %172 : vector<1x256xi1> to vector<1x256xi1>
    %175 = vector.broadcast %174 : vector<1x256xi1> to vector<16x256xi1>
    %176 = arith.select %175, %163, %173 : vector<16x256xi1>, vector<16x256xbf16>
    %cst_55 = arith.constant 0.000000e+00 : bf16
    %177 = vector.broadcast %cst_55 : bf16 to vector<16x128xbf16>
    %178 = tpu.concatenate %2, %177 in 1 : vector<16x256xbf16>, vector<16x128xbf16> -> vector<16x384xbf16>
    %179 = vector.extract_strided_slice %178 {offsets = [0, 5], sizes = [16, 256], strides = [1, 1]} : vector<16x384xbf16> to vector<16x256xbf16>
    %c5_i32 = arith.constant 5 : i32
    %180 = vector.broadcast %c5_i32 : i32 to vector<1x256xi32>
    %181 = arith.addi %19, %180 : vector<1x256xi32>
    %c0_i32_56 = arith.constant 0 : i32
    %182 = vector.broadcast %c0_i32_56 : i32 to vector<1x256xi32>
    %183 = arith.cmpi sge, %181, %182 : vector<1x256xi32>
    %c5_i32_57 = arith.constant 5 : i32
    %184 = vector.broadcast %c5_i32_57 : i32 to vector<1x256xi32>
    %185 = arith.addi %19, %184 : vector<1x256xi32>
    %c16_i32_58 = arith.constant 16 : i32
    %186 = vector.broadcast %c16_i32_58 : i32 to vector<1x256xi32>
    %187 = arith.cmpi slt, %185, %186 : vector<1x256xi32>
    %188 = arith.andi %183, %187 : vector<1x256xi1>
    %cst_59 = arith.constant 0.000000e+00 : bf16
    %189 = vector.broadcast %cst_59 : bf16 to vector<16x256xbf16>
    %190 = vector.shape_cast %188 : vector<1x256xi1> to vector<1x256xi1>
    %191 = vector.broadcast %190 : vector<1x256xi1> to vector<16x256xi1>
    %192 = arith.select %191, %179, %189 : vector<16x256xi1>, vector<16x256xbf16>
    %193 = tpu.concatenate %35, %51, %67, %83, %99, %112, %128, %144, %160, %176, %192 in 0 : vector<16x256xbf16>, vector<16x256xbf16>, vector<16x256xbf16>, vector<16x256xbf16>, vector<16x256xbf16>, vector<16x256xbf16>, vector<16x256xbf16>, vector<16x256xbf16>, vector<16x256xbf16>, vector<16x256xbf16>, vector<16x256xbf16> -> vector<176x256xbf16>
    %cst_60 = arith.constant 0.000000e+00 : f32
    %194 = vector.broadcast %cst_60 : f32 to vector<16x256xf32>
    %cst_61 = arith.constant 0.000000e+00 : bf16
    %195 = vector.broadcast %cst_61 : bf16 to vector<176x128xbf16>
    %196 = tpu.concatenate %195, %193 in 1 : vector<176x128xbf16>, vector<176x256xbf16> -> vector<176x384xbf16>
    %197 = vector.extract_strided_slice %196 {offsets = [0, 48], sizes = [176, 256], strides = [1, 1]} : vector<176x384xbf16> to vector<176x256xbf16>
    %c0_62 = arith.constant 0 : index
    %c0_63 = arith.constant 0 : index
    %c0_64 = arith.constant 0 : index
    %198 = vector.load %arg2[%c0_62, %c0_63, %c0_64] : memref<11x16x176xbf16, #tpu.memory_space<vmem>>, vector<1x16x176xbf16>
    %199 = vector.shape_cast %198 : vector<1x16x176xbf16> to vector<16x176xbf16>
    %cst_65 = arith.constant dense<0.000000e+00> : vector<16x256xf32>
    %200 = tpu.matmul %199, %197, %cst_65 {dimension_numbers = #tpu.dot_dimension_numbers<[1], [0], [0], [1], [0, 0, 1, 1], [], []>} : vector<16x176xbf16>, vector<176x256xbf16>, vector<16x256xf32> -> vector<16x256xf32>
    %201 = arith.addf %194, %200 : vector<16x256xf32>
    %cst_66 = arith.constant 0.000000e+00 : bf16
    %202 = vector.broadcast %cst_66 : bf16 to vector<176x128xbf16>
    %203 = tpu.concatenate %202, %193 in 1 : vector<176x128xbf16>, vector<176x256xbf16> -> vector<176x384xbf16>
    %204 = vector.extract_strided_slice %203 {offsets = [0, 64], sizes = [176, 256], strides = [1, 1]} : vector<176x384xbf16> to vector<176x256xbf16>
    %c1 = arith.constant 1 : index
    %c0_67 = arith.constant 0 : index
    %c0_68 = arith.constant 0 : index
    %205 = vector.load %arg2[%c1, %c0_67, %c0_68] : memref<11x16x176xbf16, #tpu.memory_space<vmem>>, vector<1x16x176xbf16>
    %206 = vector.shape_cast %205 : vector<1x16x176xbf16> to vector<16x176xbf16>
    %cst_69 = arith.constant dense<0.000000e+00> : vector<16x256xf32>
    %207 = tpu.matmul %206, %204, %cst_69 {dimension_numbers = #tpu.dot_dimension_numbers<[1], [0], [0], [1], [0, 0, 1, 1], [], []>} : vector<16x176xbf16>, vector<176x256xbf16>, vector<16x256xf32> -> vector<16x256xf32>
    %208 = arith.addf %201, %207 : vector<16x256xf32>
    %cst_70 = arith.constant 0.000000e+00 : bf16
    %209 = vector.broadcast %cst_70 : bf16 to vector<176x128xbf16>
    %210 = tpu.concatenate %209, %193 in 1 : vector<176x128xbf16>, vector<176x256xbf16> -> vector<176x384xbf16>
    %211 = vector.extract_strided_slice %210 {offsets = [0, 80], sizes = [176, 256], strides = [1, 1]} : vector<176x384xbf16> to vector<176x256xbf16>
    %c2 = arith.constant 2 : index
    %c0_71 = arith.constant 0 : index
    %c0_72 = arith.constant 0 : index
    %212 = vector.load %arg2[%c2, %c0_71, %c0_72] : memref<11x16x176xbf16, #tpu.memory_space<vmem>>, vector<1x16x176xbf16>
    %213 = vector.shape_cast %212 : vector<1x16x176xbf16> to vector<16x176xbf16>
    %cst_73 = arith.constant dense<0.000000e+00> : vector<16x256xf32>
    %214 = tpu.matmul %213, %211, %cst_73 {dimension_numbers = #tpu.dot_dimension_numbers<[1], [0], [0], [1], [0, 0, 1, 1], [], []>} : vector<16x176xbf16>, vector<176x256xbf16>, vector<16x256xf32> -> vector<16x256xf32>
    %215 = arith.addf %208, %214 : vector<16x256xf32>
    %cst_74 = arith.constant 0.000000e+00 : bf16
    %216 = vector.broadcast %cst_74 : bf16 to vector<176x128xbf16>
    %217 = tpu.concatenate %216, %193 in 1 : vector<176x128xbf16>, vector<176x256xbf16> -> vector<176x384xbf16>
    %218 = vector.extract_strided_slice %217 {offsets = [0, 96], sizes = [176, 256], strides = [1, 1]} : vector<176x384xbf16> to vector<176x256xbf16>
    %c3 = arith.constant 3 : index
    %c0_75 = arith.constant 0 : index
    %c0_76 = arith.constant 0 : index
    %219 = vector.load %arg2[%c3, %c0_75, %c0_76] : memref<11x16x176xbf16, #tpu.memory_space<vmem>>, vector<1x16x176xbf16>
    %220 = vector.shape_cast %219 : vector<1x16x176xbf16> to vector<16x176xbf16>
    %cst_77 = arith.constant dense<0.000000e+00> : vector<16x256xf32>
    %221 = tpu.matmul %220, %218, %cst_77 {dimension_numbers = #tpu.dot_dimension_numbers<[1], [0], [0], [1], [0, 0, 1, 1], [], []>} : vector<16x176xbf16>, vector<176x256xbf16>, vector<16x256xf32> -> vector<16x256xf32>
    %222 = arith.addf %215, %221 : vector<16x256xf32>
    %cst_78 = arith.constant 0.000000e+00 : bf16
    %223 = vector.broadcast %cst_78 : bf16 to vector<176x128xbf16>
    %224 = tpu.concatenate %223, %193 in 1 : vector<176x128xbf16>, vector<176x256xbf16> -> vector<176x384xbf16>
    %225 = vector.extract_strided_slice %224 {offsets = [0, 112], sizes = [176, 256], strides = [1, 1]} : vector<176x384xbf16> to vector<176x256xbf16>
    %c4 = arith.constant 4 : index
    %c0_79 = arith.constant 0 : index
    %c0_80 = arith.constant 0 : index
    %226 = vector.load %arg2[%c4, %c0_79, %c0_80] : memref<11x16x176xbf16, #tpu.memory_space<vmem>>, vector<1x16x176xbf16>
    %227 = vector.shape_cast %226 : vector<1x16x176xbf16> to vector<16x176xbf16>
    %cst_81 = arith.constant dense<0.000000e+00> : vector<16x256xf32>
    %228 = tpu.matmul %227, %225, %cst_81 {dimension_numbers = #tpu.dot_dimension_numbers<[1], [0], [0], [1], [0, 0, 1, 1], [], []>} : vector<16x176xbf16>, vector<176x256xbf16>, vector<16x256xf32> -> vector<16x256xf32>
    %229 = arith.addf %222, %228 : vector<16x256xf32>
    %c5 = arith.constant 5 : index
    %c0_82 = arith.constant 0 : index
    %c0_83 = arith.constant 0 : index
    %230 = vector.load %arg2[%c5, %c0_82, %c0_83] : memref<11x16x176xbf16, #tpu.memory_space<vmem>>, vector<1x16x176xbf16>
    %231 = vector.shape_cast %230 : vector<1x16x176xbf16> to vector<16x176xbf16>
    %cst_84 = arith.constant dense<0.000000e+00> : vector<16x256xf32>
    %232 = tpu.matmul %231, %193, %cst_84 {dimension_numbers = #tpu.dot_dimension_numbers<[1], [0], [0], [1], [0, 0, 1, 1], [], []>} : vector<16x176xbf16>, vector<176x256xbf16>, vector<16x256xf32> -> vector<16x256xf32>
    %233 = arith.addf %229, %232 : vector<16x256xf32>
    %cst_85 = arith.constant 0.000000e+00 : bf16
    %234 = vector.broadcast %cst_85 : bf16 to vector<176x128xbf16>
    %235 = tpu.concatenate %193, %234 in 1 : vector<176x256xbf16>, vector<176x128xbf16> -> vector<176x384xbf16>
    %236 = vector.extract_strided_slice %235 {offsets = [0, 16], sizes = [176, 256], strides = [1, 1]} : vector<176x384xbf16> to vector<176x256xbf16>
    %c6 = arith.constant 6 : index
    %c0_86 = arith.constant 0 : index
    %c0_87 = arith.constant 0 : index
    %237 = vector.load %arg2[%c6, %c0_86, %c0_87] : memref<11x16x176xbf16, #tpu.memory_space<vmem>>, vector<1x16x176xbf16>
    %238 = vector.shape_cast %237 : vector<1x16x176xbf16> to vector<16x176xbf16>
    %cst_88 = arith.constant dense<0.000000e+00> : vector<16x256xf32>
    %239 = tpu.matmul %238, %236, %cst_88 {dimension_numbers = #tpu.dot_dimension_numbers<[1], [0], [0], [1], [0, 0, 1, 1], [], []>} : vector<16x176xbf16>, vector<176x256xbf16>, vector<16x256xf32> -> vector<16x256xf32>
    %240 = arith.addf %233, %239 : vector<16x256xf32>
    %cst_89 = arith.constant 0.000000e+00 : bf16
    %241 = vector.broadcast %cst_89 : bf16 to vector<176x128xbf16>
    %242 = tpu.concatenate %193, %241 in 1 : vector<176x256xbf16>, vector<176x128xbf16> -> vector<176x384xbf16>
    %243 = vector.extract_strided_slice %242 {offsets = [0, 32], sizes = [176, 256], strides = [1, 1]} : vector<176x384xbf16> to vector<176x256xbf16>
    %c7 = arith.constant 7 : index
    %c0_90 = arith.constant 0 : index
    %c0_91 = arith.constant 0 : index
    %244 = vector.load %arg2[%c7, %c0_90, %c0_91] : memref<11x16x176xbf16, #tpu.memory_space<vmem>>, vector<1x16x176xbf16>
    %245 = vector.shape_cast %244 : vector<1x16x176xbf16> to vector<16x176xbf16>
    %cst_92 = arith.constant dense<0.000000e+00> : vector<16x256xf32>
    %246 = tpu.matmul %245, %243, %cst_92 {dimension_numbers = #tpu.dot_dimension_numbers<[1], [0], [0], [1], [0, 0, 1, 1], [], []>} : vector<16x176xbf16>, vector<176x256xbf16>, vector<16x256xf32> -> vector<16x256xf32>
    %247 = arith.addf %240, %246 : vector<16x256xf32>
    %cst_93 = arith.constant 0.000000e+00 : bf16
    %248 = vector.broadcast %cst_93 : bf16 to vector<176x128xbf16>
    %249 = tpu.concatenate %193, %248 in 1 : vector<176x256xbf16>, vector<176x128xbf16> -> vector<176x384xbf16>
    %250 = vector.extract_strided_slice %249 {offsets = [0, 48], sizes = [176, 256], strides = [1, 1]} : vector<176x384xbf16> to vector<176x256xbf16>
    %c8 = arith.constant 8 : index
    %c0_94 = arith.constant 0 : index
    %c0_95 = arith.constant 0 : index
    %251 = vector.load %arg2[%c8, %c0_94, %c0_95] : memref<11x16x176xbf16, #tpu.memory_space<vmem>>, vector<1x16x176xbf16>
    %252 = vector.shape_cast %251 : vector<1x16x176xbf16> to vector<16x176xbf16>
    %cst_96 = arith.constant dense<0.000000e+00> : vector<16x256xf32>
    %253 = tpu.matmul %252, %250, %cst_96 {dimension_numbers = #tpu.dot_dimension_numbers<[1], [0], [0], [1], [0, 0, 1, 1], [], []>} : vector<16x176xbf16>, vector<176x256xbf16>, vector<16x256xf32> -> vector<16x256xf32>
    %254 = arith.addf %247, %253 : vector<16x256xf32>
    %cst_97 = arith.constant 0.000000e+00 : bf16
    %255 = vector.broadcast %cst_97 : bf16 to vector<176x128xbf16>
    %256 = tpu.concatenate %193, %255 in 1 : vector<176x256xbf16>, vector<176x128xbf16> -> vector<176x384xbf16>
    %257 = vector.extract_strided_slice %256 {offsets = [0, 64], sizes = [176, 256], strides = [1, 1]} : vector<176x384xbf16> to vector<176x256xbf16>
    %c9 = arith.constant 9 : index
    %c0_98 = arith.constant 0 : index
    %c0_99 = arith.constant 0 : index
    %258 = vector.load %arg2[%c9, %c0_98, %c0_99] : memref<11x16x176xbf16, #tpu.memory_space<vmem>>, vector<1x16x176xbf16>
    %259 = vector.shape_cast %258 : vector<1x16x176xbf16> to vector<16x176xbf16>
    %cst_100 = arith.constant dense<0.000000e+00> : vector<16x256xf32>
    %260 = tpu.matmul %259, %257, %cst_100 {dimension_numbers = #tpu.dot_dimension_numbers<[1], [0], [0], [1], [0, 0, 1, 1], [], []>} : vector<16x176xbf16>, vector<176x256xbf16>, vector<16x256xf32> -> vector<16x256xf32>
    %261 = arith.addf %254, %260 : vector<16x256xf32>
    %cst_101 = arith.constant 0.000000e+00 : bf16
    %262 = vector.broadcast %cst_101 : bf16 to vector<176x128xbf16>
    %263 = tpu.concatenate %193, %262 in 1 : vector<176x256xbf16>, vector<176x128xbf16> -> vector<176x384xbf16>
    %264 = vector.extract_strided_slice %263 {offsets = [0, 80], sizes = [176, 256], strides = [1, 1]} : vector<176x384xbf16> to vector<176x256xbf16>
    %c10 = arith.constant 10 : index
    %c0_102 = arith.constant 0 : index
    %c0_103 = arith.constant 0 : index
    %265 = vector.load %arg2[%c10, %c0_102, %c0_103] : memref<11x16x176xbf16, #tpu.memory_space<vmem>>, vector<1x16x176xbf16>
    %266 = vector.shape_cast %265 : vector<1x16x176xbf16> to vector<16x176xbf16>
    %cst_104 = arith.constant dense<0.000000e+00> : vector<16x256xf32>
    %267 = tpu.matmul %266, %264, %cst_104 {dimension_numbers = #tpu.dot_dimension_numbers<[1], [0], [0], [1], [0, 0, 1, 1], [], []>} : vector<16x176xbf16>, vector<176x256xbf16>, vector<16x256xf32> -> vector<16x256xf32>
    %268 = arith.addf %261, %267 : vector<16x256xf32>
    %c0_105 = arith.constant 0 : index
    %c0_106 = arith.constant 0 : index
    %269 = vector.load %arg3[%c0_105, %c0_106] : memref<16x1xf32, #tpu.memory_space<vmem>>, vector<16x1xf32>
    %270 = vector.broadcast %269 : vector<16x1xf32> to vector<16x256xf32>
    %271 = arith.addf %268, %270 : vector<16x256xf32>
    %272 = arith.truncf %271 : vector<16x256xf32> to vector<16x256xbf16>
    %273 = tpu.iota {dimensions = array<i32: 1>} : vector<1x256xi32>
    %c16_i32_107 = arith.constant 16 : i32
    %c0_i32_108 = arith.constant 0 : i32
    %274 = arith.cmpi eq, %c16_i32_107, %c0_i32_108 : i32
    %c1_i32_109 = arith.constant 1 : i32
    %275 = arith.select %274, %c1_i32_109, %c16_i32_107 : i32
    %276 = vector.broadcast %275 : i32 to vector<1x256xi32>
    %277 = arith.remsi %273, %276 : vector<1x256xi32>
    %c0_i32_110 = arith.constant 0 : i32
    %278 = vector.broadcast %c0_i32_110 : i32 to vector<1x256xi32>
    %279 = arith.cmpi ne, %277, %278 : vector<1x256xi32>
    %c0_i32_111 = arith.constant 0 : i32
    %280 = vector.broadcast %c0_i32_111 : i32 to vector<1x256xi32>
    %281 = arith.cmpi slt, %277, %280 : vector<1x256xi32>
    %c0_i32_112 = arith.constant 0 : i32
    %282 = arith.cmpi slt, %275, %c0_i32_112 : i32
    %283 = vector.broadcast %282 : i1 to vector<1x256xi1>
    %284 = vector.broadcast %283 : vector<1x256xi1> to vector<1x256xi1>
    %285 = arith.xori %281, %284 : vector<1x256xi1>
    %286 = arith.andi %285, %279 : vector<1x256xi1>
    %287 = vector.broadcast %275 : i32 to vector<1x256xi32>
    %288 = arith.addi %277, %287 : vector<1x256xi32>
    %289 = arith.select %286, %288, %277 : vector<1x256xi1>, vector<1x256xi32>
    %cst_113 = arith.constant 0.000000e+00 : bf16
    %290 = vector.broadcast %cst_113 : bf16 to vector<16x128xbf16>
    %291 = tpu.concatenate %290, %272 in 1 : vector<16x128xbf16>, vector<16x256xbf16> -> vector<16x384xbf16>
    %292 = vector.extract_strided_slice %291 {offsets = [0, 126], sizes = [16, 256], strides = [1, 1]} : vector<16x384xbf16> to vector<16x256xbf16>
    %c-2_i32_114 = arith.constant -2 : i32
    %293 = vector.broadcast %c-2_i32_114 : i32 to vector<1x256xi32>
    %294 = arith.addi %289, %293 : vector<1x256xi32>
    %c0_i32_115 = arith.constant 0 : i32
    %295 = vector.broadcast %c0_i32_115 : i32 to vector<1x256xi32>
    %296 = arith.cmpi sge, %294, %295 : vector<1x256xi32>
    %c-2_i32_116 = arith.constant -2 : i32
    %297 = vector.broadcast %c-2_i32_116 : i32 to vector<1x256xi32>
    %298 = arith.addi %289, %297 : vector<1x256xi32>
    %c16_i32_117 = arith.constant 16 : i32
    %299 = vector.broadcast %c16_i32_117 : i32 to vector<1x256xi32>
    %300 = arith.cmpi slt, %298, %299 : vector<1x256xi32>
    %301 = arith.andi %296, %300 : vector<1x256xi1>
    %cst_118 = arith.constant 0.000000e+00 : bf16
    %302 = vector.broadcast %cst_118 : bf16 to vector<16x256xbf16>
    %303 = vector.shape_cast %301 : vector<1x256xi1> to vector<1x256xi1>
    %304 = vector.broadcast %303 : vector<1x256xi1> to vector<16x256xi1>
    %305 = arith.select %304, %292, %302 : vector<16x256xi1>, vector<16x256xbf16>
    %cst_119 = arith.constant 0.000000e+00 : bf16
    %306 = vector.broadcast %cst_119 : bf16 to vector<16x128xbf16>
    %307 = tpu.concatenate %306, %272 in 1 : vector<16x128xbf16>, vector<16x256xbf16> -> vector<16x384xbf16>
    %308 = vector.extract_strided_slice %307 {offsets = [0, 127], sizes = [16, 256], strides = [1, 1]} : vector<16x384xbf16> to vector<16x256xbf16>
    %c-1_i32_120 = arith.constant -1 : i32
    %309 = vector.broadcast %c-1_i32_120 : i32 to vector<1x256xi32>
    %310 = arith.addi %289, %309 : vector<1x256xi32>
    %c0_i32_121 = arith.constant 0 : i32
    %311 = vector.broadcast %c0_i32_121 : i32 to vector<1x256xi32>
    %312 = arith.cmpi sge, %310, %311 : vector<1x256xi32>
    %c-1_i32_122 = arith.constant -1 : i32
    %313 = vector.broadcast %c-1_i32_122 : i32 to vector<1x256xi32>
    %314 = arith.addi %289, %313 : vector<1x256xi32>
    %c16_i32_123 = arith.constant 16 : i32
    %315 = vector.broadcast %c16_i32_123 : i32 to vector<1x256xi32>
    %316 = arith.cmpi slt, %314, %315 : vector<1x256xi32>
    %317 = arith.andi %312, %316 : vector<1x256xi1>
    %cst_124 = arith.constant 0.000000e+00 : bf16
    %318 = vector.broadcast %cst_124 : bf16 to vector<16x256xbf16>
    %319 = vector.shape_cast %317 : vector<1x256xi1> to vector<1x256xi1>
    %320 = vector.broadcast %319 : vector<1x256xi1> to vector<16x256xi1>
    %321 = arith.select %320, %308, %318 : vector<16x256xi1>, vector<16x256xbf16>
    %c0_i32_125 = arith.constant 0 : i32
    %322 = vector.broadcast %c0_i32_125 : i32 to vector<1x256xi32>
    %323 = arith.addi %289, %322 : vector<1x256xi32>
    %c0_i32_126 = arith.constant 0 : i32
    %324 = vector.broadcast %c0_i32_126 : i32 to vector<1x256xi32>
    %325 = arith.cmpi sge, %323, %324 : vector<1x256xi32>
    %c0_i32_127 = arith.constant 0 : i32
    %326 = vector.broadcast %c0_i32_127 : i32 to vector<1x256xi32>
    %327 = arith.addi %289, %326 : vector<1x256xi32>
    %c16_i32_128 = arith.constant 16 : i32
    %328 = vector.broadcast %c16_i32_128 : i32 to vector<1x256xi32>
    %329 = arith.cmpi slt, %327, %328 : vector<1x256xi32>
    %330 = arith.andi %325, %329 : vector<1x256xi1>
    %cst_129 = arith.constant 0.000000e+00 : bf16
    %331 = vector.broadcast %cst_129 : bf16 to vector<16x256xbf16>
    %332 = vector.shape_cast %330 : vector<1x256xi1> to vector<1x256xi1>
    %333 = vector.broadcast %332 : vector<1x256xi1> to vector<16x256xi1>
    %334 = arith.select %333, %272, %331 : vector<16x256xi1>, vector<16x256xbf16>
    %cst_130 = arith.constant 0.000000e+00 : bf16
    %335 = vector.broadcast %cst_130 : bf16 to vector<16x128xbf16>
    %336 = tpu.concatenate %272, %335 in 1 : vector<16x256xbf16>, vector<16x128xbf16> -> vector<16x384xbf16>
    %337 = vector.extract_strided_slice %336 {offsets = [0, 1], sizes = [16, 256], strides = [1, 1]} : vector<16x384xbf16> to vector<16x256xbf16>
    %c1_i32_131 = arith.constant 1 : i32
    %338 = vector.broadcast %c1_i32_131 : i32 to vector<1x256xi32>
    %339 = arith.addi %289, %338 : vector<1x256xi32>
    %c0_i32_132 = arith.constant 0 : i32
    %340 = vector.broadcast %c0_i32_132 : i32 to vector<1x256xi32>
    %341 = arith.cmpi sge, %339, %340 : vector<1x256xi32>
    %c1_i32_133 = arith.constant 1 : i32
    %342 = vector.broadcast %c1_i32_133 : i32 to vector<1x256xi32>
    %343 = arith.addi %289, %342 : vector<1x256xi32>
    %c16_i32_134 = arith.constant 16 : i32
    %344 = vector.broadcast %c16_i32_134 : i32 to vector<1x256xi32>
    %345 = arith.cmpi slt, %343, %344 : vector<1x256xi32>
    %346 = arith.andi %341, %345 : vector<1x256xi1>
    %cst_135 = arith.constant 0.000000e+00 : bf16
    %347 = vector.broadcast %cst_135 : bf16 to vector<16x256xbf16>
    %348 = vector.shape_cast %346 : vector<1x256xi1> to vector<1x256xi1>
    %349 = vector.broadcast %348 : vector<1x256xi1> to vector<16x256xi1>
    %350 = arith.select %349, %337, %347 : vector<16x256xi1>, vector<16x256xbf16>
    %cst_136 = arith.constant 0.000000e+00 : bf16
    %351 = vector.broadcast %cst_136 : bf16 to vector<16x128xbf16>
    %352 = tpu.concatenate %272, %351 in 1 : vector<16x256xbf16>, vector<16x128xbf16> -> vector<16x384xbf16>
    %353 = vector.extract_strided_slice %352 {offsets = [0, 2], sizes = [16, 256], strides = [1, 1]} : vector<16x384xbf16> to vector<16x256xbf16>
    %c2_i32_137 = arith.constant 2 : i32
    %354 = vector.broadcast %c2_i32_137 : i32 to vector<1x256xi32>
    %355 = arith.addi %289, %354 : vector<1x256xi32>
    %c0_i32_138 = arith.constant 0 : i32
    %356 = vector.broadcast %c0_i32_138 : i32 to vector<1x256xi32>
    %357 = arith.cmpi sge, %355, %356 : vector<1x256xi32>
    %c2_i32_139 = arith.constant 2 : i32
    %358 = vector.broadcast %c2_i32_139 : i32 to vector<1x256xi32>
    %359 = arith.addi %289, %358 : vector<1x256xi32>
    %c16_i32_140 = arith.constant 16 : i32
    %360 = vector.broadcast %c16_i32_140 : i32 to vector<1x256xi32>
    %361 = arith.cmpi slt, %359, %360 : vector<1x256xi32>
    %362 = arith.andi %357, %361 : vector<1x256xi1>
    %cst_141 = arith.constant 0.000000e+00 : bf16
    %363 = vector.broadcast %cst_141 : bf16 to vector<16x256xbf16>
    %364 = vector.shape_cast %362 : vector<1x256xi1> to vector<1x256xi1>
    %365 = vector.broadcast %364 : vector<1x256xi1> to vector<16x256xi1>
    %366 = arith.select %365, %353, %363 : vector<16x256xi1>, vector<16x256xbf16>
    %367 = tpu.concatenate %305, %321, %334, %350, %366 in 0 : vector<16x256xbf16>, vector<16x256xbf16>, vector<16x256xbf16>, vector<16x256xbf16>, vector<16x256xbf16> -> vector<80x256xbf16>
    %cst_142 = arith.constant 0.000000e+00 : f32
    %368 = vector.broadcast %cst_142 : f32 to vector<32x256xf32>
    %cst_143 = arith.constant 0.000000e+00 : bf16
    %369 = vector.broadcast %cst_143 : bf16 to vector<80x128xbf16>
    %370 = tpu.concatenate %369, %367 in 1 : vector<80x128xbf16>, vector<80x256xbf16> -> vector<80x384xbf16>
    %371 = vector.extract_strided_slice %370 {offsets = [0, 96], sizes = [80, 256], strides = [1, 1]} : vector<80x384xbf16> to vector<80x256xbf16>
    %c0_144 = arith.constant 0 : index
    %c0_145 = arith.constant 0 : index
    %c0_146 = arith.constant 0 : index
    %372 = vector.load %arg4[%c0_144, %c0_145, %c0_146] : memref<5x32x80xbf16, #tpu.memory_space<vmem>>, vector<1x32x80xbf16>
    %373 = vector.shape_cast %372 : vector<1x32x80xbf16> to vector<32x80xbf16>
    %cst_147 = arith.constant dense<0.000000e+00> : vector<32x256xf32>
    %374 = tpu.matmul %373, %371, %cst_147 {dimension_numbers = #tpu.dot_dimension_numbers<[1], [0], [0], [1], [0, 0, 1, 1], [], []>} : vector<32x80xbf16>, vector<80x256xbf16>, vector<32x256xf32> -> vector<32x256xf32>
    %375 = arith.addf %368, %374 : vector<32x256xf32>
    %cst_148 = arith.constant 0.000000e+00 : bf16
    %376 = vector.broadcast %cst_148 : bf16 to vector<80x128xbf16>
    %377 = tpu.concatenate %376, %367 in 1 : vector<80x128xbf16>, vector<80x256xbf16> -> vector<80x384xbf16>
    %378 = vector.extract_strided_slice %377 {offsets = [0, 112], sizes = [80, 256], strides = [1, 1]} : vector<80x384xbf16> to vector<80x256xbf16>
    %c1_149 = arith.constant 1 : index
    %c0_150 = arith.constant 0 : index
    %c0_151 = arith.constant 0 : index
    %379 = vector.load %arg4[%c1_149, %c0_150, %c0_151] : memref<5x32x80xbf16, #tpu.memory_space<vmem>>, vector<1x32x80xbf16>
    %380 = vector.shape_cast %379 : vector<1x32x80xbf16> to vector<32x80xbf16>
    %cst_152 = arith.constant dense<0.000000e+00> : vector<32x256xf32>
    %381 = tpu.matmul %380, %378, %cst_152 {dimension_numbers = #tpu.dot_dimension_numbers<[1], [0], [0], [1], [0, 0, 1, 1], [], []>} : vector<32x80xbf16>, vector<80x256xbf16>, vector<32x256xf32> -> vector<32x256xf32>
    %382 = arith.addf %375, %381 : vector<32x256xf32>
    %c2_153 = arith.constant 2 : index
    %c0_154 = arith.constant 0 : index
    %c0_155 = arith.constant 0 : index
    %383 = vector.load %arg4[%c2_153, %c0_154, %c0_155] : memref<5x32x80xbf16, #tpu.memory_space<vmem>>, vector<1x32x80xbf16>
    %384 = vector.shape_cast %383 : vector<1x32x80xbf16> to vector<32x80xbf16>
    %cst_156 = arith.constant dense<0.000000e+00> : vector<32x256xf32>
    %385 = tpu.matmul %384, %367, %cst_156 {dimension_numbers = #tpu.dot_dimension_numbers<[1], [0], [0], [1], [0, 0, 1, 1], [], []>} : vector<32x80xbf16>, vector<80x256xbf16>, vector<32x256xf32> -> vector<32x256xf32>
    %386 = arith.addf %382, %385 : vector<32x256xf32>
    %cst_157 = arith.constant 0.000000e+00 : bf16
    %387 = vector.broadcast %cst_157 : bf16 to vector<80x128xbf16>
    %388 = tpu.concatenate %367, %387 in 1 : vector<80x256xbf16>, vector<80x128xbf16> -> vector<80x384xbf16>
    %389 = vector.extract_strided_slice %388 {offsets = [0, 16], sizes = [80, 256], strides = [1, 1]} : vector<80x384xbf16> to vector<80x256xbf16>
    %c3_158 = arith.constant 3 : index
    %c0_159 = arith.constant 0 : index
    %c0_160 = arith.constant 0 : index
    %390 = vector.load %arg4[%c3_158, %c0_159, %c0_160] : memref<5x32x80xbf16, #tpu.memory_space<vmem>>, vector<1x32x80xbf16>
    %391 = vector.shape_cast %390 : vector<1x32x80xbf16> to vector<32x80xbf16>
    %cst_161 = arith.constant dense<0.000000e+00> : vector<32x256xf32>
    %392 = tpu.matmul %391, %389, %cst_161 {dimension_numbers = #tpu.dot_dimension_numbers<[1], [0], [0], [1], [0, 0, 1, 1], [], []>} : vector<32x80xbf16>, vector<80x256xbf16>, vector<32x256xf32> -> vector<32x256xf32>
    %393 = arith.addf %386, %392 : vector<32x256xf32>
    %cst_162 = arith.constant 0.000000e+00 : bf16
    %394 = vector.broadcast %cst_162 : bf16 to vector<80x128xbf16>
    %395 = tpu.concatenate %367, %394 in 1 : vector<80x256xbf16>, vector<80x128xbf16> -> vector<80x384xbf16>
    %396 = vector.extract_strided_slice %395 {offsets = [0, 32], sizes = [80, 256], strides = [1, 1]} : vector<80x384xbf16> to vector<80x256xbf16>
    %c4_163 = arith.constant 4 : index
    %c0_164 = arith.constant 0 : index
    %c0_165 = arith.constant 0 : index
    %397 = vector.load %arg4[%c4_163, %c0_164, %c0_165] : memref<5x32x80xbf16, #tpu.memory_space<vmem>>, vector<1x32x80xbf16>
    %398 = vector.shape_cast %397 : vector<1x32x80xbf16> to vector<32x80xbf16>
    %cst_166 = arith.constant dense<0.000000e+00> : vector<32x256xf32>
    %399 = tpu.matmul %398, %396, %cst_166 {dimension_numbers = #tpu.dot_dimension_numbers<[1], [0], [0], [1], [0, 0, 1, 1], [], []>} : vector<32x80xbf16>, vector<80x256xbf16>, vector<32x256xf32> -> vector<32x256xf32>
    %400 = arith.addf %393, %399 : vector<32x256xf32>
    %c0_167 = arith.constant 0 : index
    %c0_168 = arith.constant 0 : index
    %401 = vector.load %arg5[%c0_167, %c0_168] : memref<32x1xf32, #tpu.memory_space<vmem>>, vector<32x1xf32>
    %402 = vector.broadcast %401 : vector<32x1xf32> to vector<32x256xf32>
    %403 = arith.addf %400, %402 : vector<32x256xf32>
    %cst_169 = arith.constant 0.000000e+00 : f32
    %404 = vector.broadcast %cst_169 : f32 to vector<32x256xf32>
    %405 = arith.cmpf oge, %403, %404 : vector<32x256xf32>
    %cst_170 = arith.constant 2.000000e-01 : f32
    %406 = vector.broadcast %cst_170 : f32 to vector<32x256xf32>
    %407 = arith.mulf %406, %403 : vector<32x256xf32>
    %408 = arith.select %405, %403, %407 : vector<32x256xi1>, vector<32x256xf32>
    %409 = arith.truncf %408 : vector<32x256xf32> to vector<32x256xbf16>
    %410 = tpu.iota {dimensions = array<i32: 1>} : vector<1x256xi32>
    %c16_i32_171 = arith.constant 16 : i32
    %c0_i32_172 = arith.constant 0 : i32
    %411 = arith.cmpi eq, %c16_i32_171, %c0_i32_172 : i32
    %c1_i32_173 = arith.constant 1 : i32
    %412 = arith.select %411, %c1_i32_173, %c16_i32_171 : i32
    %413 = vector.broadcast %412 : i32 to vector<1x256xi32>
    %414 = arith.remsi %410, %413 : vector<1x256xi32>
    %c0_i32_174 = arith.constant 0 : i32
    %415 = vector.broadcast %c0_i32_174 : i32 to vector<1x256xi32>
    %416 = arith.cmpi ne, %414, %415 : vector<1x256xi32>
    %c0_i32_175 = arith.constant 0 : i32
    %417 = vector.broadcast %c0_i32_175 : i32 to vector<1x256xi32>
    %418 = arith.cmpi slt, %414, %417 : vector<1x256xi32>
    %c0_i32_176 = arith.constant 0 : i32
    %419 = arith.cmpi slt, %412, %c0_i32_176 : i32
    %420 = vector.broadcast %419 : i1 to vector<1x256xi1>
    %421 = vector.broadcast %420 : vector<1x256xi1> to vector<1x256xi1>
    %422 = arith.xori %418, %421 : vector<1x256xi1>
    %423 = arith.andi %422, %416 : vector<1x256xi1>
    %424 = vector.broadcast %412 : i32 to vector<1x256xi32>
    %425 = arith.addi %414, %424 : vector<1x256xi32>
    %426 = arith.select %423, %425, %414 : vector<1x256xi1>, vector<1x256xi32>
    %cst_177 = arith.constant 0.000000e+00 : bf16
    %427 = vector.broadcast %cst_177 : bf16 to vector<32x128xbf16>
    %428 = tpu.concatenate %427, %409 in 1 : vector<32x128xbf16>, vector<32x256xbf16> -> vector<32x384xbf16>
    %429 = vector.extract_strided_slice %428 {offsets = [0, 127], sizes = [32, 256], strides = [1, 1]} : vector<32x384xbf16> to vector<32x256xbf16>
    %c-1_i32_178 = arith.constant -1 : i32
    %430 = vector.broadcast %c-1_i32_178 : i32 to vector<1x256xi32>
    %431 = arith.addi %426, %430 : vector<1x256xi32>
    %c0_i32_179 = arith.constant 0 : i32
    %432 = vector.broadcast %c0_i32_179 : i32 to vector<1x256xi32>
    %433 = arith.cmpi sge, %431, %432 : vector<1x256xi32>
    %c-1_i32_180 = arith.constant -1 : i32
    %434 = vector.broadcast %c-1_i32_180 : i32 to vector<1x256xi32>
    %435 = arith.addi %426, %434 : vector<1x256xi32>
    %c16_i32_181 = arith.constant 16 : i32
    %436 = vector.broadcast %c16_i32_181 : i32 to vector<1x256xi32>
    %437 = arith.cmpi slt, %435, %436 : vector<1x256xi32>
    %438 = arith.andi %433, %437 : vector<1x256xi1>
    %cst_182 = arith.constant 0.000000e+00 : bf16
    %439 = vector.broadcast %cst_182 : bf16 to vector<32x256xbf16>
    %440 = vector.shape_cast %438 : vector<1x256xi1> to vector<1x256xi1>
    %441 = vector.broadcast %440 : vector<1x256xi1> to vector<32x256xi1>
    %442 = arith.select %441, %429, %439 : vector<32x256xi1>, vector<32x256xbf16>
    %c0_i32_183 = arith.constant 0 : i32
    %443 = vector.broadcast %c0_i32_183 : i32 to vector<1x256xi32>
    %444 = arith.addi %426, %443 : vector<1x256xi32>
    %c0_i32_184 = arith.constant 0 : i32
    %445 = vector.broadcast %c0_i32_184 : i32 to vector<1x256xi32>
    %446 = arith.cmpi sge, %444, %445 : vector<1x256xi32>
    %c0_i32_185 = arith.constant 0 : i32
    %447 = vector.broadcast %c0_i32_185 : i32 to vector<1x256xi32>
    %448 = arith.addi %426, %447 : vector<1x256xi32>
    %c16_i32_186 = arith.constant 16 : i32
    %449 = vector.broadcast %c16_i32_186 : i32 to vector<1x256xi32>
    %450 = arith.cmpi slt, %448, %449 : vector<1x256xi32>
    %451 = arith.andi %446, %450 : vector<1x256xi1>
    %cst_187 = arith.constant 0.000000e+00 : bf16
    %452 = vector.broadcast %cst_187 : bf16 to vector<32x256xbf16>
    %453 = vector.shape_cast %451 : vector<1x256xi1> to vector<1x256xi1>
    %454 = vector.broadcast %453 : vector<1x256xi1> to vector<32x256xi1>
    %455 = arith.select %454, %409, %452 : vector<32x256xi1>, vector<32x256xbf16>
    %cst_188 = arith.constant 0.000000e+00 : bf16
    %456 = vector.broadcast %cst_188 : bf16 to vector<32x128xbf16>
    %457 = tpu.concatenate %409, %456 in 1 : vector<32x256xbf16>, vector<32x128xbf16> -> vector<32x384xbf16>
    %458 = vector.extract_strided_slice %457 {offsets = [0, 1], sizes = [32, 256], strides = [1, 1]} : vector<32x384xbf16> to vector<32x256xbf16>
    %c1_i32_189 = arith.constant 1 : i32
    %459 = vector.broadcast %c1_i32_189 : i32 to vector<1x256xi32>
    %460 = arith.addi %426, %459 : vector<1x256xi32>
    %c0_i32_190 = arith.constant 0 : i32
    %461 = vector.broadcast %c0_i32_190 : i32 to vector<1x256xi32>
    %462 = arith.cmpi sge, %460, %461 : vector<1x256xi32>
    %c1_i32_191 = arith.constant 1 : i32
    %463 = vector.broadcast %c1_i32_191 : i32 to vector<1x256xi32>
    %464 = arith.addi %426, %463 : vector<1x256xi32>
    %c16_i32_192 = arith.constant 16 : i32
    %465 = vector.broadcast %c16_i32_192 : i32 to vector<1x256xi32>
    %466 = arith.cmpi slt, %464, %465 : vector<1x256xi32>
    %467 = arith.andi %462, %466 : vector<1x256xi1>
    %cst_193 = arith.constant 0.000000e+00 : bf16
    %468 = vector.broadcast %cst_193 : bf16 to vector<32x256xbf16>
    %469 = vector.shape_cast %467 : vector<1x256xi1> to vector<1x256xi1>
    %470 = vector.broadcast %469 : vector<1x256xi1> to vector<32x256xi1>
    %471 = arith.select %470, %458, %468 : vector<32x256xi1>, vector<32x256xbf16>
    %472 = tpu.concatenate %442, %455, %471 in 0 : vector<32x256xbf16>, vector<32x256xbf16>, vector<32x256xbf16> -> vector<96x256xbf16>
    %cst_194 = arith.constant 0.000000e+00 : f32
    %473 = vector.broadcast %cst_194 : f32 to vector<16x256xf32>
    %cst_195 = arith.constant 0.000000e+00 : bf16
    %474 = vector.broadcast %cst_195 : bf16 to vector<96x128xbf16>
    %475 = tpu.concatenate %474, %472 in 1 : vector<96x128xbf16>, vector<96x256xbf16> -> vector<96x384xbf16>
    %476 = vector.extract_strided_slice %475 {offsets = [0, 112], sizes = [96, 256], strides = [1, 1]} : vector<96x384xbf16> to vector<96x256xbf16>
    %c0_196 = arith.constant 0 : index
    %c0_197 = arith.constant 0 : index
    %c0_198 = arith.constant 0 : index
    %477 = vector.load %arg6[%c0_196, %c0_197, %c0_198] : memref<3x16x96xbf16, #tpu.memory_space<vmem>>, vector<1x16x96xbf16>
    %478 = vector.shape_cast %477 : vector<1x16x96xbf16> to vector<16x96xbf16>
    %cst_199 = arith.constant dense<0.000000e+00> : vector<16x256xf32>
    %479 = tpu.matmul %478, %476, %cst_199 {dimension_numbers = #tpu.dot_dimension_numbers<[1], [0], [0], [1], [0, 0, 1, 1], [], []>} : vector<16x96xbf16>, vector<96x256xbf16>, vector<16x256xf32> -> vector<16x256xf32>
    %480 = arith.addf %473, %479 : vector<16x256xf32>
    %c1_200 = arith.constant 1 : index
    %c0_201 = arith.constant 0 : index
    %c0_202 = arith.constant 0 : index
    %481 = vector.load %arg6[%c1_200, %c0_201, %c0_202] : memref<3x16x96xbf16, #tpu.memory_space<vmem>>, vector<1x16x96xbf16>
    %482 = vector.shape_cast %481 : vector<1x16x96xbf16> to vector<16x96xbf16>
    %cst_203 = arith.constant dense<0.000000e+00> : vector<16x256xf32>
    %483 = tpu.matmul %482, %472, %cst_203 {dimension_numbers = #tpu.dot_dimension_numbers<[1], [0], [0], [1], [0, 0, 1, 1], [], []>} : vector<16x96xbf16>, vector<96x256xbf16>, vector<16x256xf32> -> vector<16x256xf32>
    %484 = arith.addf %480, %483 : vector<16x256xf32>
    %cst_204 = arith.constant 0.000000e+00 : bf16
    %485 = vector.broadcast %cst_204 : bf16 to vector<96x128xbf16>
    %486 = tpu.concatenate %472, %485 in 1 : vector<96x256xbf16>, vector<96x128xbf16> -> vector<96x384xbf16>
    %487 = vector.extract_strided_slice %486 {offsets = [0, 16], sizes = [96, 256], strides = [1, 1]} : vector<96x384xbf16> to vector<96x256xbf16>
    %c2_205 = arith.constant 2 : index
    %c0_206 = arith.constant 0 : index
    %c0_207 = arith.constant 0 : index
    %488 = vector.load %arg6[%c2_205, %c0_206, %c0_207] : memref<3x16x96xbf16, #tpu.memory_space<vmem>>, vector<1x16x96xbf16>
    %489 = vector.shape_cast %488 : vector<1x16x96xbf16> to vector<16x96xbf16>
    %cst_208 = arith.constant dense<0.000000e+00> : vector<16x256xf32>
    %490 = tpu.matmul %489, %487, %cst_208 {dimension_numbers = #tpu.dot_dimension_numbers<[1], [0], [0], [1], [0, 0, 1, 1], [], []>} : vector<16x96xbf16>, vector<96x256xbf16>, vector<16x256xf32> -> vector<16x256xf32>
    %491 = arith.addf %484, %490 : vector<16x256xf32>
    %c0_209 = arith.constant 0 : index
    %c0_210 = arith.constant 0 : index
    %492 = vector.load %arg7[%c0_209, %c0_210] : memref<16x1xf32, #tpu.memory_space<vmem>>, vector<16x1xf32>
    %493 = vector.broadcast %492 : vector<16x1xf32> to vector<16x256xf32>
    %494 = arith.addf %491, %493 : vector<16x256xf32>
    %cst_211 = arith.constant 0.000000e+00 : f32
    %495 = vector.broadcast %cst_211 : f32 to vector<16x256xf32>
    %496 = arith.cmpf oge, %494, %495 : vector<16x256xf32>
    %cst_212 = arith.constant 2.000000e-01 : f32
    %497 = vector.broadcast %cst_212 : f32 to vector<16x256xf32>
    %498 = arith.mulf %497, %494 : vector<16x256xf32>
    %499 = arith.select %496, %494, %498 : vector<16x256xi1>, vector<16x256xf32>
    %500 = arith.truncf %499 : vector<16x256xf32> to vector<16x256xbf16>
    %501 = tpu.iota {dimensions = array<i32: 1>} : vector<1x256xi32>
    %c16_i32_213 = arith.constant 16 : i32
    %c0_i32_214 = arith.constant 0 : i32
    %502 = arith.cmpi eq, %c16_i32_213, %c0_i32_214 : i32
    %c1_i32_215 = arith.constant 1 : i32
    %503 = arith.select %502, %c1_i32_215, %c16_i32_213 : i32
    %504 = vector.broadcast %503 : i32 to vector<1x256xi32>
    %505 = arith.remsi %501, %504 : vector<1x256xi32>
    %c0_i32_216 = arith.constant 0 : i32
    %506 = vector.broadcast %c0_i32_216 : i32 to vector<1x256xi32>
    %507 = arith.cmpi ne, %505, %506 : vector<1x256xi32>
    %c0_i32_217 = arith.constant 0 : i32
    %508 = vector.broadcast %c0_i32_217 : i32 to vector<1x256xi32>
    %509 = arith.cmpi slt, %505, %508 : vector<1x256xi32>
    %c0_i32_218 = arith.constant 0 : i32
    %510 = arith.cmpi slt, %503, %c0_i32_218 : i32
    %511 = vector.broadcast %510 : i1 to vector<1x256xi1>
    %512 = vector.broadcast %511 : vector<1x256xi1> to vector<1x256xi1>
    %513 = arith.xori %509, %512 : vector<1x256xi1>
    %514 = arith.andi %513, %507 : vector<1x256xi1>
    %515 = vector.broadcast %503 : i32 to vector<1x256xi32>
    %516 = arith.addi %505, %515 : vector<1x256xi32>
    %517 = arith.select %514, %516, %505 : vector<1x256xi1>, vector<1x256xi32>
    %cst_219 = arith.constant 0.000000e+00 : bf16
    %518 = vector.broadcast %cst_219 : bf16 to vector<16x128xbf16>
    %519 = tpu.concatenate %518, %500 in 1 : vector<16x128xbf16>, vector<16x256xbf16> -> vector<16x384xbf16>
    %520 = vector.extract_strided_slice %519 {offsets = [0, 127], sizes = [16, 256], strides = [1, 1]} : vector<16x384xbf16> to vector<16x256xbf16>
    %c-1_i32_220 = arith.constant -1 : i32
    %521 = vector.broadcast %c-1_i32_220 : i32 to vector<1x256xi32>
    %522 = arith.addi %517, %521 : vector<1x256xi32>
    %c0_i32_221 = arith.constant 0 : i32
    %523 = vector.broadcast %c0_i32_221 : i32 to vector<1x256xi32>
    %524 = arith.cmpi sge, %522, %523 : vector<1x256xi32>
    %c-1_i32_222 = arith.constant -1 : i32
    %525 = vector.broadcast %c-1_i32_222 : i32 to vector<1x256xi32>
    %526 = arith.addi %517, %525 : vector<1x256xi32>
    %c16_i32_223 = arith.constant 16 : i32
    %527 = vector.broadcast %c16_i32_223 : i32 to vector<1x256xi32>
    %528 = arith.cmpi slt, %526, %527 : vector<1x256xi32>
    %529 = arith.andi %524, %528 : vector<1x256xi1>
    %cst_224 = arith.constant 0.000000e+00 : bf16
    %530 = vector.broadcast %cst_224 : bf16 to vector<16x256xbf16>
    %531 = vector.shape_cast %529 : vector<1x256xi1> to vector<1x256xi1>
    %532 = vector.broadcast %531 : vector<1x256xi1> to vector<16x256xi1>
    %533 = arith.select %532, %520, %530 : vector<16x256xi1>, vector<16x256xbf16>
    %c0_i32_225 = arith.constant 0 : i32
    %534 = vector.broadcast %c0_i32_225 : i32 to vector<1x256xi32>
    %535 = arith.addi %517, %534 : vector<1x256xi32>
    %c0_i32_226 = arith.constant 0 : i32
    %536 = vector.broadcast %c0_i32_226 : i32 to vector<1x256xi32>
    %537 = arith.cmpi sge, %535, %536 : vector<1x256xi32>
    %c0_i32_227 = arith.constant 0 : i32
    %538 = vector.broadcast %c0_i32_227 : i32 to vector<1x256xi32>
    %539 = arith.addi %517, %538 : vector<1x256xi32>
    %c16_i32_228 = arith.constant 16 : i32
    %540 = vector.broadcast %c16_i32_228 : i32 to vector<1x256xi32>
    %541 = arith.cmpi slt, %539, %540 : vector<1x256xi32>
    %542 = arith.andi %537, %541 : vector<1x256xi1>
    %cst_229 = arith.constant 0.000000e+00 : bf16
    %543 = vector.broadcast %cst_229 : bf16 to vector<16x256xbf16>
    %544 = vector.shape_cast %542 : vector<1x256xi1> to vector<1x256xi1>
    %545 = vector.broadcast %544 : vector<1x256xi1> to vector<16x256xi1>
    %546 = arith.select %545, %500, %543 : vector<16x256xi1>, vector<16x256xbf16>
    %cst_230 = arith.constant 0.000000e+00 : bf16
    %547 = vector.broadcast %cst_230 : bf16 to vector<16x128xbf16>
    %548 = tpu.concatenate %500, %547 in 1 : vector<16x256xbf16>, vector<16x128xbf16> -> vector<16x384xbf16>
    %549 = vector.extract_strided_slice %548 {offsets = [0, 1], sizes = [16, 256], strides = [1, 1]} : vector<16x384xbf16> to vector<16x256xbf16>
    %c1_i32_231 = arith.constant 1 : i32
    %550 = vector.broadcast %c1_i32_231 : i32 to vector<1x256xi32>
    %551 = arith.addi %517, %550 : vector<1x256xi32>
    %c0_i32_232 = arith.constant 0 : i32
    %552 = vector.broadcast %c0_i32_232 : i32 to vector<1x256xi32>
    %553 = arith.cmpi sge, %551, %552 : vector<1x256xi32>
    %c1_i32_233 = arith.constant 1 : i32
    %554 = vector.broadcast %c1_i32_233 : i32 to vector<1x256xi32>
    %555 = arith.addi %517, %554 : vector<1x256xi32>
    %c16_i32_234 = arith.constant 16 : i32
    %556 = vector.broadcast %c16_i32_234 : i32 to vector<1x256xi32>
    %557 = arith.cmpi slt, %555, %556 : vector<1x256xi32>
    %558 = arith.andi %553, %557 : vector<1x256xi1>
    %cst_235 = arith.constant 0.000000e+00 : bf16
    %559 = vector.broadcast %cst_235 : bf16 to vector<16x256xbf16>
    %560 = vector.shape_cast %558 : vector<1x256xi1> to vector<1x256xi1>
    %561 = vector.broadcast %560 : vector<1x256xi1> to vector<16x256xi1>
    %562 = arith.select %561, %549, %559 : vector<16x256xi1>, vector<16x256xbf16>
    %563 = tpu.concatenate %533, %546, %562 in 0 : vector<16x256xbf16>, vector<16x256xbf16>, vector<16x256xbf16> -> vector<48x256xbf16>
    %cst_236 = arith.constant 0.000000e+00 : f32
    %564 = vector.broadcast %cst_236 : f32 to vector<3x256xf32>
    %cst_237 = arith.constant 0.000000e+00 : bf16
    %565 = vector.broadcast %cst_237 : bf16 to vector<48x128xbf16>
    %566 = tpu.concatenate %565, %563 in 1 : vector<48x128xbf16>, vector<48x256xbf16> -> vector<48x384xbf16>
    %567 = vector.extract_strided_slice %566 {offsets = [0, 112], sizes = [48, 256], strides = [1, 1]} : vector<48x384xbf16> to vector<48x256xbf16>
    %c0_238 = arith.constant 0 : index
    %c0_239 = arith.constant 0 : index
    %c0_240 = arith.constant 0 : index
    %568 = vector.load %arg8[%c0_238, %c0_239, %c0_240] : memref<3x3x48xbf16, #tpu.memory_space<vmem>>, vector<1x3x48xbf16>
    %569 = vector.shape_cast %568 : vector<1x3x48xbf16> to vector<3x48xbf16>
    %cst_241 = arith.constant dense<0.000000e+00> : vector<3x256xf32>
    %570 = tpu.matmul %569, %567, %cst_241 {dimension_numbers = #tpu.dot_dimension_numbers<[1], [0], [0], [1], [0, 0, 1, 1], [], []>} : vector<3x48xbf16>, vector<48x256xbf16>, vector<3x256xf32> -> vector<3x256xf32>
    %571 = arith.addf %564, %570 : vector<3x256xf32>
    %c1_242 = arith.constant 1 : index
    %c0_243 = arith.constant 0 : index
    %c0_244 = arith.constant 0 : index
    %572 = vector.load %arg8[%c1_242, %c0_243, %c0_244] : memref<3x3x48xbf16, #tpu.memory_space<vmem>>, vector<1x3x48xbf16>
    %573 = vector.shape_cast %572 : vector<1x3x48xbf16> to vector<3x48xbf16>
    %cst_245 = arith.constant dense<0.000000e+00> : vector<3x256xf32>
    %574 = tpu.matmul %573, %563, %cst_245 {dimension_numbers = #tpu.dot_dimension_numbers<[1], [0], [0], [1], [0, 0, 1, 1], [], []>} : vector<3x48xbf16>, vector<48x256xbf16>, vector<3x256xf32> -> vector<3x256xf32>
    %575 = arith.addf %571, %574 : vector<3x256xf32>
    %cst_246 = arith.constant 0.000000e+00 : bf16
    %576 = vector.broadcast %cst_246 : bf16 to vector<48x128xbf16>
    %577 = tpu.concatenate %563, %576 in 1 : vector<48x256xbf16>, vector<48x128xbf16> -> vector<48x384xbf16>
    %578 = vector.extract_strided_slice %577 {offsets = [0, 16], sizes = [48, 256], strides = [1, 1]} : vector<48x384xbf16> to vector<48x256xbf16>
    %c2_247 = arith.constant 2 : index
    %c0_248 = arith.constant 0 : index
    %c0_249 = arith.constant 0 : index
    %579 = vector.load %arg8[%c2_247, %c0_248, %c0_249] : memref<3x3x48xbf16, #tpu.memory_space<vmem>>, vector<1x3x48xbf16>
    %580 = vector.shape_cast %579 : vector<1x3x48xbf16> to vector<3x48xbf16>
    %cst_250 = arith.constant dense<0.000000e+00> : vector<3x256xf32>
    %581 = tpu.matmul %580, %578, %cst_250 {dimension_numbers = #tpu.dot_dimension_numbers<[1], [0], [0], [1], [0, 0, 1, 1], [], []>} : vector<3x48xbf16>, vector<48x256xbf16>, vector<3x256xf32> -> vector<3x256xf32>
    %582 = arith.addf %575, %581 : vector<3x256xf32>
    %c0_251 = arith.constant 0 : index
    %c0_252 = arith.constant 0 : index
    %583 = vector.load %arg9[%c0_251, %c0_252] : memref<3x1xf32, #tpu.memory_space<vmem>>, vector<3x1xf32>
    %584 = vector.broadcast %583 : vector<3x1xf32> to vector<3x256xf32>
    %585 = arith.addf %582, %584 : vector<3x256xf32>
    %cst_253 = arith.constant 0.000000e+00 : f32
    %586 = vector.broadcast %cst_253 : f32 to vector<3x256xf32>
    %587 = arith.subf %586, %585 : vector<3x256xf32>
    %588 = math.exp %587 : vector<3x256xf32>
    %cst_254 = arith.constant 1.000000e+00 : f32
    %589 = vector.broadcast %cst_254 : f32 to vector<3x256xf32>
    %590 = arith.addf %589, %588 : vector<3x256xf32>
    %591 = tpu.reciprocal %590 {approx = true} : vector<3x256xf32> -> vector<3x256xf32>
    %c0_255 = arith.constant 0 : index
    %c0_256 = arith.constant 0 : index
    %c0_257 = arith.constant 0 : index
    %592 = vector.load %arg10[%c0_255, %c0_256, %c0_257] : memref<1x3x256xf32, #tpu.memory_space<vmem>>, vector<1x3x256xf32>
    %593 = vector.shape_cast %592 : vector<1x3x256xf32> to vector<3x256xf32>
    %594 = vector.shape_cast %591 : vector<3x256xf32> to vector<1x3x256xf32>
    tpu.vector_store %arg10[%c0_255, %c0_256, %c0_257], %594 {strides = array<i32>} : memref<1x3x256xf32, #tpu.memory_space<vmem>>, vector<1x3x256xf32>,
    return
  }
  func.func @transform_0(%arg0: i32) -> (i32, i32, i32) {
    %c0_i32 = arith.constant 0 : i32
    %c0_i32_0 = arith.constant 0 : i32
    %c0_i32_1 = arith.constant 0 : i32
    return %arg0, %c0_i32, %c0_i32_0 : i32, i32, i32
  }
  func.func @transform_1(%arg0: i32) -> (i32, i32, i32) {
    %c0_i32 = arith.constant 0 : i32
    %c0_i32_0 = arith.constant 0 : i32
    %c0_i32_1 = arith.constant 0 : i32
    %c0_i32_2 = arith.constant 0 : i32
    return %c0_i32, %c0_i32_0, %c0_i32_1 : i32, i32, i32
  }
  func.func @transform_2(%arg0: i32) -> (i32, i32) {
    %c0_i32 = arith.constant 0 : i32
    %c0_i32_0 = arith.constant 0 : i32
    %c0_i32_1 = arith.constant 0 : i32
    return %c0_i32, %c0_i32_0 : i32, i32
  }
  func.func @transform_3(%arg0: i32) -> (i32, i32, i32) {
    %c0_i32 = arith.constant 0 : i32
    %c0_i32_0 = arith.constant 0 : i32
    %c0_i32_1 = arith.constant 0 : i32
    %c0_i32_2 = arith.constant 0 : i32
    return %c0_i32, %c0_i32_0, %c0_i32_1 : i32, i32, i32
  }
  func.func @transform_4(%arg0: i32) -> (i32, i32) {
    %c0_i32 = arith.constant 0 : i32
    %c0_i32_0 = arith.constant 0 : i32
    %c0_i32_1 = arith.constant 0 : i32
    return %c0_i32, %c0_i32_0 : i32, i32
  }
  func.func @transform_5(%arg0: i32) -> (i32, i32, i32) {
    %c0_i32 = arith.constant 0 : i32
    %c0_i32_0 = arith.constant 0 : i32
    %c0_i32_1 = arith.constant 0 : i32
    %c0_i32_2 = arith.constant 0 : i32
    return %c0_i32, %c0_i32_0, %c0_i32_1 : i32, i32, i32
  }
  func.func @transform_6(%arg0: i32) -> (i32, i32) {
    %c0_i32 = arith.constant 0 : i32
    %c0_i32_0 = arith.constant 0 : i32
    %c0_i32_1 = arith.constant 0 : i32
    return %c0_i32, %c0_i32_0 : i32, i32
  }
  func.func @transform_7(%arg0: i32) -> (i32, i32, i32) {
    %c0_i32 = arith.constant 0 : i32
    %c0_i32_0 = arith.constant 0 : i32
    %c0_i32_1 = arith.constant 0 : i32
    %c0_i32_2 = arith.constant 0 : i32
    return %c0_i32, %c0_i32_0, %c0_i32_1 : i32, i32, i32
  }
  func.func @transform_8(%arg0: i32) -> (i32, i32) {
    %c0_i32 = arith.constant 0 : i32
    %c0_i32_0 = arith.constant 0 : i32
    %c0_i32_1 = arith.constant 0 : i32
    return %c0_i32, %c0_i32_0 : i32, i32
  }
  func.func @transform_9(%arg0: i32) -> (i32, i32, i32) {
    %c0_i32 = arith.constant 0 : i32
    %c0_i32_0 = arith.constant 0 : i32
    %c0_i32_1 = arith.constant 0 : i32
    return %arg0, %c0_i32, %c0_i32_0 : i32, i32, i32
  }
}

</mosaic_0001>

<bundles_post_ra>
// kernel: generator_forward.1
= control target key start
LH: loop header
LB: loop body
LE: loop exit
PB: predicated region body
PF: predicated region fallthrough
CT: control target
= control target key end

     0   :  { %s4260_s30 = smov 0   ;;  %s6758_s0 = inlined_call_operand.vmem [shape: f32[2,16,256], index: 0, kind: input, shape index: {}]   ;;  %s6759_s1 = inlined_call_operand.vmem [shape: bf16[11,16,176], index: 1, kind: input, shape index: {}]   ;;  %s6760_s2 = inlined_call_operand.vmem [shape: f32[16,1], index: 2, kind: input, shape index: {}]   ;;  %s6761_s3 = inlined_call_operand.vmem [shape: bf16[5,32,80], index: 3, kind: input, shape index: {}]   ;;  %s6762_s4 = inlined_call_operand.vmem [shape: f32[32,1], index: 4, kind: input, shape index: {}]   ;;  %s6763_s5 = inlined_call_operand.vmem [shape: bf16[3,16,96], index: 5, kind: input, shape index: {}]   ;;  %s6764_s6 = inlined_call_operand.vmem [shape: f32[16,1], index: 6, kind: input, shape index: {}]   ;;  %s6765_s7 = inlined_call_operand.vmem [shape: bf16[3,3,48], index: 7, kind: input, shape index: {}]   ;;  %s6766_s8 = inlined_call_operand.vmem [shape: f32[3,1], index: 8, kind: input, shape index: {}]   ;;  %s6767_s9 = inlined_call_operand.vmem [shape: f32[2,3,256], index: 9, kind: output, shape index: {}]  }
   0x1 LB: > { %s3851_s10 = sadd.s32 4294967295, %s4184_s30   ;;  %p3855_p0 = scmp.ge.s32.totalorder %s4184_s30, 1  ;;  %s4184_s30 = sphi %s4260_s30, %s19_s30  }
   0x2   : > { %p287_p1 = scmp.lt.s32.totalorder %s4184_s30, 3 }
   0x4   : > { %p288_p2 = pnand %p3855_p0, %p287_p1 }
   0x6   : > { %291 = sbr.rel (%p288_p2) target bundleno = 2963 (0xb93), region = 56 }
   0xb   : > { %v342_v0 = vlaneseq  ;;  %v6788_v1 = vmov 0   ;;  %p323_p3 = scmp.lt.s32.totalorder %s3851_s10, 1  ;;  %s4187_s11 = smov 2   ;;  %v6873_v62 = vmov 0 }
   0xc   : > { %4167 = vset.pattern.permute.xlu0 %v6788_v1  ;;  %4168 = vset.pattern.permute.xlu1 %v6788_v1  ;;  %s4188_s12 = smov 1   ;;  %s4189_s14 = smov 5  }
   0xd   : > { %v343_v2 = vand.u32 127, %v342_v0  ;;  %4169 = vset.pattern.permute.xlu2 %v6788_v1  ;;  %s7195_s10 = smov (!%p323_p3, %s3851_s10), 1  ;;  %s4190_s18 = smov 4  }
   0xe   : > { %s4098_s13 = sshll.u32 %s7195_s10, 5  ;;  %s4191_s19 = smov 127  }
   0xf   : > { %v344_v3 = vadd.s32 128, %v343_v2  ;;  %v4271_v4 = vand.u32 15, %v343_v2  ;;  %s327_s17 = scalar_lea.vmem %s6758_s0, %s4098_s13  ;;  %s4192_s20 = smov 3  }
  0x10   : > { %v338_v28 = vld [vmem:[%s327_s17 + $0x10] sm:$0xff]  ;;  %v339_v29 = vld [vmem:[%s327_s17 + $0x18] sm:$0xff]  ;;  %v336_v31 = vld [vmem:[%s327_s17] sm:$0xff]  ;;  %s4193_s21 = smov 126   ;;  %s4195_s22 = smov 125  }
  0x11   : > { %v4273_v5 = vand.u32 15, %v344_v3  ;;  %v620_v6 = vadd.s32 2, %v4271_v4  ;;  %v582_v7 = vadd.s32 1, %v4271_v4  ;;  %v734_v10 = vadd.s32 5, %v4271_v4  ;;  %v337_v32 = vld [vmem:[%s327_s17 + $0x8] sm:$0xff]  ;;  %s4196_s23 = smov 124  }
  0x12   : > { %v696_v16 = vadd.s32 4, %v4271_v4  ;;  %v531_v22 = vadd.s32 4294967295, %v4271_v4  ;;  %v658_v24 = vadd.s32 3, %v4271_v4  ;;  %v341_v34 = vpack.c.bf16 %v339_v29, %v338_v28  ;;  %s4197_s24 = smov 123   ;;  %s4198_s25 = smov 121  }
  0x13   : > { %v621_v8 = vadd.s32 2, %v4273_v5  ;;  %vm624_vm0 = vcmp.lt.s32.totalorder %v620_v6, 16  ;;  %v583_v9 = vadd.s32 1, %v4273_v5  ;;  %vm586_vm1 = vcmp.lt.s32.totalorder %v582_v7, 16  ;;  %s4199_s26 = smov 118   ;;  %s4200_s27 = smov 119  }
  0x14   : > { %v735_v11 = vadd.s32 5, %v4273_v5  ;;  %vm738_vm6 = vcmp.lt.s32.totalorder %v734_v10, 16  ;;  %v697_v17 = vadd.s32 4, %v4273_v5  ;;  %vm700_vm9 = vcmp.lt.s32.totalorder %v696_v16, 16  ;;  %s4201_s28 = smov 122   ;;  %s4202_s29 = smov 120  }
  0x15   : > { %vm625_vm2 = vcmp.lt.s32.totalorder %v621_v8, 16  ;;  %vm587_vm3 = vcmp.lt.s32.totalorder %v583_v9, 16  ;;  %v532_v23 = vadd.s32 4294967295, %v4273_v5  ;;  %v659_v25 = vadd.s32 3, %v4273_v5  ;;  %s4203_s13 = smov 64   ;;  %s4204_s15 = smov 80  }
  0x16   : > { %vm632_vm4 = vmpackc.low %vm625_vm2, %vm624_vm0  ;;  %vm739_vm7 = vcmp.lt.s32.totalorder %v735_v11, 16  ;;  %vm701_vm10 = vcmp.lt.s32.totalorder %v697_v17, 16  ;;  %vm533_vm12 = vcmp.ge.s32.totalorder %v531_v22, 0  ;;  %vm662_vm14 = vcmp.lt.s32.totalorder %v658_v24, 16  ;;  %s4205_s16 = smov 32   ;;  %s4206_s17 = smov 48  }
  0x17   : > { %v633_v12 = vsel %vm632_vm4, 65537, %v6788_v1  ;;  %vm594_vm5 = vmpackc.low %vm587_vm3, %vm586_vm1  ;;  %vm534_vm13 = vcmp.ge.s32.totalorder %v532_v23, 0  ;;  %vm663_vm15 = vcmp.lt.s32.totalorder %v659_v25, 16  ;;  %v493_v35 = vadd.s32 4294967294, %v4271_v4 }
  0x18   : > { %v634_v13 = vperm.slane %v633_v12, 0  ;;  %v595_v14 = vsel %vm594_vm5, 65537, %v6788_v1  ;;  %vm746_vm8 = vmpackc.low %vm739_vm7, %vm738_vm6  ;;  %v635_v20 = vperm.slane %v633_v12, 4  ;;  %v494_v36 = vadd.s32 4294967294, %v4273_v5 }
  0x19   : > { %v596_v15 = vperm.slane %v595_v14, 0  ;;  %v747_v18 = vsel %vm746_vm8, 65537, %v6788_v1  ;;  %v597_v21 = vperm.slane %v595_v14, 4  ;;  %vm708_vm11 = vmpackc.low %vm701_vm10, %vm700_vm9  ;;  %v340_v37 = vpack.c.bf16 %v337_v32, %v336_v31 }
  0x1a   : > { %636 = vrot.lane.b32.xlu0 %v634_v13, %s4187_s11  ;;  %v748_v19 = vperm.slane %v747_v18, 0  ;;  %v709_v26 = vsel %vm708_vm11, 65537, %v6788_v1  ;;  %v749_v27 = vperm.slane %v747_v18, 4  ;;  %vm543_vm0 = vmpackc.low %vm534_vm13, %vm533_vm12  ;;  %v373_v38 = vunpack.c.l.b16 %v341_v34 }
  0x1b   : > { %598 = vrot.lane.b32.xlu1 %v596_v15, %s4188_s12  ;;  %v710_v30 = vperm.slane %v709_v26, 0  ;;  %v711_v33 = vperm.slane %v709_v26, 4  ;;  %vm670_vm1 = vmpackc.low %vm663_vm15, %vm662_vm14  ;;  %v374_v39 = vunpack.c.h.b16 %v341_v34  ;;  %v544_v40 = vsel %vm543_vm0, 65537, %v6788_v1 }
  0x1c   : > { %750 = vrot.lane.b32.xlu2 %v748_v19, %s4189_s14  ;;  %v545_v41 = vperm.slane %v544_v40, 0  ;;  %v371_v42 = vunpack.c.l.b16 %v340_v37  ;;  %v372_v43 = vunpack.c.h.b16 %v340_v37  ;;  %v671_v44 = vsel %vm670_vm1, 65537, %v6788_v1 }
  0x1d   : > { %vm495_vm2 = vcmp.ge.s32.totalorder %v493_v35, 0  ;;  %vm496_vm3 = vcmp.ge.s32.totalorder %v494_v36, 0  ;;  %v546_v47 = vperm.slane %v544_v40, 4  ;;  %v672_v48 = vperm.slane %v671_v44, 0 }
  0x1e   : > { %v4311_v45 = vpack.c.b16 %v373_v38, %v371_v42  ;;  %v4313_v46 = vpack.c.b16 %v374_v39, %v372_v43  ;;  %vm505_vm4 = vmpackc.low %vm496_vm3, %vm495_vm2  ;;  %v455_v49 = vadd.s32 4294967293, %v4271_v4  ;;  %v456_v50 = vadd.s32 4294967293, %v4273_v5 }
  0x1f   : > { %v417_v51 = vadd.s32 4294967292, %v4271_v4  ;;  %v418_v52 = vadd.s32 4294967292, %v4273_v5  ;;  %v506_v53 = vsel %vm505_vm4, 65537, %v6788_v1  ;;  %v673_v54 = vperm.slane %v671_v44, 4 }
  0x20   : > { %vm457_vm5 = vcmp.ge.s32.totalorder %v455_v49, 0  ;;  %vm458_vm6 = vcmp.ge.s32.totalorder %v456_v50, 0  ;;  %v507_v55 = vperm.slane %v506_v53, 0  ;;  %v508_v56 = vperm.slane %v506_v53, 4 }
  0x21   : > { %vm419_vm7 = vcmp.ge.s32.totalorder %v417_v51, 0  ;;  %vm420_vm8 = vcmp.ge.s32.totalorder %v418_v52, 0  ;;  %vm467_vm9 = vmpackc.low %vm458_vm6, %vm457_vm5  ;;  %v379_v58 = vadd.s32 4294967291, %v4271_v4  ;;  %v380_v59 = vadd.s32 4294967291, %v4273_v5 }
  0x22   : > { %638 = vrot.lane.b32.xlu0 %v635_v20, %s4187_s11  ;;  %vm429_vm10 = vmpackc.low %vm420_vm8, %vm419_vm7  ;;  %v468_v57 = vsel %vm467_vm9, 65537, %v6788_v1  ;;  %vm4194_vm11 = vmmov 1   ;;  %v4370_v17 = vunpack.c.l.b16 %v6788_v1  ;;  %v4373_v18 = vunpack.c.h.b16 %v6788_v1 }
  0x23   : > { %600 = vrot.lane.b32.xlu1 %v597_v21, %s4188_s12  ;;  %v469_v60 = vperm.slane %v468_v57, 0  ;;  %v430_v61 = vsel %vm429_vm10, 65537, %v6788_v1  ;;  %vm4328_vm12 = vmpackc.low %vm4194_vm11, %vm4194_vm11  ;;  %vm381_vm13 = vcmp.ge.s32.totalorder %v379_v58, 0  ;;  %vm382_vm14 = vcmp.ge.s32.totalorder %v380_v59, 0 }
  0x24   : > { %752 = vrot.lane.b32.xlu2 %v749_v27, %s4189_s14  ;;  %v6874_v62 = vsel %vm4328_vm12, 4294967295, %v6873_v62  ;;  %vm4332_vm15 = vmpackc.low %vm382_vm14, %vm381_vm13  ;;  %v470_v0 = vperm.slane %v468_v57, 4  ;;  %v431_v2 = vperm.slane %v430_v61, 0  ;;  %v580_v3 = vsel %vm4328_vm12, %v340_v37, 0 }
  0x25   : > { %6875 = vst [vmem:[#allocation2_spill] sm:$0xff] %v6874_v62  ;;  %v581_v4 = vsel %vm4328_vm12, %v341_v34, 0  ;;  %v815_v5 = vunpack.c.l.b16 %v580_v3  ;;  %v816_v7 = vunpack.c.h.b16 %v580_v3  ;;  %v432_v9 = vperm.slane %v430_v61, 4 }
  0x26   : > { %v817_v6 = vunpack.c.l.b16 %v581_v4  ;;  %v818_v8 = vunpack.c.h.b16 %v581_v4  ;;  %v392_v12 = vsel %vm4332_vm15, 65537, %v6788_v1  ;;  %v6878_v23 = vmov 0 }
  0x27   : > { %v394_v13 = vperm.slane %v392_v12, 4  ;;  %v393_v14 = vperm.slane %v392_v12, 0  ;;  %v6881_v24 = vmov 0  ;;  %vm6768_vm6 = vcmask 7168  }
  0x28   : > { %v819_v10 = vpack.c.b16 %v817_v6, %v815_v5  ;;  %v820_v11 = vpack.c.b16 %v818_v8, %v816_v7  ;;  %vm716_vm13 = vcmask 31744   ;;  %vm6773_vm15 = vcmask 1006592  }
  0x29   : > { %v6892_v4 = vmov 0 }
  0x2a   : > { %712 = vrot.lane.b32.xlu0 %v710_v30, %s4190_s18 }
  0x2b   : > { %714 = vrot.lane.b32.xlu1 %v711_v33, %s4190_s18 }
  0x2c   : > { %547 = vrot.lane.b32.xlu2 %v545_v41, %s4191_s19 }
  0x32   : > { %549 = vrot.lane.b32.xlu0 %v546_v47, %s4191_s19 }
  0x33   : > { %674 = vrot.lane.b32.xlu1 %v672_v48, %s4192_s20 }
  0x34   : > { %676 = vrot.lane.b32.xlu2 %v673_v54, %s4192_s20  ;;  %v6917_v54 = vmov 0 }
  0x3a   : > { %509 = vrot.lane.b32.xlu0 %v507_v55, %s4193_s21 }
  0x3b   : > { %511 = vrot.lane.b32.xlu1 %v508_v56, %s4193_s21 }
  0x3c   : > { %471 = vrot.lane.b32.xlu2 %v469_v60, %s4195_s22 }
  0x42   : > { %473 = vrot.lane.b32.xlu0 %v470_v0, %s4195_s22 }
  0x43   : > { %433 = vrot.lane.b32.xlu1 %v431_v2, %s4196_s23 }
  0x44   : > { %435 = vrot.lane.b32.xlu2 %v432_v9, %s4196_s23 }
  0x4a   : > { %821 = vrot.lane.b32.xlu0 %v819_v10, %s4197_s24 }
  0x4b   : > { %823 = vrot.lane.b32.xlu1 %v820_v11, %s4197_s24  ;;  %v6897_v11 = vmov 0 }
  0x4c   : > { %805 = vrot.lane.b32.xlu2 %v6788_v1, %s4196_s23 }
  0x52   : > { %795 = vrot.lane.b32.xlu0 %v6788_v1, %s4195_s22 }
  0x53   : > { %843 = vrot.lane.b32.xlu1 %v6788_v1, %s4198_s25 }
  0x54   : > { %876 = vrot.lane.b32.xlu2 %v6788_v1, %s4199_s26 }
  0x5a   : > { %865 = vrot.lane.b32.xlu0 %v6788_v1, %s4200_s27 }
  0x5b   : > { %832 = vrot.lane.b32.xlu1 %v6788_v1, %s4201_s28 }
  0x5c   : > { %395 = vrot.lane.b32.xlu2 %v393_v14, %s4197_s24  ;;  %v6900_v14 = vmov 0 }
  0x62   : > { %397 = vrot.lane.b32.xlu0 %v394_v13, %s4197_s24 }
  0x63   : > { %785 = vrot.lane.b32.xlu1 %v6788_v1, %s4193_s21 }
  0x6b   : > { %854 = vrot.lane.b32.xlu1 %v6788_v1, %s4202_s29 }
  0x73   : > { %775 = vrot.lane.b32.xlu1 %v6788_v1, %s4191_s19 }
  0x76   : > { %v4365_v15 = vpop.permute.xlu2 %750 }
  0x77   : > { %v756_v48 = vunpack.c.l.b16 %v4365_v15  ;;  %v757_v49 = vunpack.c.h.b16 %v4365_v15 }
  0x79   : > { %vm4449_vm10 = vcmp.ne.s32.totalorder %v756_v48, %v4370_v17  ;;  %vm4454_vm11 = vcmp.ne.s32.totalorder %v757_v49, %v4373_v18 }
  0x7a   : > { %vm762_vm14 = vmpackc.low %vm4454_vm11, %vm4449_vm10 }
  0x7b   : > { %v770_v0 = vsel %vm762_vm14, %v4311_v45, 0 }
  0x7e   : > { %v4367_v16 = vpop.permute.xlu2 %752 }
  0x86   : > { %v4404_v27 = vpop.permute.xlu2 %547 }
  0x8c   : > { %v4375_v19 = vpop.permute.xlu0 %636 }
  0x8d   : > { %v4377_v20 = vpop.permute.xlu1 %598  ;;  %v642_v21 = vunpack.c.l.b16 %v4375_v19  ;;  %v643_v22 = vunpack.c.h.b16 %v4375_v19 }
  0x8e   : > { %v4408_v31 = vpop.permute.xlu2 %676  ;;  %v604_v58 = vunpack.c.l.b16 %v4377_v20  ;;  %v605_v61 = vunpack.c.h.b16 %v4377_v20 }
  0x8f   : > { %vm4382_vm0 = vcmp.ne.s32.totalorder %v642_v21, %v4370_v17  ;;  %vm4387_vm1 = vcmp.ne.s32.totalorder %v643_v22, %v4373_v18 }
  0x90   : > { %v6879_v23 = vsel %vm4382_vm0, 4294967295, %v6878_v23  ;;  %v6882_v24 = vsel %vm4387_vm1, 4294967295, %v6881_v24  ;;  %vm6770_vm2 = vmpackc.low %vm4387_vm1, %vm4382_vm0  ;;  %vm609_vm11 = vcmp.ne.s32.totalorder %v605_v61, %v4373_v18 }
  0x91   : > { %6880 = vst [vmem:[#allocation3_spill] sm:$0xff] %v6879_v23  ;;  %v656_v25 = vsel %vm6770_vm2, %v4311_v45, 0  ;;  %v6979_v23 = vmov 0  }
  0x92   : > { %6883 = vst [vmem:[#allocation4_spill] sm:$0xff] %v6882_v24  ;;  %839 = vrot.lane.b32.xlu0 %v656_v25, %s4198_s25 }
  0x94   : > { %v4402_v26 = vpop.permute.xlu0 %638 }
  0x95   : > { %v601_v28 = vpop.permute.xlu1 %600 }
  0x96   : > { %v4414_v34 = vpop.permute.xlu2 %471  ;;  %v603_v50 = vsel %vm6768_vm6, %v4377_v20, %v601_v28 }
  0x97   : > { %v611_v55 = vunpack.c.l.b16 %v603_v50  ;;  %v612_v56 = vunpack.c.h.b16 %v603_v50 }
  0x9c   : > { %v4406_v29 = vpop.permute.xlu0 %712 }
  0x9d   : > { %v715_v30 = vpop.permute.xlu1 %714  ;;  %v719_v22 = vunpack.c.h.b16 %v4406_v29 }
  0x9e   : > { %v4420_v37 = vpop.permute.xlu2 %435  ;;  %v717_v63 = vsel %vm716_vm13, %v4406_v29, %v715_v30  ;;  %vm6772_vm13 = vcmask 1039360  }
  0x9f   : > { %v446_v42 = vunpack.c.l.b16 %v4420_v37  ;;  %v447_v43 = vunpack.c.h.b16 %v4420_v37  ;;  %v725_v8 = vunpack.c.l.b16 %v717_v63  ;;  %v726_v9 = vunpack.c.h.b16 %v717_v63 }
  0xa1   : > { %vm4434_vm7 = vcmp.ne.s32.totalorder %v446_v42, %v4370_v17  ;;  %vm451_vm8 = vcmp.ne.s32.totalorder %v447_v43, %v4373_v18 }
  0xa2   : > { %vm452_vm9 = vmpackc.low %vm451_vm8, %vm4434_vm7  ;;  %vm4475_vm7 = vcmp.ne.s32.totalorder %v604_v58, %v4370_v17 }
  0xa3   : > { %v454_v57 = vsel %vm452_vm9, %v4313_v46, 0 }
  0xa4   : > { %v4410_v32 = vpop.permute.xlu0 %549 }
  0xa5   : > { %v4412_v33 = vpop.permute.xlu1 %674  ;;  %v560_v59 = vunpack.c.l.b16 %v4410_v32  ;;  %v561_v60 = vunpack.c.h.b16 %v4410_v32  ;;  %v552_v25 = vsel %vm6772_vm13, %v4404_v27, %v4410_v32  ;;  %v6907_v27 = vmov 0 }
  0xa6   : > { %v4486_v5 = vpop.permute.xlu2 %805  ;;  %v554_v42 = vunpack.c.h.b16 %v552_v25  ;;  %v681_v50 = vunpack.c.h.b16 %v4412_v33 }
  0xa7   : > { %vm564_vm9 = vcmp.ne.s32.totalorder %v560_v59, %v4370_v17  ;;  %vm565_vm10 = vcmp.ne.s32.totalorder %v561_v60, %v4373_v18  ;;  %6895 = vst [vmem:[#allocation6_spill] sm:$0xff] %v4486_v5 }
  0xa8   : > { %vm4497_vm14 = vmpackc.low %vm565_vm10, %vm564_vm9  ;;  %vm4515_vm9 = vcmp.ne.s32.totalorder %v726_v9, %v4373_v18 }
  0xa9   : > { %v6898_v11 = vsel %vm4497_vm14, 4294967295, %v6897_v11 }
  0xaa   : > { %6899 = vst [vmem:[#allocation8_spill] sm:$0xff] %v6898_v11 }
  0xac   : > { %v4416_v35 = vpop.permute.xlu0 %509 }
  0xad   : > { %v4418_v36 = vpop.permute.xlu1 %511 }
  0xae   : > { %v4550_v32 = vpop.permute.xlu2 %876 }
  0xb4   : > { %v4422_v38 = vpop.permute.xlu0 %473 }
  0xb5   : > { %v4424_v39 = vpop.permute.xlu1 %433  ;;  %v484_v40 = vunpack.c.l.b16 %v4422_v38  ;;  %v485_v41 = vunpack.c.h.b16 %v4422_v38 }
  0xb6   : > { %v396_v58 = vpop.permute.xlu2 %395 }
  0xb7   : > { %vm488_vm3 = vcmp.ne.s32.totalorder %v484_v40, %v4370_v17  ;;  %vm489_vm4 = vcmp.ne.s32.totalorder %v485_v41, %v4373_v18  ;;  %v553_v41 = vunpack.c.l.b16 %v552_v25 }
  0xb8   : > { %vm490_vm5 = vmpackc.low %vm489_vm4, %vm488_vm3  ;;  %vm615_vm3 = vcmp.ne.s32.totalorder %v611_v55, %v4370_v17  ;;  %vm616_vm4 = vcmp.ne.s32.totalorder %v612_v56, %v4373_v18 }
  0xb9   : > { %v492_v44 = vsel %vm490_vm5, %v4313_v46, 0  ;;  %vm6769_vm5 = vcmask 15360   ;;  %vm4479_vm8 = vmpackc.low %vm616_vm4, %vm615_vm3  ;;  %vm4510_vm4 = vcmp.ne.s32.totalorder %v725_v8, %v4370_v17  ;;  %vm557_vm13 = vcmp.ne.s32.totalorder %v553_v41, %v4370_v17 }
  0xba   : > { %789 = vrot.lane.b32.xlu0 %v492_v44, %s4193_s21  ;;  %v6893_v4 = vsel %vm4479_vm8, 4294967295, %v6892_v4  ;;  %v641_v7 = vsel %vm6769_vm5, %v4375_v19, %v4402_v26  ;;  %v619_v10 = vsel %vm4479_vm8, %v4313_v46, 0  ;;  %vm4504_vm3 = vmpackc.low %vm609_vm11, %vm4475_vm7  ;;  %v718_v19 = vunpack.c.l.b16 %v4406_v29 }
  0xbb   : > { %6894 = vst [vmem:[#allocation5_spill] sm:$0xff] %v6893_v4  ;;  %v649_v12 = vunpack.c.l.b16 %v641_v7  ;;  %v650_v13 = vunpack.c.h.b16 %v641_v7  ;;  %v6901_v14 = vsel %vm4504_vm3, 4294967295, %v6900_v14  ;;  %vm6771_vm7 = vcmask 1031168   ;;  %vm731_vm10 = vmpackc.low %vm4515_vm9, %vm4510_vm4 }
  0xbc   : > { %v822_v51 = vpop.permute.xlu0 %821  ;;  %6902 = vst [vmem:[#allocation9_spill] sm:$0xff] %v6901_v14  ;;  %v568_v26 = vsel %vm4497_vm14, %v4313_v46, 0  ;;  %v618_v28 = vsel %vm4504_vm3, %v4311_v45, 0  ;;  %v6910_v29 = vmov 0  ;;  %vm4546_vm5 = vcmp.ne.s32.totalorder %v718_v19, %v4370_v17 }
  0xbd   : > { %v824_v52 = vpop.permute.xlu1 %823  ;;  %913 = vrot.lane.b32.xlu1 %v822_v51, %s4189_s14  ;;  %vm4536_vm11 = vcmp.ne.s32.totalorder %v649_v12, %v4370_v17  ;;  %vm4541_vm6 = vcmp.ne.s32.totalorder %v650_v13, %v4373_v18  ;;  %v514_v43 = vsel %vm6771_vm7, %v4416_v35, %v4418_v36  ;;  %vm4558_vm4 = vcmp.ne.s32.totalorder %v719_v22, %v4373_v18 }
  0xbe   : > { %917 = vrot.lane.b32.xlu2 %v824_v52, %s4189_s14  ;;  %v825_v2 = vsel %vm6773_vm15, %v822_v51, %v824_v52  ;;  %v6908_v27 = vsel %vm4536_vm11, 4294967295, %v6907_v27  ;;  %v6911_v29 = vsel %vm4541_vm6, 4294967295, %v6910_v29  ;;  %vm678_vm9 = vcmask 23552   ;;  %vm6774_vm2 = vmpackc.low %vm4541_vm6, %vm4536_vm11 }
  0xbf   : > { %6909 = vst [vmem:[#allocation10_spill] sm:$0xff] %v6908_v27  ;;  %v733_v47 = vsel %vm731_vm10, %v4313_v46, 0  ;;  %v515_v48 = vunpack.c.l.b16 %v514_v43  ;;  %v516_v49 = vunpack.c.h.b16 %v514_v43  ;;  %vm724_vm7 = vmpackc.low %vm4558_vm4, %vm4546_vm5  ;;  %vm558_vm15 = vcmp.ne.s32.totalorder %v554_v42, %v4373_v18 }
  0xc0   : > { %6912 = vst [vmem:[#allocation11_spill] sm:$0xff] %v6911_v29  ;;  %v680_v35 = vunpack.c.l.b16 %v4412_v33  ;;  %v679_v51 = vsel %vm678_vm9, %v4412_v33, %v4408_v31  ;;  %v657_v52 = vsel %vm6774_vm2, %v4313_v46, 0  ;;  %v732_v53 = vsel %vm724_vm7, %v4311_v45, 0  ;;  %vm4586_vm5 = vmpackc.low %vm558_vm15, %vm557_vm13 }
  0xc1   : > { %v6918_v54 = vsel %vm4586_vm5, 4294967295, %v6917_v54  ;;  %vm4592_vm10 = vcmp.ne.s32.totalorder %v515_v48, %v4370_v17  ;;  %v6920_v31 = vmov 0  ;;  %vm4597_vm4 = vcmp.ne.s32.totalorder %v516_v49, %v4373_v18 }
  0xc2   : > { %779 = vrot.lane.b32.xlu0 %v454_v57, %s4191_s19  ;;  %6919 = vst [vmem:[#allocation12_spill] sm:$0xff] %v6918_v54  ;;  %v6921_v31 = vsel %vm4592_vm10, 4294967295, %v6920_v31  ;;  %v6923_v33 = vmov 0  ;;  %v687_v55 = vunpack.c.l.b16 %v679_v51  ;;  %v688_v56 = vunpack.c.h.b16 %v679_v51  ;;  %vm6780_vm13 = vmpackc.low %vm4597_vm4, %vm4592_vm10 }
  0xc3   : > { %6922 = vst [vmem:[#allocation13_spill] sm:$0xff] %v6921_v31  ;;  %v6924_v33 = vsel %vm4597_vm4, 4294967295, %v6923_v33  ;;  %vm4602_vm7 = vcmp.ne.s32.totalorder %v680_v35, %v4370_v17  ;;  %vm685_vm15 = vcmp.ne.s32.totalorder %v681_v50, %v4373_v18  ;;  %v567_v60 = vsel %vm4586_vm5, %v4311_v45, 0 }
  0xc4   : > { %v4488_v6 = vpop.permute.xlu0 %795  ;;  %6925 = vst [vmem:[#allocation14_spill] sm:$0xff] %v6924_v33  ;;  %vm686_vm9 = vmpackc.low %vm685_vm15, %vm4602_vm7  ;;  %vm6928_vm2 = vcmask 1006592   ;;  %vm4619_vm14 = vcmp.ne.s32.totalorder %v687_v55, %v4370_v17  ;;  %vm692_vm3 = vcmp.ne.s32.totalorder %v688_v56, %v4373_v18  ;;  %v529_v3 = vsel %vm6780_vm13, %v4311_v45, 0 }
  0xc5   : > { %872 = vrot.lane.b32.xlu1 %v770_v0, %s4199_s26  ;;  %6896 = vst [vmem:[#allocation7_spill] sm:$0xff] %v4488_v6  ;;  %v522_v0 = vunpack.c.l.b16 %v4418_v36  ;;  %vm6781_vm7 = vcmask 39936   ;;  %v694_v7 = vsel %vm686_vm9, %v4311_v45, 0  ;;  %vm475_vm13 = vcmask 1022976  }
  0xc6   : > { %915 = vrot.lane.b32.xlu2 %v825_v2, %s4189_s14  ;;  %v523_v2 = vunpack.c.h.b16 %v4418_v36  ;;  %v6931_v36 = vmov 0  ;;  %v755_v12 = vsel %vm6781_vm7, %v4365_v15, %v4367_v16 }
  0xc7   : > { %vm4638_vm15 = vcmp.ne.s32.totalorder %v522_v0, %v4370_v17  ;;  %v763_v15 = vunpack.c.l.b16 %v755_v12  ;;  %v764_v16 = vunpack.c.h.b16 %v755_v12 }
  0xc8   : > { %v6932_v36 = vsel %vm4638_vm15, 4294967295, %v6931_v36  ;;  %vm4643_vm10 = vcmp.ne.s32.totalorder %v523_v2, %v4373_v18 }
  0xc9   : > { %6933 = vst [vmem:[#allocation15_spill] sm:$0xff] %v6932_v36  ;;  %vm767_vm7 = vcmp.ne.s32.totalorder %v763_v15, %v4370_v17 }
  0xca   : > { %830 = vrot.lane.b32.xlu0 %v619_v10, %s4201_s28  ;;  %v6934_v10 = vmov 0 }
  0xcb   : > { %v6935_v10 = vsel %vm4643_vm10, 4294967295, %v6934_v10 }
  0xcc   : > { %v4552_v40 = vpop.permute.xlu0 %865  ;;  %6936 = vst [vmem:[#allocation16_spill] sm:$0xff] %v6935_v10 }
  0xcd   : > { %809 = vrot.lane.b32.xlu1 %v568_v26, %s4196_s23 }
  0xce   : > { %828 = vrot.lane.b32.xlu2 %v618_v28, %s4201_s28  ;;  %v476_v28 = vsel %vm475_vm13, %v4414_v34, %v4422_v38 }
  0xcf   : > { %v477_v30 = vunpack.c.l.b16 %v476_v28  ;;  %v478_v41 = vunpack.c.h.b16 %v476_v28 }
  0xd1   : > { %vm482_vm5 = vcmp.ne.s32.totalorder %v478_v41, %v4373_v18 }
  0xd2   : > { %863 = vrot.lane.b32.xlu0 %v733_v47, %s4200_s27 }
  0xd4   : > { %v398_v59 = vpop.permute.xlu0 %397 }
  0xd5   : > { %841 = vrot.lane.b32.xlu1 %v657_v52, %s4198_s25  ;;  %v400_v61 = vsel %vm6928_vm2, %v396_v58, %v398_v59  ;;  %vm693_vm2 = vmpackc.low %vm692_vm3, %vm4619_vm14  ;;  %v408_v22 = vunpack.c.l.b16 %v398_v59  ;;  %v409_v25 = vunpack.c.h.b16 %v398_v59  ;;  %s4207_s25 = smov 16  }
  0xd6   : > { %861 = vrot.lane.b32.xlu2 %v732_v53, %s4200_s27  ;;  %v401_v8 = vunpack.c.l.b16 %v400_v61  ;;  %v402_v9 = vunpack.c.h.b16 %v400_v61  ;;  %v695_v13 = vsel %vm693_vm2, %v4313_v46, 0  ;;  %vm6782_vm3 = vmpackc.low %vm4643_vm10, %vm4638_vm15  ;;  %vm437_vm10 = vcmask 1014784  }
  0xd7   : > { %v530_v21 = vsel %vm6782_vm3, %v4313_v46, 0  ;;  %vm413_vm3 = vcmp.ne.s32.totalorder %v409_v25, %v4373_v18  ;;  %v438_v38 = vsel %vm437_vm10, %v4424_v39, %v4420_v37  ;;  %v4704_v37 = vpop.permute.xlu1 %843 }
  0xd8   : > { %vm4652_vm9 = vcmp.ne.s32.totalorder %v401_v8, %v4370_v17  ;;  %vm4657_vm14 = vcmp.ne.s32.totalorder %v402_v9, %v4373_v18  ;;  %v439_v43 = vunpack.c.l.b16 %v438_v38  ;;  %v440_v44 = vunpack.c.h.b16 %v438_v38 }
  0xd9   : > { %vm407_vm2 = vmpackc.low %vm4657_vm14, %vm4652_vm9  ;;  %vm768_vm9 = vcmp.ne.s32.totalorder %v764_v16, %v4373_v18  ;;  %vm412_vm14 = vcmp.ne.s32.totalorder %v408_v22, %v4370_v17 }
  0xda   : > { %807 = vrot.lane.b32.xlu0 %v567_v60, %s4196_s23  ;;  %v415_v26 = vsel %vm407_vm2, %v4311_v45, 0  ;;  %vm769_vm4 = vmpackc.low %vm768_vm9, %vm767_vm7  ;;  %vm481_vm2 = vcmp.ne.s32.totalorder %v477_v30, %v4370_v17 }
  0xdb   : > { %vm414_vm15 = vmpackc.low %vm413_vm3, %vm412_vm14  ;;  %v771_v42 = vsel %vm769_vm4, %v4313_v46, 0  ;;  %vm443_vm4 = vcmp.ne.s32.totalorder %v439_v43, %v4370_v17  ;;  %vm444_vm3 = vcmp.ne.s32.totalorder %v440_v44, %v4373_v18  ;;  %vm878_vm14 = vcmask 965632  }
  0xdc   : > { %v416_v34 = vsel %vm414_vm15, %v4313_v46, 0  ;;  %vm483_vm7 = vmpackc.low %vm482_vm5, %vm481_vm2  ;;  %vm6942_vm5 = vcmask 39936   ;;  %vm834_vm2 = vcmask 998400  }
  0xdd   : > { %797 = vrot.lane.b32.xlu1 %v529_v3, %s4195_s22  ;;  %v491_v47 = vsel %vm483_vm7, %v4311_v45, 0  ;;  %vm445_vm9 = vmpackc.low %vm444_vm3, %vm443_vm4  ;;  %vm856_vm7 = vcmask 982016   ;;  %vm867_vm4 = vcmask 973824   ;;  %vm845_vm3 = vcmask 990208  }
  0xde   : > { %850 = vrot.lane.b32.xlu2 %v694_v7, %s4202_s29  ;;  %v453_v46 = vsel %vm445_vm9, %v4311_v45, 0  ;;  %vm6944_vm15 = vmmov %vm6942_vm5  ;;  %vm6945_vm9 = vcmask 1039360  }
  0xdf   : > { %v4711_v17 = vpop.permute.xlu1 %832 }
  0xe2   : > { %852 = vrot.lane.b32.xlu0 %v695_v13, %s4202_s29 }
  0xe5   : > { %985 = vrot.lane.b32.xlu1 %v6788_v1, %s4203_s13 }
  0xe6   : > { %799 = vrot.lane.b32.xlu2 %v530_v21, %s4195_s22 }
  0xe7   : > { %v4715_v18 = vpop.permute.xlu1 %785 }
  0xe8   : > { %6941 = vst [vmem:[#allocation17_spill] sm:$0xff] %v4715_v18 }
  0xea   : > { %885 = vrot.lane.b32.xlu0 %v415_v26, %s4189_s14 }
  0xee   : > { %874 = vrot.lane.b32.xlu2 %v771_v42, %s4199_s26 }
  0xef   : > { %v4717_v39 = vpop.permute.xlu1 %854 }
  0xf2   : > { %887 = vrot.lane.b32.xlu0 %v416_v34, %s4189_s14 }
  0xf6   : > { %787 = vrot.lane.b32.xlu2 %v491_v47, %s4193_s21 }
  0xf7   : > { %v4724_v50 = vpop.permute.xlu1 %775 }
  0xf8   : > { %6943 = vst [vmem:[#allocation18_spill] sm:$0xff] %v4724_v50 }
  0xfa   : > { %1145 = vrot.lane.b32.xlu0 %v6788_v1, %s4204_s15 }
  0xfe   : > { %777 = vrot.lane.b32.xlu2 %v453_v46, %s4191_s19 }
 0x102   : > { %1473 = vrot.lane.b32.xlu0 %v6788_v1, %s4205_s16 }
 0x104   : > { %v840_v35 = vpop.permute.xlu0 %839 }
 0x106   : > { %883 = vrot.lane.b32.xlu2 %v6788_v1, %s4189_s14 }
 0x10e   : > { %1307 = vrot.lane.b32.xlu2 %v6788_v1, %s4206_s17 }
 0x118   : > { %v918_v45 = vpop.permute.xlu2 %917 }
 0x120   : > { %v916_v48 = vpop.permute.xlu2 %915 }
 0x121   : > { %v4720_v49 = vsel %vm6942_vm5, %v916_v48, %v918_v45 }
 0x122   : > { %1169 = vrot.lane.b32.xlu0 %v4720_v49, %s4204_s15 }
 0x128   : > { %v829_v51 = vpop.permute.xlu2 %828 }
 0x12a   : > { %919 = vrot.lane.b32.xlu0 %v829_v51, %s4189_s14 }
 0x12c   : > { %v4727_v52 = vpop.permute.xlu0 %789 }
 0x12f   : > { %v914_v53 = vpop.permute.xlu1 %913 }
 0x130   : > { %v4730_v55 = vsel %vm6944_vm15, %v914_v53, %v916_v48  ;;  %v862_v56 = vpop.permute.xlu2 %861  ;;  %vm6946_vm15 = vcmask 1031168  }
 0x131   : > { %1167 = vrot.lane.b32.xlu1 %v4730_v55, %s4204_s15  ;;  %1007 = vrot.lane.b32.xlu2 %v4730_v55, %s4203_s13 }
 0x132   : > { %937 = vrot.lane.b32.xlu0 %v862_v56, %s4189_s14 }
 0x134   : > { %v780_v57 = vpop.permute.xlu0 %779 }
 0x137   : > { %v873_v58 = vpop.permute.xlu1 %872 }
 0x138   : > { %v851_v59 = vpop.permute.xlu2 %850 }
 0x139   : > { %1009 = vrot.lane.b32.xlu1 %v4720_v49, %s4203_s13  ;;  %1329 = vrot.lane.b32.xlu2 %v4730_v55, %s4206_s17 }
 0x13c   : > { %v831_v60 = vpop.permute.xlu0 %830 }
 0x13d   : > { %v835_v13 = vsel %vm834_vm2, %v829_v51, %v831_v60  ;;  %v836_v42 = vsel %vm834_vm2, %v831_v60, %v4711_v17  ;;  %vm6948_vm2 = vmmov %vm6945_vm9 }
 0x13f   : > { %v810_v61 = vpop.permute.xlu1 %809 }
 0x140   : > { %v800_v63 = vpop.permute.xlu2 %799  ;;  %911 = vrot.lane.b32.xlu0 %v810_v61, %s4189_s14 }
 0x141   : > { %925 = vrot.lane.b32.xlu1 %v840_v35, %s4189_s14  ;;  %1331 = vrot.lane.b32.xlu2 %v4720_v49, %s4206_s17 }
 0x144   : > { %v864_v0 = vpop.permute.xlu0 %863 }
 0x145   : > { %v868_v15 = vsel %vm867_vm4, %v862_v56, %v864_v0  ;;  %v869_v28 = vsel %vm867_vm4, %v864_v0, %v4552_v40  ;;  %vm6950_vm4 = vmmov %vm6942_vm5 }
 0x147   : > { %v842_v9 = vpop.permute.xlu1 %841 }
 0x148   : > { %v875_v2 = vpop.permute.xlu2 %874  ;;  %v846_v16 = vsel %vm845_vm3, %v840_v35, %v842_v9  ;;  %v847_v26 = vsel %vm845_vm3, %v842_v9, %v4704_v37  ;;  %vm6955_vm3 = vmmov %vm6950_vm4 }
 0x149   : > { %905 = vrot.lane.b32.xlu1 %v800_v63, %s4189_s14  ;;  %943 = vrot.lane.b32.xlu2 %v873_v58, %s4189_s14  ;;  %v879_v3 = vsel %vm878_vm14, %v873_v58, %v875_v2  ;;  %v880_v34 = vsel %vm878_vm14, %v875_v2, %v4550_v32  ;;  %vm6947_vm14 = vmmov %vm6946_vm15 }
 0x14a   : > { %945 = vrot.lane.b32.xlu0 %v879_v3, %s4189_s14 }
 0x14c   : > { %v808_v7 = vpop.permute.xlu0 %807 }
 0x14d   : > { %v811_v8 = vsel %vm437_vm10, %v4486_v5, %v808_v7  ;;  %v812_v25 = vsel %vm437_vm10, %v808_v7, %v810_v61 }
 0x14f   : > { %v798_v20 = vpop.permute.xlu1 %797 }
 0x150   : > { %v801_v21 = vsel %vm475_vm13, %v4488_v6, %v798_v20  ;;  %v788_v22 = vpop.permute.xlu2 %787  ;;  %v802_v47 = vsel %vm475_vm13, %v798_v20, %v800_v63  ;;  %v3866_v6 = vld [vmem:[%s6759_s1 + $0x18] sm:$0xf0] }
 0x151   : > { %899 = vrot.lane.b32.xlu1 %v4727_v52, %s4189_s14  ;;  %931 = vrot.lane.b32.xlu2 %v851_v59, %s4189_s14  ;;  %v792_v46 = vsel %vm6946_vm15, %v788_v22, %v4727_v52  ;;  %v791_v32 = vsel %vm6947_vm14, %v4715_v18, %v788_v22  ;;  %vm6958_vm15 = vmmov %vm6955_vm3 }
 0x152   : > { %907 = vrot.lane.b32.xlu0 %v811_v8, %s4189_s14  ;;  %vm6959_vm14 = vmmov %vm6955_vm3 }
 0x154   : > { %v853_v12 = vpop.permute.xlu0 %852 }
 0x155   : > { %v857_v19 = vsel %vm856_vm7, %v851_v59, %v853_v12  ;;  %v858_v35 = vsel %vm856_vm7, %v853_v12, %v4717_v39  ;;  %vm6954_vm7 = vmmov %vm6950_vm4 }
 0x158   : > { %v778_v41 = vpop.permute.xlu2 %777 }
 0x159   : > { %921 = vrot.lane.b32.xlu1 %v835_v13, %s4189_s14  ;;  %893 = vrot.lane.b32.xlu2 %v780_v57, %s4189_s14  ;;  %v782_v38 = vsel %vm6945_vm9, %v778_v41, %v780_v57  ;;  %v781_v37 = vsel %vm6948_vm2, %v4724_v50, %v778_v41  ;;  %v4817_v57 = vpop.permute.xlu1 %985  ;;  %vm6956_vm9 = vmmov %vm6955_vm3 }
 0x15a   : > { %933 = vrot.lane.b32.xlu0 %v857_v19, %s4189_s14  ;;  %vm6960_vm2 = vmmov %vm6955_vm3 }
 0x15c   : > { %v886_v30 = vpop.permute.xlu0 %885 }
 0x160   : > { %v884_v44 = vpop.permute.xlu2 %883 }
 0x161   : > { %939 = vrot.lane.b32.xlu1 %v868_v15, %s4189_s14  ;;  %927 = vrot.lane.b32.xlu2 %v846_v16, %s4189_s14  ;;  %v4800_v48 = vsel %vm6950_vm4, %v884_v44, %v886_v30  ;;  %vm6961_vm4 = vmmov %vm6960_vm2 }
 0x162   : > { %901 = vrot.lane.b32.xlu0 %v801_v21, %s4189_s14 }
 0x164   : > { %v888_v43 = vpop.permute.xlu0 %887 }
 0x165   : > { %v4780_v40 = vsel %vm6942_vm5, %v886_v30, %v888_v43  ;;  %vm6957_vm5 = vmmov %vm6955_vm3 }
 0x168   : > { %v4795_v17 = vpop.permute.xlu2 %1307 }
 0x169   : > { %909 = vrot.lane.b32.xlu1 %v812_v25, %s4189_s14  ;;  %929 = vrot.lane.b32.xlu2 %v847_v26, %s4189_s14  ;;  %6949 = vst [vmem:[#allocation19_spill] sm:$0xff] %v4795_v17 }
 0x16a   : > { %941 = vrot.lane.b32.xlu0 %v869_v28, %s4189_s14 }
 0x16c   : > { %v4797_v45 = vpop.permute.xlu0 %1145 }
 0x171   : > { %923 = vrot.lane.b32.xlu1 %v836_v42, %s4189_s14  ;;  %947 = vrot.lane.b32.xlu2 %v880_v34, %s4189_s14 }
 0x172   : > { %891 = vrot.lane.b32.xlu0 %v782_v38, %s4189_s14 }
 0x174   : > { %v4809_v52 = vpop.permute.xlu0 %1473 }
 0x175   : > { %6951 = vst [vmem:[#allocation20_spill] sm:$0xff] %v4809_v52 }
 0x179   : > { %903 = vrot.lane.b32.xlu1 %v802_v47, %s4189_s14  ;;  %897 = vrot.lane.b32.xlu2 %v792_v46, %s4189_s14 }
 0x17a   : > { %989 = vrot.lane.b32.xlu0 %v4780_v40, %s4203_s13 }
 0x181   : > { %895 = vrot.lane.b32.xlu1 %v791_v32, %s4189_s14  ;;  %889 = vrot.lane.b32.xlu2 %v781_v37, %s4189_s14 }
 0x189   : > { %935 = vrot.lane.b32.xlu1 %v858_v35, %s4189_s14  ;;  %1147 = vrot.lane.b32.xlu2 %v4800_v48, %s4204_s15 }
 0x18b   : > { %v4807_v51 = vpop.permute.xlu2 %1007 }
 0x191   : > { %987 = vrot.lane.b32.xlu1 %v4800_v48, %s4203_s13 }
 0x193   : > { %v4813_v53 = vpop.permute.xlu2 %1329 }
 0x194   : > { %v4815_v56 = vpop.permute.xlu0 %1169 }
 0x19b   : > { %v4819_v58 = vpop.permute.xlu2 %1331 }
 0x19c   : > { %6952 = vst [vmem:[#allocation21_spill] sm:$0xff] %v4819_v58  ;;  %v920_v39 = vpop.permute.xlu0 %919 }
 0x1a3   : > { %v4821_v59 = vpop.permute.xlu1 %1167  ;;  %v944_v60 = vpop.permute.xlu2 %943 }
 0x1a4   : > { %v938_v61 = vpop.permute.xlu0 %937 }
 0x1ab   : > { %v4823_v63 = vpop.permute.xlu1 %1009  ;;  %v932_v0 = vpop.permute.xlu2 %931 }
 0x1ac   : > { %6953 = vst [vmem:[#allocation22_spill] sm:$0xff] %v4823_v63 }
 0x1b2   : > { %v912_v2 = vpop.permute.xlu0 %911 }
 0x1b3   : > { %v926_v3 = vpop.permute.xlu1 %925  ;;  %v4825_v7 = vpop.permute.xlu2 %893 }
 0x1bb   : > { %v906_v8 = vpop.permute.xlu1 %905  ;;  %v928_v9 = vpop.permute.xlu2 %927 }
 0x1bc   : > { %v4828_v12 = vsel %vm6954_vm7, %v926_v3, %v928_v9  ;;  %v946_v13 = vpop.permute.xlu0 %945  ;;  %vm6962_vm7 = vmmov %vm6960_vm2 }
 0x1bd   : > { %v4831_v19 = vsel %vm6955_vm3, %v944_v60, %v946_v13  ;;  %1015 = vrot.lane.b32.xlu2 %v4828_v12, %s4203_s13  ;;  %1175 = vrot.lane.b32.xlu1 %v4828_v12, %s4204_s15  ;;  %vm6963_vm3 = vmmov %vm6960_vm2 }
 0x1be   : > { %1027 = vrot.lane.b32.xlu0 %v4831_v19, %s4203_s13 }
 0x1c3   : > { %v900_v20 = vpop.permute.xlu1 %899  ;;  %v930_v22 = vpop.permute.xlu2 %929 }
 0x1c4   : > { %v908_v15 = vpop.permute.xlu0 %907  ;;  %v4847_v28 = vsel %vm6957_vm5, %v928_v9, %v930_v22  ;;  %vm6965_vm5 = vmmov %vm6960_vm2 }
 0x1cb   : > { %v922_v16 = vpop.permute.xlu1 %921  ;;  %v948_v42 = vpop.permute.xlu2 %947 }
 0x1cc   : > { %v4840_v21 = vsel %vm6956_vm9, %v920_v39, %v922_v16  ;;  %v934_v25 = vpop.permute.xlu0 %933  ;;  %v4865_v43 = vsel %vm6961_vm4, %v946_v13, %v948_v42  ;;  %vm6964_vm9 = vmmov %vm6960_vm2 }
 0x1cd   : > { %1171 = vrot.lane.b32.xlu1 %v4840_v21, %s4204_s15  ;;  %1011 = vrot.lane.b32.xlu2 %v4840_v21, %s4203_s13  ;;  %v4853_v41 = vsel %vm6959_vm14, %v932_v0, %v934_v25  ;;  %vm6967_vm14 = vmmov %vm6960_vm2 }
 0x1ce   : > { %vm6968_vm4 = vmmov %vm6960_vm2 }
 0x1d3   : > { %v940_v26 = vpop.permute.xlu1 %939  ;;  %v898_v39 = vpop.permute.xlu2 %897 }
 0x1d4   : > { %v4850_v30 = vsel %vm6958_vm15, %v938_v61, %v940_v26  ;;  %v902_v46 = vpop.permute.xlu0 %901  ;;  %vm6966_vm15 = vmmov %vm6960_vm2 }
 0x1d5   : > { %1017 = vrot.lane.b32.xlu2 %v4847_v28, %s4203_s13  ;;  %1023 = vrot.lane.b32.xlu0 %v4850_v30, %s4203_s13 }
 0x1d6   : > { %1019 = vrot.lane.b32.xlu1 %v4853_v41, %s4203_s13 }
 0x1db   : > { %v910_v34 = vpop.permute.xlu1 %909  ;;  %v890_v9 = vpop.permute.xlu2 %889 }
 0x1dc   : > { %v4862_v38 = vsel %vm6960_vm2, %v908_v15, %v910_v34  ;;  %v942_v35 = vpop.permute.xlu0 %941  ;;  %v4904_v22 = vsel %vm6960_vm2, %v910_v34, %v912_v2 }
 0x1dd   : > { %1163 = vrot.lane.b32.xlu2 %v4862_v38, %s4204_s15  ;;  %1003 = vrot.lane.b32.xlu0 %v4862_v38, %s4203_s13  ;;  %v4889_v0 = vsel %vm6965_vm5, %v940_v26, %v942_v35  ;;  %vm1191_vm5 = vcmask 654336  }
 0x1de   : > { %1029 = vrot.lane.b32.xlu1 %v4865_v43, %s4203_s13 }
 0x1e3   : > { %v924_v44 = vpop.permute.xlu1 %923  ;;  %v4927_v2 = vpop.permute.xlu2 %1147 }
 0x1e4   : > { %v4874_v47 = vsel %vm6962_vm7, %v922_v16, %v924_v44  ;;  %v892_v3 = vpop.permute.xlu0 %891  ;;  %vm6969_vm7 = vmmov %vm6960_vm2 }
 0x1e5   : > { %1013 = vrot.lane.b32.xlu0 %v4874_v47, %s4203_s13  ;;  %v4898_v15 = vsel %vm6966_vm15, %v890_v9, %v892_v3  ;;  %vm6870_vm15 = vcmask 392192  }
 0x1eb   : > { %v904_v32 = vpop.permute.xlu1 %903 }
 0x1ec   : > { %v4879_v37 = vsel %vm6963_vm3, %v902_v46, %v904_v32  ;;  %v4913_v26 = vsel %vm6968_vm4, %v904_v32, %v906_v8  ;;  %v4930_v8 = vsel %vm6969_vm7, %v898_v39, %v900_v20  ;;  %vm6970_vm3 = vmmov %vm6960_vm2  ;;  %v4956_v20 = vpop.permute.xlu0 %989  ;;  %vm1685_vm2 = vcmask 130048  }
 0x1ed   : > { %1159 = vrot.lane.b32.xlu0 %v4879_v37, %s4204_s15  ;;  %999 = vrot.lane.b32.xlu2 %v4879_v37, %s4203_s13  ;;  %6971 = vst [vmem:[#allocation23_spill] sm:$0xff] %v4956_v20  ;;  %vm6871_vm4 = vcmask 916480   ;;  %vm6872_vm7 = vcmask 785408  }
 0x1f3   : > { %v896_v60 = vpop.permute.xlu1 %895 }
 0x1f4   : > { %v4886_v61 = vsel %vm6964_vm9, %v896_v60, %v898_v39  ;;  %vm1031_vm9 = vcmask 523264  }
 0x1f5   : > { %1155 = vrot.lane.b32.xlu1 %v4886_v61, %s4204_s15  ;;  %995 = vrot.lane.b32.xlu0 %v4886_v61, %s4203_s13  ;;  %v1042_v46 = vsel %vm1031_vm9, %v4817_v57, %v4807_v51 }
 0x1f6   : > { %1025 = vrot.lane.b32.xlu2 %v4889_v0, %s4203_s13 }
 0x1fb   : > { %v936_v13 = vpop.permute.xlu1 %935 }
 0x1fc   : > { %v4901_v16 = vsel %vm6967_vm14, %v934_v25, %v936_v13  ;;  %v4934_v25 = vsel %vm6970_vm3, %v892_v3, %v4825_v7  ;;  %vm1519_vm14 = vcmask 261120   ;;  %vm7077_vm3 = vmpackc.low %vm4541_vm6, %vm4536_vm11  ;;  %vm7091_vm11 = vcmask 1031168  }
 0x1fd   : > { %1021 = vrot.lane.b32.xlu0 %v4901_v16, %s4203_s13  ;;  %991 = vrot.lane.b32.xlu1 %v4898_v15, %s4203_s13 }
 0x1fe   : > { %1005 = vrot.lane.b32.xlu2 %v4904_v22, %s4203_s13 }
 0x203   : > { %v4969_v32 = vpop.permute.xlu1 %987 }
 0x205   : > { %1001 = vrot.lane.b32.xlu0 %v4913_v26, %s4203_s13  ;;  %1177 = vrot.lane.b32.xlu1 %v4847_v28, %s4204_s15 }
 0x206   : > { %1151 = vrot.lane.b32.xlu2 %v4898_v15, %s4204_s15 }
 0x20d   : > { %1337 = vrot.lane.b32.xlu0 %v4828_v12, %s4206_s17  ;;  %1173 = vrot.lane.b32.xlu1 %v4874_v47, %s4204_s15 }
 0x20e   : > { %1187 = vrot.lane.b32.xlu2 %v4831_v19, %s4204_s15 }
 0x215   : > { %997 = vrot.lane.b32.xlu0 %v4930_v8, %s4203_s13  ;;  %1339 = vrot.lane.b32.xlu1 %v4847_v28, %s4206_s17 }
 0x216   : > { %993 = vrot.lane.b32.xlu2 %v4934_v25, %s4203_s13  ;;  %s4099_s13 = sshll.u32 %s7195_s10, 3 }
 0x217   : > { %v1016_v42 = vpop.permute.xlu2 %1015 }
 0x218   : > { %v1046_v34 = vsel %vm1031_vm9, %v4817_v57, %v1016_v42 }
 0x219   : > { %1080 = vmatpush.bf16.msra.mxu0 %v1046_v34 }
 0x21d   : > { %1333 = vrot.lane.b32.xlu0 %v4840_v21, %s4206_s17  ;;  %1183 = vrot.lane.b32.xlu1 %v4850_v30, %s4204_s15 }
 0x21e   : > { %1349 = vrot.lane.b32.xlu2 %v4831_v19, %s4206_s17 }
 0x225   : > { %1189 = vrot.lane.b32.xlu0 %v4865_v43, %s4204_s15  ;;  %1335 = vrot.lane.b32.xlu1 %v4874_v47, %s4206_s17 }
 0x226   : > { %1179 = vrot.lane.b32.xlu2 %v4853_v41, %s4204_s15 }
 0x227   : > { %v1012_v7 = vpop.permute.xlu2 %1011 }
 0x228   : > { %v1044_v44 = vsel %vm1031_vm9, %v4817_v57, %v1012_v7 }
 0x229   : > { %1081 = vmatpush.bf16.msra.mxu0 %v1044_v44 }
 0x22d   : > { %1082 = vmatpush.bf16.msra.mxu0 %v1042_v46  ;;  %1325 = vrot.lane.b32.xlu0 %v4862_v38, %s4206_s17 }
 0x22e   : > { %1321 = vrot.lane.b32.xlu2 %v4879_v37, %s4206_s17  ;;  %1165 = vrot.lane.b32.xlu1 %v4904_v22, %s4204_s15 }
 0x22f   : > { %v4971_v35 = vpop.permute.xlu2 %1017  ;;  %v4986_v9 = vpop.permute.xlu1 %1175 }
 0x230   : > { %v1028_v39 = vpop.permute.xlu0 %1027  ;;  %v4975_v60 = vsel %vm1031_vm9, %v1016_v42, %v4971_v35  ;;  %v1206_v18 = vsel %vm1191_vm5, %v4797_v45, %v4986_v9 }
 0x231   : > { %v1052_v3 = vsel %vm1031_vm9, %v4817_v57, %v1028_v39  ;;  %1108 = vmatpush.bf16.msra.mxu2 %v4975_v60 }
 0x232   : > { %1099 = vmatpush.bf16.msra.mxu1 %v1052_v3 }
 0x235   : > { %1345 = vrot.lane.b32.xlu0 %v4850_v30, %s4206_s17 }
 0x236   : > { %1181 = vrot.lane.b32.xlu2 %v4901_v16, %s4204_s15  ;;  %1185 = vrot.lane.b32.xlu1 %v4889_v0, %s4204_s15 }
 0x237   : > { %v4994_v13 = vpop.permute.xlu2 %1163 }
 0x23d   : > { %1327 = vrot.lane.b32.xlu0 %v4904_v22, %s4206_s17 }
 0x23e   : > { %1157 = vrot.lane.b32.xlu2 %v4930_v8, %s4204_s15  ;;  %1161 = vrot.lane.b32.xlu1 %v4913_v26, %s4204_s15 }
 0x23f   : > { %v4996_v42 = vpop.permute.xlu1 %1171 }
 0x240   : > { %v1204_v10 = vsel %vm1191_vm5, %v4797_v45, %v4996_v42 }
 0x245   : > { %1317 = vrot.lane.b32.xlu0 %v4886_v61, %s4206_s17 }
 0x246   : > { %1323 = vrot.lane.b32.xlu2 %v4913_v26, %s4206_s17  ;;  %1503 = vrot.lane.b32.xlu1 %v4828_v12, %s4205_s16 }
 0x247   : > { %v5004_v34 = vpop.permute.xlu2 %999  ;;  %v1024_v44 = vpop.permute.xlu0 %1023 }
 0x248   : > { %v5006_v46 = vpop.permute.xlu1 %1019  ;;  %v1050_v3 = vsel %vm1031_vm9, %v4817_v57, %v1024_v44 }
 0x249   : > { %1100 = vmatpush.bf16.msra.mxu1 %v1050_v3  ;;  %v1048_v1 = vsel %vm1031_vm9, %v4817_v57, %v5006_v46 }
 0x24d   : > { %1505 = vrot.lane.b32.xlu0 %v4847_v28, %s4205_s16  ;;  %1101 = vmatpush.bf16.msra.mxu1 %v1048_v1 }
 0x24e   : > { %1313 = vrot.lane.b32.xlu2 %v4898_v15, %s4206_s17  ;;  %1341 = vrot.lane.b32.xlu1 %v4853_v41, %s4206_s17 }
 0x24f   : > { %v1004_v3 = vpop.permute.xlu0 %1003 }
 0x250   : > { %v5022_v31 = vpop.permute.xlu1 %1029  ;;  %v5024_v33 = vpop.permute.xlu2 %1025  ;;  %v1040_v1 = vsel %vm1031_vm9, %v4817_v57, %v1004_v3 }
 0x251   : > { %1239 = vmatpush.bf16.msrb.mxu1 %v1206_v18  ;;  %6972 = vst [vmem:[#allocation24_spill] sm:$0xff] %v5022_v31  ;;  %1083 = vmatpush.bf16.msra.mxu0 %v1040_v1  ;;  %v5030_v36 = vsel %vm1031_vm9, %v1028_v39, %v5022_v31  ;;  %v1038_v18 = vsel %vm1031_vm9, %v4817_v57, %v5004_v34 }
 0x252   : > { %6973 = vst [vmem:[#allocation25_spill] sm:$0xff] %v5024_v33  ;;  %1127 = vmatpush.bf16.msra.mxu3 %v5030_v36  ;;  %v5047_v39 = vsel %vm1031_vm9, %v1024_v44, %v5024_v33  ;;  %v4102_v44 = vld [vmem:[%s6759_s1 + $0x14] sm:$0xf] }
 0x253   : > { %6974 = vst [vmem:[#allocation26_spill] sm:$0xff] %v5030_v36  ;;  %v3869_v5 = vor.u32 %v4102_v44, %v3866_v6 }
 0x254   : > { %6975 = vst [vmem:[#allocation27_spill] sm:$0xff] %v5047_v39 }
 0x255   : > { %1240 = vmatpush.bf16.msrb.mxu1 %v1204_v10  ;;  %1495 = vrot.lane.b32.xlu0 %v4730_v55, %s4205_s16  ;;  %v1202_v10 = vsel %vm1191_vm5, %v4797_v45, %v4821_v59 }
 0x256   : > { %1084 = vmatpush.bf16.msra.mxu0 %v1038_v18  ;;  %1351 = vrot.lane.b32.xlu2 %v4865_v43, %s4206_s17 }
 0x257   : > { %1499 = vrot.lane.b32.xlu1 %v4840_v21, %s4205_s16  ;;  %1128 = vmatpush.bf16.msra.mxu3 %v5047_v39  ;;  %v5053_v1 = vpop.permute.xlu0 %1013  ;;  %v1032_v39 = vsel %vm1031_vm9, %v4817_v57, %v4969_v32 }
 0x258   : > { %v5055_v18 = vpop.permute.xlu2 %1005  ;;  %v5059_v50 = vsel %vm1031_vm9, %v1012_v7, %v5053_v1  ;;  %v5074_v7 = vsel %vm1031_vm9, %v4807_v51, %v4823_v63  ;;  %3870 = vmatmul.msk.bf16.vlgmr.msra.gmra.mxu1 %vm6870_vm15, %v3869_v5 }
 0x259   : > { %1241 = vmatpush.bf16.msrb.mxu1 %v1202_v10  ;;  %6976 = vst [vmem:[#allocation28_spill] sm:$0xff] %v5055_v18  ;;  %1109 = vmatpush.bf16.msra.mxu2 %v5059_v50  ;;  %v1200_v10 = vsel %vm1191_vm5, %v4797_v45, %v4994_v13  ;;  %v5090_v51 = vsel %vm1031_vm9, %v1004_v3, %v5055_v18 }
 0x25a   : > { %6977 = vst [vmem:[#allocation29_spill] sm:$0xff] %v5074_v7 }
 0x25b   : > { %6978 = vst [vmem:[#allocation30_spill] sm:$0xff] %v5090_v51 }
 0x25d   : > { %1242 = vmatpush.bf16.msrb.mxu1 %v1200_v10  ;;  %1501 = vrot.lane.b32.xlu0 %v4874_v47, %s4205_s16 }
 0x25e   : > { %1110 = vmatpush.bf16.msra.mxu2 %v5074_v7  ;;  %1309 = vrot.lane.b32.xlu2 %v4800_v48, %s4206_s17 }
 0x25f   : > { %1153 = vrot.lane.b32.xlu1 %v4934_v25, %s4204_s15  ;;  %v5084_v6 = vpop.permute.xlu0 %1159 }
 0x260   : > { %v5086_v44 = vpop.permute.xlu2 %1151  ;;  %v1198_v10 = vsel %vm1191_vm5, %v4797_v45, %v5084_v6 }
 0x261   : > { %1243 = vmatpush.bf16.msrb.mxu1 %v1198_v10  ;;  %v1194_v62 = vsel %vm1191_vm5, %v4797_v45, %v5086_v44 }
 0x262   : > { %1111 = vmatpush.bf16.msra.mxu2 %v5090_v51 }
 0x265   : > { %1491 = vrot.lane.b32.xlu0 %v4862_v38, %s4205_s16 }
 0x266   : > { %1347 = vrot.lane.b32.xlu2 %v4889_v0, %s4206_s17 }
 0x267   : > { %1319 = vrot.lane.b32.xlu1 %v4930_v8, %s4206_s17  ;;  %v5102_v11 = vpop.permute.xlu1 %1155  ;;  %v996_v3 = vpop.permute.xlu0 %995 }
 0x268   : > { %v5104_v14 = vpop.permute.xlu2 %1187  ;;  %v1036_v54 = vsel %vm1031_vm9, %v4817_v57, %v996_v3  ;;  %v1196_v10 = vsel %vm1191_vm5, %v4797_v45, %v5102_v11 }
 0x269   : > { %1085 = vmatpush.bf16.msra.mxu0 %v1036_v54  ;;  %1244 = vmatpush.bf16.msrb.mxu1 %v1196_v10  ;;  %v1212_v29 = vsel %vm1191_vm5, %v4797_v45, %v5104_v14 }
 0x26d   : > { %1497 = vrot.lane.b32.xlu0 %v4720_v49, %s4205_s16  ;;  %1245 = vmatpush.bf16.msrb.mxu1 %v1194_v62  ;;  %v1192_v62 = vsel %vm1191_vm5, %v4797_v45, %v4927_v2 }
 0x26e   : > { %1639 = vrot.lane.b32.xlu2 %v6979_v23, %s4207_s25 }
 0x26f   : > { %1149 = vrot.lane.b32.xlu1 %v4780_v40, %s4204_s15  ;;  %v992_v24 = vpop.permute.xlu1 %991  ;;  %v5120_v4 = vpop.permute.xlu0 %1021  ;;  %s4208_s15 = smov 112  }
 0x270   : > { %6980 = vst [vmem:[#allocation31_spill] sm:$0xff] %v5120_v4  ;;  %v5122_v54 = vpop.permute.xlu2 %993  ;;  %v1034_v10 = vsel %vm1031_vm9, %v4817_v57, %v992_v24  ;;  %v5129_v27 = vsel %vm1031_vm9, %v5006_v46, %v5120_v4 }
 0x271   : > { %6981 = vst [vmem:[#allocation32_spill] sm:$0xff] %v5122_v54  ;;  %1086 = vmatpush.bf16.msra.mxu0 %v1034_v10  ;;  %1129 = vmatpush.bf16.msra.mxu3 %v5129_v27  ;;  %v5194_v31 = vsel %vm1031_vm9, %v992_v24, %v5122_v54 }
 0x272   : > { %6982 = vst [vmem:[#allocation33_spill] sm:$0xff] %v5129_v27  ;;  %1246 = vmatpush.bf16.msrb.mxu1 %v1192_v62 }
 0x273   : > { %6988 = vst [vmem:[#allocation39_spill] sm:$0xff] %v5194_v31 }
 0x274   : > { %3871 = vmatmul.msk.bf16.vlgmr.msra.gmra.mxu3 %vm6870_vm15, %v3869_v5 }
 0x275   : > { %1258 = vmatpush.bf16.msrb.mxu3 %v1212_v29  ;;  %1669 = vrot.lane.b32.xlu0 %v4828_v12, %s4207_s25 }
 0x276   : > { %1087 = vmatpush.bf16.msra.mxu0 %v1032_v39  ;;  %1343 = vrot.lane.b32.xlu2 %v4901_v16, %s4206_s17 }
 0x277   : > { %1315 = vrot.lane.b32.xlu1 %v4934_v25, %s4206_s17  ;;  %v5148_v46 = vpop.permute.xlu1 %1177  ;;  %v5150_v10 = vpop.permute.xlu0 %1001 }
 0x278   : > { %6983 = vst [vmem:[#allocation34_spill] sm:$0xff] %v5150_v10  ;;  %v5152_v29 = vpop.permute.xlu2 %1349  ;;  %v5157_v5 = vsel %vm1031_vm9, %v5004_v34, %v5150_v10  ;;  %v3864_v10 = vld [vmem:[%s6759_s1 + $0x10] sm:$0xf] }
 0x279   : > { %6984 = vst [vmem:[#allocation35_spill] sm:$0xff] %v5157_v5  ;;  %1112 = vmatpush.bf16.msra.mxu2 %v5157_v5  ;;  %v1374_v39 = vsel %vm6870_vm15, %v4795_v17, %v5152_v29 }
 0x27a   : > { %1420 = vmatpush.bf16.msra.mxu1 %v1374_v39 }
 0x27d   : > { %1493 = vrot.lane.b32.xlu0 %v4904_v22, %s4205_s16 }
 0x27e   : > { %1515 = vrot.lane.b32.xlu2 %v4831_v19, %s4205_s16 }
 0x27f   : > { %1487 = vrot.lane.b32.xlu1 %v4879_v37, %s4205_s16  ;;  %v5169_v62 = vpop.permute.xlu1 %1173  ;;  %v5171_v34 = vpop.permute.xlu0 %1337 }
 0x280   : > { %v5173_v27 = vpop.permute.xlu2 %1179 }
 0x285   : > { %1665 = vrot.lane.b32.xlu0 %v4840_v21, %s4207_s25 }
 0x286   : > { %1671 = vrot.lane.b32.xlu2 %v4847_v28, %s4207_s25 }
 0x287   : > { %1311 = vrot.lane.b32.xlu1 %v4780_v40, %s4206_s17  ;;  %v5181_v39 = vpop.permute.xlu1 %1339  ;;  %v5183_v4 = vpop.permute.xlu0 %997  ;;  %s4209_s17 = smov 96  }
 0x288   : > { %6985 = vst [vmem:[#allocation36_spill] sm:$0xff] %v5181_v39  ;;  %v5185_v36 = vpop.permute.xlu2 %1321  ;;  %v5189_v33 = vsel %vm1031_vm9, %v996_v3, %v5183_v4  ;;  %v4103_v3 = vld [vmem:[%s6759_s1 + $0x14] sm:$0xf0] }
 0x289   : > { %6986 = vst [vmem:[#allocation37_spill] sm:$0xff] %v5183_v4  ;;  %1113 = vmatpush.bf16.msra.mxu2 %v5189_v33  ;;  %v3865_v24 = vor.u32 %v4103_v3, %v3864_v10  ;;  %v1368_v10 = vsel %vm6870_vm15, %v4795_v17, %v5171_v34  ;;  %v1208_v3 = vsel %vm1191_vm5, %v4797_v45, %v5173_v27 }
 0x28a   : > { %6987 = vst [vmem:[#allocation38_spill] sm:$0xff] %v5189_v33 }
 0x28b   : > { %1088 = vmatmul.bf16.vlgmr.msra.gmra.mxu0 %v3865_v24 }
 0x28d   : > { %1479 = vrot.lane.b32.xlu0 %v4898_v15, %s4205_s16  ;;  %1114 = vmatpush.bf16.msra.mxu2 %v5194_v31  ;;  %v5216_v31 = vsel %vm1031_vm9, %v4969_v32, %v4956_v20  ;;  %v5236_v32 = vsel %vm1191_vm5, %v4986_v9, %v5148_v46  ;;  %v5257_v9 = vsel %vm1191_vm5, %v4996_v42, %v5169_v62 }
 0x28e   : > { %1661 = vrot.lane.b32.xlu2 %v4730_v55, %s4207_s25  ;;  %6989 = vst [vmem:[#allocation40_spill] sm:$0xff] %v5216_v31 }
 0x28f   : > { %1483 = vrot.lane.b32.xlu1 %v4886_v61, %s4205_s16  ;;  %v1184_v54 = vpop.permute.xlu1 %1183  ;;  %v5209_v4 = vpop.permute.xlu0 %1333  ;;  %6992 = vst [vmem:[#allocation43_spill] sm:$0xff] %v5257_v9 }
 0x290   : > { %v5211_v33 = vpop.permute.xlu2 %1181  ;;  %v1210_v5 = vsel %vm1191_vm5, %v4797_v45, %v1184_v54 }
 0x291   : > { %1115 = vmatpush.bf16.msra.mxu2 %v5216_v31  ;;  %1259 = vmatpush.bf16.msrb.mxu3 %v1210_v5  ;;  %v1366_v5 = vsel %vm6870_vm15, %v4795_v17, %v5209_v4 }
 0x294   : > { %1116 = vmatmul.bf16.vlgmr.msra.gmra.mxu2 %v3865_v24 }
 0x295   : > { %1401 = vmatpush.bf16.msrb.mxu2 %v1368_v10  ;;  %1485 = vrot.lane.b32.xlu0 %v4930_v8, %s4205_s16 }
 0x296   : > { %1260 = vmatpush.bf16.msrb.mxu3 %v1208_v3  ;;  %1667 = vrot.lane.b32.xlu2 %v4874_v47, %s4207_s25 }
 0x297   : > { %1489 = vrot.lane.b32.xlu1 %v4913_v26, %s4205_s16  ;;  %v5242_v24 = vpop.permute.xlu1 %1335  ;;  %v5244_v10 = vpop.permute.xlu0 %1189 }
 0x298   : > { %6990 = vst [vmem:[#allocation41_spill] sm:$0xff] %v5242_v24  ;;  %v5246_v3 = vpop.permute.xlu2 %1157  ;;  %v5251_v20 = vsel %vm1191_vm5, %v5104_v14, %v5244_v10  ;;  %v5272_v14 = vsel %vm1191_vm5, %v4821_v59, %v4815_v56  ;;  %v3874_v59 = vld [vmem:[%s6759_s1] sm:$0xf] }
 0x299   : > { %1402 = vmatpush.bf16.msrb.mxu2 %v1366_v5  ;;  %6991 = vst [vmem:[#allocation42_spill] sm:$0xff] %v5246_v3  ;;  %1286 = vmatpush.bf16.msrb.mxu0 %v5251_v20  ;;  %v1364_v5 = vsel %vm6870_vm15, %v4795_v17, %v4813_v53 }
 0x29a   : > { %1267 = vmatpush.bf16.msra.mxu3 %v5236_v32  ;;  %6993 = vst [vmem:[#allocation44_spill] sm:$0xff] %v5272_v14 }
 0x29d   : > { %1403 = vmatpush.bf16.msrb.mxu2 %v1364_v5  ;;  %1475 = vrot.lane.b32.xlu0 %v4800_v48, %s4205_s16 }
 0x29e   : > { %1268 = vmatpush.bf16.msra.mxu3 %v5257_v9  ;;  %1657 = vrot.lane.b32.xlu2 %v4862_v38, %s4207_s25 }
 0x29f   : > { %1511 = vrot.lane.b32.xlu1 %v4850_v30, %s4205_s16  ;;  %v1326_v42 = vpop.permute.xlu0 %1325 }
 0x2a0   : > { %v5275_v31 = vpop.permute.xlu2 %1323  ;;  %v5277_v5 = vpop.permute.xlu1 %1165  ;;  %v1362_v18 = vsel %vm6870_vm15, %v4795_v17, %v1326_v42 }
 0x2a1   : > { %6994 = vst [vmem:[#allocation45_spill] sm:$0xff] %v5275_v31  ;;  %1404 = vmatpush.bf16.msrb.mxu2 %v1362_v18  ;;  %v5284_v51 = vsel %vm1191_vm5, %v4994_v13, %v5277_v5  ;;  %v1360_v18 = vsel %vm6870_vm15, %v4795_v17, %v5185_v36 }
 0x2a2   : > { %1269 = vmatpush.bf16.msra.mxu3 %v5272_v14  ;;  %6995 = vst [vmem:[#allocation46_spill] sm:$0xff] %v5277_v5  ;;  %v4101_v14 = vld [vmem:[%s6759_s1 + $0x4] sm:$0xf0] }
 0x2a3   : > { %6996 = vst [vmem:[#allocation47_spill] sm:$0xff] %v5284_v51  ;;  %v5292_v63 = vor.u32 %v4101_v14, %v3874_v59 }
 0x2a5   : > { %1247 = vmatmul.bf16.vlgmr.msrb.gmra.mxu1 %v5292_v63  ;;  %1481 = vrot.lane.b32.xlu0 %v4934_v25, %s4205_s16 }
 0x2a6   : > { %1270 = vmatpush.bf16.msra.mxu3 %v5284_v51  ;;  %1405 = vmatpush.bf16.msrb.mxu2 %v1360_v18  ;;  %v5328_v18 = vsel %vm1191_vm5, %v5173_v27, %v5211_v33 }
 0x2a7   : > { %1663 = vrot.lane.b32.xlu2 %v4720_v49, %s4207_s25  ;;  %1517 = vrot.lane.b32.xlu1 %v4865_v43, %s4205_s16  ;;  %v5305_v13 = vpop.permute.xlu0 %1345 }
 0x2a8   : > { %v5307_v14 = vpop.permute.xlu2 %1313  ;;  %v5309_v59 = vpop.permute.xlu1 %1185  ;;  %v1372_v51 = vsel %vm6870_vm15, %v4795_v17, %v5305_v13 }
 0x2a9   : > { %v5316_v5 = vsel %vm1191_vm5, %v1184_v54, %v5309_v59  ;;  %1421 = vmatpush.bf16.msra.mxu1 %v1372_v51  ;;  %v5334_v51 = vsel %vm6870_vm15, %v5171_v34, %v5181_v39  ;;  %v5352_v34 = vsel %vm6870_vm15, %v5209_v4, %v5242_v24  ;;  %v5370_v4 = vsel %vm6870_vm15, %v4813_v53, %v4819_v58 }
 0x2aa   : > { %1287 = vmatpush.bf16.msrb.mxu0 %v5316_v5  ;;  %6997 = vst [vmem:[#allocation48_spill] sm:$0xff] %v5334_v51  ;;  %v1356_v53 = vsel %vm6870_vm15, %v4795_v17, %v5307_v14 }
 0x2ab   : > { %7002 = vst [vmem:[#allocation53_spill] sm:$0xff] %v5352_v34 }
 0x2ac   : > { %7004 = vst [vmem:[#allocation55_spill] sm:$0xff] %v5370_v4 }
 0x2ad   : > { %1653 = vrot.lane.b32.xlu0 %v4879_v37, %s4207_s25 }
 0x2ae   : > { %1288 = vmatpush.bf16.msrb.mxu0 %v5328_v18 }
 0x2af   : > { %1509 = vrot.lane.b32.xlu2 %v4901_v16, %s4205_s16  ;;  %1507 = vrot.lane.b32.xlu1 %v4853_v41, %s4205_s16  ;;  %v5336_v54 = vpop.permute.xlu0 %1327 }
 0x2b0   : > { %6998 = vst [vmem:[#allocation49_spill] sm:$0xff] %v5336_v54  ;;  %v5339_v7 = vpop.permute.xlu2 %1351  ;;  %v5341_v9 = vpop.permute.xlu1 %1161  ;;  %v5384_v39 = vsel %vm6870_vm15, %v1326_v42, %v5336_v54  ;;  %v4104_v42 = vld [vmem:[%s6759_s1 + $0x24] sm:$0xf] }
 0x2b1   : > { %6999 = vst [vmem:[#allocation50_spill] sm:$0xff] %v5339_v7  ;;  %v5346_v27 = vsel %vm1191_vm5, %v5084_v6, %v5341_v9  ;;  %v5364_v6 = vsel %vm1191_vm5, %v5102_v11, %v5246_v3 }
 0x2b2   : > { %1429 = vmatpush.bf16.msra.mxu0 %v5334_v51  ;;  %7000 = vst [vmem:[#allocation51_spill] sm:$0xff] %v5341_v9  ;;  %1271 = vmatpush.bf16.msra.mxu3 %v5346_v27 }
 0x2b3   : > { %7001 = vst [vmem:[#allocation52_spill] sm:$0xff] %v5346_v27 }
 0x2b4   : > { %7003 = vst [vmem:[#allocation54_spill] sm:$0xff] %v5364_v6 }
 0x2b5   : > { %1659 = vrot.lane.b32.xlu0 %v4904_v22, %s4207_s25  ;;  %7005 = vst [vmem:[#allocation56_spill] sm:$0xff] %v5384_v39 }
 0x2b6   : > { %1430 = vmatpush.bf16.msra.mxu0 %v5352_v34  ;;  %1272 = vmatpush.bf16.msra.mxu3 %v5364_v6 }
 0x2b7   : > { %1681 = vrot.lane.b32.xlu2 %v4831_v19, %s4207_s25  ;;  %1513 = vrot.lane.b32.xlu1 %v4889_v0, %s4205_s16  ;;  %v5372_v34 = vpop.permute.xlu0 %1317 }
 0x2b8   : > { %v5375_v51 = vpop.permute.xlu2 %1309  ;;  %v5377_v24 = vpop.permute.xlu1 %1503  ;;  %v1358_v11 = vsel %vm6870_vm15, %v4795_v17, %v5372_v34 }
 0x2b9   : > { %1406 = vmatpush.bf16.msrb.mxu2 %v1358_v11  ;;  %v3888_v11 = vld [vmem:[%s6759_s1 + $0x28] sm:$0xf0]  ;;  %v1354_v58 = vsel %vm6870_vm15, %v4795_v17, %v5375_v51 }
 0x2ba   : > { %1431 = vmatpush.bf16.msra.mxu0 %v5370_v4  ;;  %v3891_v27 = vor.u32 %v4104_v42, %v3888_v11 }
 0x2bd   : > { %1655 = vrot.lane.b32.xlu0 %v4913_v26, %s4207_s25  ;;  %1407 = vmatpush.bf16.msrb.mxu2 %v1356_v53 }
 0x2be   : > { %1432 = vmatpush.bf16.msra.mxu0 %v5384_v39  ;;  %v5405_v39 = vsel %vm6870_vm15, %v5185_v36, %v5275_v31  ;;  %v4100_v36 = vld [vmem:[%s6759_s1 + $0x4] sm:$0xf]  ;;  %v5424_v31 = vsel %vm6870_vm15, %v5152_v29, %v5339_v7 }
 0x2bf   : > { %1677 = vrot.lane.b32.xlu2 %v4850_v30, %s4207_s25  ;;  %1477 = vrot.lane.b32.xlu1 %v4780_v40, %s4205_s16  ;;  %7006 = vst [vmem:[#allocation57_spill] sm:$0xff] %v5405_v39  ;;  %v1506_v53 = vpop.permute.xlu0 %1505 }
 0x2c0   : > { %v5408_v4 = vpop.permute.xlu2 %1347  ;;  %v1342_v54 = vpop.permute.xlu1 %1341  ;;  %7008 = vst [vmem:[#allocation59_spill] sm:$0xff] %v5424_v31 }
 0x2c1   : > { %7007 = vst [vmem:[#allocation58_spill] sm:$0xff] %v5408_v4  ;;  %1408 = vmatpush.bf16.msrb.mxu2 %v1354_v58  ;;  %v1370_v6 = vsel %vm6870_vm15, %v4795_v17, %v1342_v54  ;;  %v5439_v58 = vsel %vm6870_vm15, %v5305_v13, %v5408_v4  ;;  %v1535_v4 = vsel %vm1519_vm14, %v5377_v24, %v1506_v53 }
 0x2c2   : > { %1433 = vmatpush.bf16.msra.mxu0 %v5405_v39  ;;  %v3876_v39 = vld [vmem:[%s6759_s1 + $0x8] sm:$0xf0]  ;;  %1422 = vmatpush.bf16.msra.mxu1 %v1370_v6  ;;  %7009 = vst [vmem:[#allocation60_spill] sm:$0xff] %v5439_v58 }
 0x2c3   : > { %v3879_v3 = vor.u32 %v4100_v36, %v3876_v39 }
 0x2c5   : > { %3880 = vmatmul.msk.bf16.vlgmr.msrb.gmra.mxu3 %vm6870_vm15, %v3879_v3  ;;  %3881 = vmatmul.msk.bf16.vlgmr.msrb.gmra.mxu0 %vm6870_vm15, %v3879_v3 }
 0x2c6   : > { %1448 = vmatpush.bf16.msrb.mxu1 %v5424_v31  ;;  %1651 = vrot.lane.b32.xlu0 %v4930_v8, %s4207_s25 }
 0x2c7   : > { %3892 = vmatmul.msk.bf16.vlgmr.msra.gmra.mxu1 %vm6870_vm15, %v3891_v27  ;;  %1641 = vrot.lane.b32.xlu2 %v4800_v48, %s4207_s25  ;;  %v1496_v29 = vpop.permute.xlu0 %1495 }
 0x2c8   : > { %1649 = vrot.lane.b32.xlu1 %v4886_v61, %s4207_s25  ;;  %v5442_v39 = vpop.permute.xlu2 %1639 }
 0x2c9   : > { %v1500_v3 = vpop.permute.xlu1 %1499 }
 0x2ca   : > { %1449 = vmatpush.bf16.msrb.mxu1 %v5439_v58 }
 0x2ce   : > { %1673 = vrot.lane.b32.xlu0 %v4853_v41, %s4207_s25 }
 0x2cf   : > { %1679 = vrot.lane.b32.xlu2 %v4889_v0, %s4207_s25  ;;  %v1502_v6 = vpop.permute.xlu0 %1501 }
 0x2d0   : > { %1645 = vrot.lane.b32.xlu1 %v4898_v15, %s4207_s25  ;;  %v5450_v42 = vpop.permute.xlu2 %1343 }
 0x2d1   : > { %7010 = vst [vmem:[#allocation61_spill] sm:$0xff] %v5450_v42  ;;  %v5452_v13 = vpop.permute.xlu1 %1153  ;;  %v5461_v36 = vsel %vm6870_vm15, %v1342_v54, %v5450_v42 }
 0x2d2   : > { %7011 = vst [vmem:[#allocation62_spill] sm:$0xff] %v5452_v13  ;;  %v5457_v11 = vsel %vm1191_vm5, %v5086_v44, %v5452_v13  ;;  %1450 = vmatpush.bf16.msrb.mxu1 %v5461_v36  ;;  %v1533_v44 = vsel %vm1519_vm14, %v1500_v3, %v1502_v6 }
 0x2d3   : > { %7012 = vst [vmem:[#allocation63_spill] sm:$0xff] %v5457_v11  ;;  %1273 = vmatpush.bf16.msra.mxu3 %v5457_v11  ;;  %v3900_v11 = vld [vmem:[%s6759_s1 + $0x38] sm:$0xf0] }
 0x2d4   : > { %7013 = vst [vmem:[#allocation64_spill] sm:$0xff] %v5461_v36 }
 0x2d6   : > { %1595 = vmatpush.bf16.msra.mxu1 %v1535_v4  ;;  %1932 = vrot.lane.b32.xlu0 %v4828_v12, %s4208_s15 }
 0x2d7   : > { %3893 = vmatmul.msk.bf16.vlgmr.msrb.gmra.mxu1 %vm6870_vm15, %v3891_v27  ;;  %1643 = vrot.lane.b32.xlu2 %v4780_v40, %s4207_s25  ;;  %v1492_v54 = vpop.permute.xlu0 %1491 }
 0x2d8   : > { %1683 = vrot.lane.b32.xlu1 %v4865_v43, %s4207_s25  ;;  %v5475_v53 = vpop.permute.xlu2 %1515 }
 0x2d9   : > { %v5477_v42 = vpop.permute.xlu1 %1319  ;;  %v1540_v27 = vsel %vm1519_vm14, %v4809_v52, %v5475_v53 }
 0x2da   : > { %1596 = vmatpush.bf16.msra.mxu1 %v1533_v44  ;;  %7014 = vst [vmem:[#allocation65_spill] sm:$0xff] %v5477_v42  ;;  %v5482_v4 = vsel %vm6870_vm15, %v5372_v34, %v5477_v42  ;;  %1586 = vmatpush.bf16.msra.mxu2 %v1540_v27 }
 0x2db   : > { %7015 = vst [vmem:[#allocation66_spill] sm:$0xff] %v5482_v4  ;;  %1434 = vmatpush.bf16.msra.mxu0 %v5482_v4  ;;  %v1534_v4 = vsel %vm1519_vm14, %v4809_v52, %v5377_v24 }
 0x2de   : > { %1675 = vrot.lane.b32.xlu0 %v4901_v16, %s4207_s25 }
 0x2df   : > { %1930 = vrot.lane.b32.xlu2 %v4874_v47, %s4208_s15  ;;  %v1498_v6 = vpop.permute.xlu0 %1497 }
 0x2e0   : > { %1647 = vrot.lane.b32.xlu1 %v4934_v25, %s4207_s25  ;;  %v5494_v44 = vpop.permute.xlu2 %1671  ;;  %v1531_v42 = vsel %vm1519_vm14, %v1496_v29, %v1498_v6 }
 0x2e1   : > { %v5496_v34 = vpop.permute.xlu1 %1149  ;;  %1597 = vmatpush.bf16.msra.mxu1 %v1531_v42 }
 0x2e2   : > { %7016 = vst [vmem:[#allocation67_spill] sm:$0xff] %v5496_v34  ;;  %v5502_v27 = vsel %vm1191_vm5, %v4927_v2, %v5496_v34  ;;  %v1532_v2 = vsel %vm1519_vm14, %v4809_v52, %v1500_v3  ;;  %v1528_v3 = vsel %vm1519_vm14, %v4809_v52, %v1492_v54 }
 0x2e3   : > { %7017 = vst [vmem:[#allocation68_spill] sm:$0xff] %v5502_v27  ;;  %1274 = vmatpush.bf16.msra.mxu3 %v5502_v27 }
 0x2e6   : > { %1906 = vrot.lane.b32.xlu0 %v6979_v23, %s4208_s15  ;;  %1275 = vmatmul.bf16.vlgmr.msra.gmra.mxu3 %v5292_v63 }
 0x2e7   : > { %1567 = vmatpush.bf16.msrb.mxu3 %v1534_v4  ;;  %1926 = vrot.lane.b32.xlu2 %v4720_v49, %s4208_s15  ;;  %v5517_v42 = vpop.permute.xlu0 %1669  ;;  %v1530_v4 = vsel %vm1519_vm14, %v4809_v52, %v1496_v29 }
 0x2e8   : > { %1934 = vrot.lane.b32.xlu1 %v4847_v28, %s4208_s15  ;;  %v5519_v6 = vpop.permute.xlu2 %1661  ;;  %v1700_v34 = vsel %vm1685_vm2, %v5442_v39, %v5517_v42 }
 0x2e9   : > { %v5521_v24 = vpop.permute.xlu1 %1315 }
 0x2ea   : > { %7018 = vst [vmem:[#allocation69_spill] sm:$0xff] %v5521_v24  ;;  %v5526_v63 = vsel %vm6870_vm15, %v5307_v14, %v5521_v24 }
 0x2eb   : > { %1568 = vmatpush.bf16.msrb.mxu3 %v1532_v2  ;;  %7019 = vst [vmem:[#allocation70_spill] sm:$0xff] %v5526_v63  ;;  %1435 = vmatpush.bf16.msra.mxu0 %v5526_v63 }
 0x2ee   : > { %1920 = vrot.lane.b32.xlu0 %v4862_v38, %s4208_s15 }
 0x2ef   : > { %1569 = vmatpush.bf16.msrb.mxu3 %v1530_v4  ;;  %1916 = vrot.lane.b32.xlu2 %v4879_v37, %s4208_s15  ;;  %v1494_v14 = vpop.permute.xlu0 %1493 }
 0x2f0   : > { %1928 = vrot.lane.b32.xlu1 %v4840_v21, %s4208_s15  ;;  %v5539_v2 = vpop.permute.xlu2 %1667  ;;  %v1529_v29 = vsel %vm1519_vm14, %v1492_v54, %v1494_v14 }
 0x2f1   : > { %v1488_v63 = vpop.permute.xlu1 %1487  ;;  %1598 = vmatpush.bf16.msra.mxu1 %v1529_v29 }
 0x2f2   : > { %v1526_v4 = vsel %vm1519_vm14, %v4809_v52, %v1488_v63 }
 0x2f3   : > { %1570 = vmatpush.bf16.msrb.mxu3 %v1528_v3 }
 0x2f6   : > { %1918 = vrot.lane.b32.xlu0 %v4913_v26, %s4208_s15 }
 0x2f7   : > { %1571 = vmatpush.bf16.msrb.mxu3 %v1526_v4  ;;  %2100 = vrot.lane.b32.xlu2 %v4847_v28, %s4209_s17  ;;  %v5550_v3 = vpop.permute.xlu0 %1665 }
 0x2f8   : > { %1924 = vrot.lane.b32.xlu1 %v4730_v55, %s4208_s15  ;;  %v5552_v24 = vpop.permute.xlu2 %1657 }
 0x2f9   : > { %v5554_v54 = vpop.permute.xlu1 %1311 }
 0x2fa   : > { %7020 = vst [vmem:[#allocation71_spill] sm:$0xff] %v5554_v54  ;;  %v5559_v14 = vsel %vm6870_vm15, %v5375_v51, %v5554_v54  ;;  %v3886_v51 = vld [vmem:[%s6759_s1 + $0x20] sm:$0xf] }
 0x2fb   : > { %7021 = vst [vmem:[#allocation72_spill] sm:$0xff] %v5559_v14  ;;  %1436 = vmatpush.bf16.msra.mxu0 %v5559_v14  ;;  %v4105_v14 = vld [vmem:[%s6759_s1 + $0x24] sm:$0xf0] }
 0x2fc   : > { %v3887_v54 = vor.u32 %v4105_v14, %v3886_v51 }
 0x2fe   : > { %1912 = vrot.lane.b32.xlu0 %v4886_v61, %s4208_s15  ;;  %1409 = vmatmul.bf16.vlgmr.msrb.gmra.mxu2 %v3887_v54 }
 0x2ff   : > { %1944 = vrot.lane.b32.xlu2 %v4831_v19, %s4208_s15  ;;  %v1480_v29 = vpop.permute.xlu0 %1479  ;;  %1437 = vmatmul.bf16.vlgmr.msra.gmra.mxu0 %v3887_v54 }
 0x300   : > { %1922 = vrot.lane.b32.xlu1 %v4904_v22, %s4208_s15  ;;  %v1522_v27 = vsel %vm1519_vm14, %v4809_v52, %v1480_v29 }
 0x301   : > { %v5568_v4 = vpop.permute.xlu2 %1663  ;;  %v1484_v36 = vpop.permute.xlu1 %1483 }
 0x302   : > { %v1524_v58 = vsel %vm1519_vm14, %v4809_v52, %v1484_v36 }
 0x303   : > { %1572 = vmatpush.bf16.msrb.mxu3 %v1524_v58 }
 0x306   : > { %1946 = vrot.lane.b32.xlu0 %v4865_v43, %s4208_s15 }
 0x307   : > { %2096 = vrot.lane.b32.xlu2 %v4874_v47, %s4209_s17  ;;  %1573 = vmatpush.bf16.msrb.mxu3 %v1522_v27  ;;  %v1486_v31 = vpop.permute.xlu0 %1485 }
 0x308   : > { %2098 = vrot.lane.b32.xlu1 %v4828_v12, %s4209_s17  ;;  %v1525_v54 = vsel %vm1519_vm14, %v1484_v36, %v1486_v31 }
 0x309   : > { %v5586_v7 = vpop.permute.xlu2 %1509  ;;  %v1490_v58 = vpop.permute.xlu1 %1489 }
 0x30a   : > { %v1527_v14 = vsel %vm1519_vm14, %v1488_v63, %v1490_v58 }
 0x30b   : > { %1599 = vmatpush.bf16.msra.mxu1 %v1527_v14 }
 0x30e   : > { %2072 = vrot.lane.b32.xlu0 %v6979_v23, %s4209_s17 }
 0x30f   : > { %1910 = vrot.lane.b32.xlu2 %v4934_v25, %s4208_s15  ;;  %1600 = vmatpush.bf16.msra.mxu1 %v1525_v54  ;;  %v5596_v27 = vpop.permute.xlu0 %1475 }
 0x310   : > { %1914 = vrot.lane.b32.xlu1 %v4930_v8, %s4208_s15  ;;  %v1520_v63 = vsel %vm1519_vm14, %v4809_v52, %v5596_v27 }
 0x311   : > { %v5598_v51 = vpop.permute.xlu2 %1681  ;;  %v1512_v17 = vpop.permute.xlu1 %1511  ;;  %1574 = vmatpush.bf16.msrb.mxu3 %v1520_v63 }
 0x312   : > { %v1538_v58 = vsel %vm1519_vm14, %v4809_v52, %v1512_v17  ;;  %v1706_v14 = vsel %vm1685_vm2, %v5442_v39, %v5598_v51 }
 0x313   : > { %1587 = vmatpush.bf16.msra.mxu2 %v1538_v58 }
 0x315   : > { %1752 = vmatpush.bf16.msra.mxu3 %v1706_v14 }
 0x316   : > { %1940 = vrot.lane.b32.xlu0 %v4850_v30, %s4208_s15 }
 0x317   : > { %2090 = vrot.lane.b32.xlu2 %v4730_v55, %s4209_s17  ;;  %v1482_v31 = vpop.permute.xlu0 %1481 }
 0x318   : > { %2094 = vrot.lane.b32.xlu1 %v4840_v21, %s4209_s17  ;;  %v1523_v63 = vsel %vm1519_vm14, %v1480_v29, %v1482_v31  ;;  %v3898_v31 = vld [vmem:[%s6759_s1 + $0x30] sm:$0xf] }
 0x319   : > { %v5614_v36 = vpop.permute.xlu2 %1677  ;;  %v1518_v54 = vpop.permute.xlu1 %1517  ;;  %1601 = vmatpush.bf16.msra.mxu1 %v1523_v63 }
 0x31a   : > { %v1541_v23 = vsel %vm1519_vm14, %v5475_v53, %v1518_v54  ;;  %v1704_v58 = vsel %vm1685_vm2, %v5442_v39, %v5614_v36  ;;  %v4106_v54 = vld [vmem:[%s6759_s1 + $0x34] sm:$0xf] }
 0x31b   : > { %1614 = vmatpush.bf16.msrb.mxu0 %v1541_v23  ;;  %1753 = vmatpush.bf16.msra.mxu3 %v1704_v58  ;;  %v4107_v23 = vld [vmem:[%s6759_s1 + $0x34] sm:$0xf0]  ;;  %v3903_v13 = vor.u32 %v4106_v54, %v3900_v11 }
 0x31c   : > { %v3899_v58 = vor.u32 %v4107_v23, %v3898_v31  ;;  %v1698_v31 = vsel %vm1685_vm2, %v5442_v39, %v5550_v3 }
 0x31e   : > { %2092 = vrot.lane.b32.xlu0 %v4720_v49, %s4209_s17  ;;  %1575 = vmatmul.bf16.vlgmr.msrb.gmra.mxu3 %v3899_v58 }
 0x31f   : > { %1904 = vrot.lane.b32.xlu2 %v4780_v40, %s4208_s15  ;;  %v5628_v29 = vpop.permute.xlu0 %1653 }
 0x320   : > { %1908 = vrot.lane.b32.xlu1 %v4898_v15, %s4208_s15 }
 0x321   : > { %v5630_v14 = vpop.permute.xlu2 %1641  ;;  %v1508_v53 = vpop.permute.xlu1 %1507 }
 0x322   : > { %v1536_v63 = vsel %vm1519_vm14, %v4809_v52, %v1508_v53 }
 0x323   : > { %1588 = vmatpush.bf16.msra.mxu2 %v1536_v63  ;;  %v1696_v63 = vsel %vm1685_vm2, %v5442_v39, %v5519_v6 }
 0x326   : > { %1936 = vrot.lane.b32.xlu0 %v4853_v41, %s4208_s15  ;;  %3904 = vmatmul.msk.bf16.vlgmr.msra.gmra.mxu2 %vm6870_vm15, %v3903_v13 }
 0x327   : > { %1733 = vmatpush.bf16.msrb.mxu2 %v1700_v34  ;;  %2086 = vrot.lane.b32.xlu2 %v4862_v38, %s4209_s17  ;;  %v1660_v23 = vpop.permute.xlu0 %1659 }
 0x328   : > { %1942 = vrot.lane.b32.xlu1 %v4889_v0, %s4208_s15 }
 0x329   : > { %v5659_v11 = vpop.permute.xlu2 %1679  ;;  %v1514_v34 = vpop.permute.xlu1 %1513 }
 0x32a   : > { %v1539_v54 = vsel %vm1519_vm14, %v1512_v17, %v1514_v34  ;;  %v1694_v17 = vsel %vm1685_vm2, %v5442_v39, %v5552_v24  ;;  %v1701_v34 = vsel %vm1685_vm2, %v5517_v42, %v5494_v44  ;;  %v1699_v44 = vsel %vm1685_vm2, %v5550_v3, %v5539_v2 }
 0x32b   : > { %1734 = vmatpush.bf16.msrb.mxu2 %v1698_v31  ;;  %1615 = vmatpush.bf16.msrb.mxu0 %v1539_v54  ;;  %v1537_v31 = vsel %vm1519_vm14, %v1508_v53, %v5586_v7  ;;  %v1692_v7 = vsel %vm1685_vm2, %v5442_v39, %v5628_v29  ;;  %v1695_v3 = vsel %vm1685_vm2, %v5552_v24, %v1660_v23 }
 0x32e   : > { %2088 = vrot.lane.b32.xlu0 %v4904_v22, %s4209_s17 }
 0x32f   : > { %1735 = vmatpush.bf16.msrb.mxu2 %v1696_v63  ;;  %2084 = vrot.lane.b32.xlu2 %v4913_v26, %s4209_s17  ;;  %v1656_v54 = vpop.permute.xlu0 %1655 }
 0x330   : > { %1902 = vrot.lane.b32.xlu1 %v4800_v48, %s4208_s15  ;;  %1616 = vmatpush.bf16.msrb.mxu0 %v1537_v31  ;;  %v1693_v24 = vsel %vm1685_vm2, %v5628_v29, %v1656_v54  ;;  %v3910_v29 = vld [vmem:[%s6759_s1 + $0x40] sm:$0xf]  ;;  %v4109_v54 = vld [vmem:[%s6759_s1 + $0x44] sm:$0xf0] }
 0x331   : > { %v5679_v63 = vpop.permute.xlu2 %1643  ;;  %v1478_v52 = vpop.permute.xlu1 %1477 }
 0x332   : > { %v1521_v9 = vsel %vm1519_vm14, %v5596_v27, %v1478_v52  ;;  %v1697_v52 = vsel %vm1685_vm2, %v5519_v6, %v5568_v4  ;;  %v4108_v6 = vld [vmem:[%s6759_s1 + $0x44] sm:$0xf]  ;;  %v3912_v4 = vld [vmem:[%s6759_s1 + $0x48] sm:$0xf0] }
 0x333   : > { %1736 = vmatpush.bf16.msrb.mxu2 %v1694_v17  ;;  %1602 = vmatpush.bf16.msra.mxu1 %v1521_v9  ;;  %v3915_v31 = vor.u32 %v4108_v6, %v3912_v4 }
 0x334   : > { %1761 = vmatpush.bf16.msra.mxu0 %v1701_v34 }
 0x335   : > { %3905 = vmatmul.msk.bf16.vlgmr.msrb.gmra.mxu0 %vm6870_vm15, %v3903_v13 }
 0x336   : > { %2078 = vrot.lane.b32.xlu0 %v4886_v61, %s4209_s17  ;;  %1603 = vmatmul.bf16.vlgmr.msra.gmra.mxu1 %v3899_v58 }
 0x337   : > { %1737 = vmatpush.bf16.msrb.mxu2 %v1692_v7  ;;  %2110 = vrot.lane.b32.xlu2 %v4831_v19, %s4209_s17  ;;  %v3911_v7 = vor.u32 %v4109_v54, %v3910_v29 }
 0x338   : > { %1762 = vmatpush.bf16.msra.mxu0 %v1699_v44  ;;  %1938 = vrot.lane.b32.xlu1 %v4901_v16, %s4208_s15  ;;  %v1652_v9 = vpop.permute.xlu0 %1651 }
 0x339   : > { %v5699_v13 = vpop.permute.xlu2 %1930 }
 0x33a   : > { %v1650_v42 = vpop.permute.xlu1 %1649 }
 0x33b   : > { %v1690_v2 = vsel %vm1685_vm2, %v5442_v39, %v1650_v42  ;;  %v1691_v34 = vsel %vm1685_vm2, %v1650_v42, %v1652_v9 }
 0x33c   : > { %1763 = vmatpush.bf16.msra.mxu0 %v1697_v52  ;;  %1738 = vmatpush.bf16.msrb.mxu2 %v1690_v2 }
 0x33e   : > { %2112 = vrot.lane.b32.xlu0 %v4865_v43, %s4209_s17 }
 0x33f   : > { %2076 = vrot.lane.b32.xlu2 %v4934_v25, %s4209_s17 }
 0x340   : > { %1764 = vmatpush.bf16.msra.mxu0 %v1695_v3  ;;  %2082 = vrot.lane.b32.xlu1 %v4879_v37, %s4209_s17  ;;  %v1674_v27 = vpop.permute.xlu0 %1673 }
 0x341   : > { %v5719_v53 = vpop.permute.xlu2 %1926  ;;  %v1702_v23 = vsel %vm1685_vm2, %v5442_v39, %v1674_v27 }
 0x342   : > { %v1646_v58 = vpop.permute.xlu1 %1645  ;;  %1754 = vmatpush.bf16.msra.mxu3 %v1702_v23 }
 0x343   : > { %v1688_v17 = vsel %vm1685_vm2, %v5442_v39, %v1646_v58 }
 0x344   : > { %1765 = vmatpush.bf16.msra.mxu0 %v1693_v24  ;;  %1739 = vmatpush.bf16.msrb.mxu2 %v1688_v17 }
 0x345   : > { %3916 = vmatmul.msk.bf16.vlgmr.msra.gmra.mxu3 %vm6870_vm15, %v3915_v31 }
 0x346   : > { %1830 = vmatpush.bf16.msrb.mxu3 %v4828_v12  ;;  %2106 = vrot.lane.b32.xlu0 %v4850_v30, %s4209_s17  ;;  %v1686_v12 = vsel %vm1685_vm2, %v5442_v39, %v5630_v14 }
 0x347   : > { %2068 = vrot.lane.b32.xlu2 %v4800_v48, %s4209_s17 }
 0x348   : > { %1766 = vmatpush.bf16.msra.mxu0 %v1691_v34  ;;  %2080 = vrot.lane.b32.xlu1 %v4930_v8, %s4209_s17  ;;  %v1933_v44 = vpop.permute.xlu0 %1932 }
 0x349   : > { %1740 = vmatpush.bf16.msrb.mxu2 %v1686_v12  ;;  %v5745_v9 = vpop.permute.xlu2 %1916  ;;  %v1089_v12 = vpop.f32.mrf.mxu0 }
 0x34a   : > { %1831 = vmatpush.bf16.msrb.mxu3 %v4840_v21  ;;  %v1684_v52 = vpop.permute.xlu1 %1683 }
 0x34b   : > { %v1707_v42 = vsel %vm1685_vm2, %v5598_v51, %v1684_v52 }
 0x34c   : > { %1780 = vmatpush.bf16.msrb.mxu1 %v1707_v42  ;;  %1741 = vmatmul.bf16.vlgmr.msrb.gmra.mxu2 %v3911_v7 }
 0x34d   : > { %1849 = vmatpush.bf16.msra.mxu2 %v4831_v19  ;;  %v1705_v19 = vsel %vm1685_vm2, %v5614_v36, %v5659_v11  ;;  %v4110_v36 = vld [vmem:[%s6759_s1 + $0x54] sm:$0xf]  ;;  %v3924_v11 = vld [vmem:[%s6759_s1 + $0x58] sm:$0xf0] }
 0x34e   : > { %1832 = vmatpush.bf16.msrb.mxu3 %v4730_v55  ;;  %2070 = vrot.lane.b32.xlu0 %v4780_v40, %s4209_s17 }
 0x34f   : > { %2104 = vrot.lane.b32.xlu2 %v4901_v16, %s4209_s17 }
 0x350   : > { %2074 = vrot.lane.b32.xlu1 %v4898_v15, %s4209_s17  ;;  %1781 = vmatpush.bf16.msrb.mxu1 %v1705_v19  ;;  %v1676_v21 = vpop.permute.xlu0 %1675 }
 0x351   : > { %1850 = vmatpush.bf16.msra.mxu2 %v4850_v30  ;;  %v1703_v30 = vsel %vm1685_vm2, %v1674_v27, %v1676_v21  ;;  %v5764_v2 = vpop.permute.xlu2 %2100 }
 0x352   : > { %1833 = vmatpush.bf16.msrb.mxu3 %v4862_v38  ;;  %v1648_v55 = vpop.permute.xlu1 %1647  ;;  %v1687_v38 = vsel %vm1685_vm2, %v5630_v14, %v5679_v63  ;;  %v3927_v14 = vor.u32 %v4110_v36, %v3924_v11 }
 0x353   : > { %v1689_v51 = vsel %vm1685_vm2, %v1646_v58, %v1648_v55 }
 0x354   : > { %1767 = vmatpush.bf16.msra.mxu0 %v1689_v51  ;;  %1782 = vmatpush.bf16.msrb.mxu1 %v1703_v30  ;;  %v5843_v51 = vpop.f32.mrf.mxu0 }
 0x355   : > { %1851 = vmatpush.bf16.msra.mxu2 %v4853_v41 }
 0x356   : > { %1834 = vmatpush.bf16.msrb.mxu3 %v4879_v37 }
 0x357   : > { %3917 = vmatmul.msk.bf16.vlgmr.msrb.gmra.mxu1 %vm6870_vm15, %v3915_v31 }
 0x358   : > { %1858 = vmatpush.bf16.msra.mxu1 %v4847_v28  ;;  %2108 = vrot.lane.b32.xlu1 %v4889_v0, %s4209_s17  ;;  %v5781_v28 = vpop.permute.xlu0 %1906 }
 0x359   : > { %1768 = vmatpush.bf16.msra.mxu0 %v1687_v38  ;;  %v1117_v38 = vpop.f32.mrf.mxu2 }
 0x35a   : > { %1835 = vmatpush.bf16.msrb.mxu3 %v4886_v61  ;;  %v1935_v37 = vpop.permute.xlu1 %1934  ;;  %v1945_v61 = vpop.permute.xlu2 %1944 }
 0x35b   : > { %v1963_v63 = vsel %vm6871_vm4, %v1933_v44, %v1935_v37 }
 0x35c   : > { %1859 = vmatpush.bf16.msra.mxu1 %v4874_v47  ;;  %1769 = vmatmul.bf16.vlgmr.msra.gmra.mxu0 %v3911_v7  ;;  %v4111_v47 = vld [vmem:[%s6759_s1 + $0x54] sm:$0xf0] }
 0x35d   : > { %1877 = vmatpush.bf16.msrb.mxu0 %v4865_v43  ;;  %1996 = vmatpush.bf16.msrb.mxu2 %v1963_v63  ;;  %v3922_v43 = vld [vmem:[%s6759_s1 + $0x50] sm:$0xf] }
 0x35e   : > { %1836 = vmatpush.bf16.msrb.mxu3 %v4898_v15  ;;  %3928 = vmatmul.msk.bf16.vlgmr.msra.gmra.mxu2 %vm6870_vm15, %v3927_v14  ;;  %v3923_v3 = vor.u32 %v4111_v47, %v3922_v43 }
 0x360   : > { %1860 = vmatpush.bf16.msra.mxu1 %v4720_v49  ;;  %2102 = vrot.lane.b32.xlu1 %v4853_v41, %s4209_s17  ;;  %v1921_v15 = vpop.permute.xlu0 %1920  ;;  %v1962_v41 = vsel %vm6871_vm4, %v5699_v13, %v5781_v28 }
 0x361   : > { %1878 = vmatpush.bf16.msrb.mxu0 %v4889_v0  ;;  %v1964_v0 = vsel %vm6871_vm4, %v1935_v37, %v5781_v28 }
 0x362   : > { %1837 = vmatpush.bf16.msrb.mxu3 %v4800_v48  ;;  %v1929_v6 = vpop.permute.xlu1 %1928  ;;  %v5809_v48 = vpop.permute.xlu2 %2096 }
 0x363   : > { %v1961_v49 = vsel %vm6871_vm4, %v1929_v6, %v5699_v13  ;;  %v1103_v13 = vpop.f32.mrf.mxu1  ;;  %v3934_v6 = vld [vmem:[%s6759_s1 + $0x60] sm:$0xf] }
 0x364   : > { %1861 = vmatpush.bf16.msra.mxu1 %v4904_v22  ;;  %1997 = vmatpush.bf16.msrb.mxu2 %v1961_v49  ;;  %v1104_v44 = vadd.f32 %v1103_v13, %v1089_v12  ;;  %v4113_v49 = vld [vmem:[%s6759_s1 + $0x64] sm:$0xf0] }
 0x365   : > { %1879 = vmatpush.bf16.msrb.mxu0 %v4901_v16  ;;  %1838 = vmatmul.bf16.vlgmr.msrb.gmra.mxu3 %v3923_v3  ;;  %v1960_v16 = vsel %vm6871_vm4, %v5719_v53, %v5781_v28 }
 0x368   : > { %1862 = vmatpush.bf16.msra.mxu1 %v4913_v26  ;;  %v1919_v22 = vpop.permute.xlu0 %1918 }
 0x369   : > { %2024 = vmatpush.bf16.msra.mxu0 %v1964_v0  ;;  %v1955_v17 = vsel %vm6871_vm4, %v5745_v9, %v1919_v22  ;;  %v5853_v0 = vpop.f32.mrf.mxu2 }
 0x36a   : > { %v1925_v4 = vpop.permute.xlu1 %1924  ;;  %v1911_v58 = vpop.permute.xlu2 %1910 }
 0x36b   : > { %v1959_v24 = vsel %vm6871_vm4, %v1925_v4, %v5719_v53  ;;  %v5823_v31 = vpop.f32.mrf.mxu1  ;;  %v1131_v53 = vpop.f32.mrf.mxu3  ;;  %v1952_v63 = vsel %vm6871_vm4, %v1911_v58, %v5781_v28 }
 0x36c   : > { %1863 = vmatpush.bf16.msra.mxu1 %v4930_v8  ;;  %3929 = vmatmul.msk.bf16.vlgmr.msrb.gmra.mxu0 %vm6870_vm15, %v3927_v14  ;;  %v1132_v36 = vadd.f32 %v1131_v53, %v1117_v38 }
 0x36d   : > { %2025 = vmatpush.bf16.msra.mxu0 %v1962_v41  ;;  %1998 = vmatpush.bf16.msrb.mxu2 %v1959_v24  ;;  %v1290_v41 = vpop.f32.mrf.mxu0 }
 0x370   : > { %1864 = vmatpush.bf16.msra.mxu1 %v4934_v25  ;;  %v1913_v26 = vpop.permute.xlu0 %1912  ;;  %v1956_v25 = vsel %vm6871_vm4, %v1919_v22, %v5781_v28  ;;  %v3935_v22 = vor.u32 %v4113_v49, %v3934_v6 }
 0x371   : > { %2026 = vmatpush.bf16.msra.mxu0 %v1960_v16 }
 0x372   : > { %v1923_v27 = vpop.permute.xlu1 %1922  ;;  %v5836_v9 = vpop.permute.xlu2 %2090 }
 0x373   : > { %v1957_v23 = vsel %vm6871_vm4, %v1921_v15, %v1923_v27  ;;  %v1958_v8 = vsel %vm6871_vm4, %v1923_v27, %v5781_v28  ;;  %v5834_v7 = vpop.f32.mrf.mxu3  ;;  %v1248_v52 = vpop.f32.mrf.mxu1 }
 0x374   : > { %1865 = vmatpush.bf16.msra.mxu1 %v4780_v40  ;;  %1999 = vmatpush.bf16.msrb.mxu2 %v1957_v23  ;;  %v1249_v42 = vadd.f32 %v1248_v52, %v1104_v44 }
 0x375   : > { %2027 = vmatpush.bf16.msra.mxu0 %v1958_v8  ;;  %v5866_v8 = vpop.f32.mrf.mxu0 }
 0x377   : > { %1866 = vmatmul.bf16.vlgmr.msra.gmra.mxu1 %v3923_v3 }
 0x378   : > { %2000 = vmatpush.bf16.msrb.mxu2 %v1955_v17  ;;  %v1947_v40 = vpop.permute.xlu0 %1946 }
 0x379   : > { %2028 = vmatpush.bf16.msra.mxu0 %v1956_v25  ;;  %v1969_v29 = vsel %vm6871_vm4, %v1945_v61, %v1947_v40  ;;  %v1970_v54 = vsel %vm6871_vm4, %v1947_v40, %v5781_v28 }
 0x37a   : > { %v5829_v34 = vpop.permute.xlu1 %2098  ;;  %2015 = vmatpush.bf16.msra.mxu3 %v1969_v29  ;;  %2043 = vmatpush.bf16.msrb.mxu1 %v1970_v54  ;;  %v1905_v43 = vpop.permute.xlu2 %1904 }
 0x37b   : > { %v5845_v11 = vpop.f32.mrf.mxu1  ;;  %v1262_v37 = vpop.f32.mrf.mxu3  ;;  %v1950_v3 = vsel %vm6871_vm4, %v1905_v43, %v5781_v28 }
 0x37c   : > { %v1263_v14 = vadd.f32 %v1262_v37, %v1249_v42 }
 0x380   : > { %v5838_v19 = vpop.permute.xlu0 %2072 }
 0x381   : > { %v1410_v27 = vpop.f32.mrf.mxu2 }
 0x382   : > { %v1915_v21 = vpop.permute.xlu1 %1914  ;;  %v2087_v54 = vpop.permute.xlu2 %2086 }
 0x383   : > { %v1953_v55 = vsel %vm6871_vm4, %v1913_v26, %v1915_v21  ;;  %v1954_v30 = vsel %vm6871_vm4, %v1915_v21, %v5781_v28  ;;  %v5855_v15 = vpop.f32.mrf.mxu3  ;;  %v1424_v16 = vpop.f32.mrf.mxu1 }
 0x384   : > { %2001 = vmatpush.bf16.msrb.mxu2 %v1953_v55  ;;  %2029 = vmatpush.bf16.msra.mxu0 %v1954_v30  ;;  %v1425_v53 = vadd.f32 %v1424_v16, %v1410_v27  ;;  %v2129_v27 = vsel %vm6872_vm7, %v5829_v34, %v5764_v2 }
 0x386   : > { %v1457_v40 = vadd.f32 %v1425_v53, %v1263_v14 }
 0x388   : > { %2030 = vmatpush.bf16.msra.mxu0 %v1952_v63  ;;  %v1941_v47 = vpop.permute.xlu0 %1940 }
 0x389   : > { %v5875_v38 = vpop.f32.mrf.mxu2 }
 0x38a   : > { %v5849_v61 = vpop.permute.xlu1 %2094  ;;  %v2085_v63 = vpop.permute.xlu2 %2084 }
 0x38b   : > { %v1276_v26 = vpop.f32.mrf.mxu3  ;;  %v5868_v17 = vpop.f32.mrf.mxu1  ;;  %v2127_v34 = vsel %vm6872_vm7, %v5849_v61, %v5809_v48 }
 0x38c   : > { %2031 = vmatpush.bf16.msra.mxu0 %v1950_v3  ;;  %v1277_v23 = vadd.f32 %v1276_v26, %v1132_v36  ;;  %v3936_v3 = vld [vmem:[%s6759_s1 + $0x68] sm:$0xf0] }
 0x38e   : > { %v1291_v25 = vadd.f32 %v1290_v41, %v1277_v23  ;;  %v2130_v23 = vsel %vm6872_vm7, %v5764_v2, %v5838_v19 }
 0x38f   : > { %2032 = vmatmul.bf16.vlgmr.msra.gmra.mxu0 %v3935_v22 }
 0x390   : > { %v5863_v4 = vpop.permute.xlu0 %2092 }
 0x391   : > { %v2126_v61 = vsel %vm6872_vm7, %v5863_v4, %v5838_v19 }
 0x392   : > { %v1909_v24 = vpop.permute.xlu1 %1908 }
 0x393   : > { %v1951_v13 = vsel %vm6871_vm4, %v1909_v24, %v1911_v58  ;;  %v1438_v58 = vpop.f32.mrf.mxu0  ;;  %v1452_v42 = vpop.f32.mrf.mxu1 }
 0x394   : > { %2002 = vmatpush.bf16.msrb.mxu2 %v1951_v13  ;;  %v1453_v21 = vadd.f32 %v1452_v42, %v1438_v58  ;;  %v5873_v55 = vpop.f32.mrf.mxu3  ;;  %v2125_v58 = vsel %vm6872_vm7, %v5836_v9, %v5863_v4  ;;  %v2122_v4 = vsel %vm6872_vm7, %v2085_v63, %v5838_v19 }
 0x396   : > { %v1458_v36 = vadd.f32 %v1453_v21, %v1291_v25  ;;  %v2111_v25 = vpop.permute.xlu2 %2110 }
 0x398   : > { %v1937_v29 = vpop.permute.xlu0 %1936 }
 0x39a   : > { %v1943_v12 = vpop.permute.xlu1 %1942 }
 0x39b   : > { %v1967_v44 = vsel %vm6871_vm4, %v1941_v47, %v1943_v12  ;;  %v1968_v52 = vsel %vm6871_vm4, %v1943_v12, %v5781_v28  ;;  %v4112_v47 = vld [vmem:[%s6759_s1 + $0x64] sm:$0xf]  ;;  %v5884_v49 = vpop.f32.mrf.mxu0  ;;  %v5886_v16 = vpop.f32.mrf.mxu1  ;;  %v2128_v12 = vsel %vm6872_vm7, %v5809_v48, %v5838_v19 }
 0x39c   : > { %2016 = vmatpush.bf16.msra.mxu3 %v1967_v44  ;;  %2044 = vmatpush.bf16.msrb.mxu1 %v1968_v52  ;;  %v3939_v24 = vor.u32 %v4112_v47, %v3936_v3 }
 0x3a0   : > { %v2089_v30 = vpop.permute.xlu0 %2088 }
 0x3a1   : > { %v1576_v13 = vpop.f32.mrf.mxu3  ;;  %v2123_v47 = vsel %vm6872_vm7, %v2087_v54, %v2089_v30  ;;  %v2124_v3 = vsel %vm6872_vm7, %v2089_v30, %v5838_v19 }
 0x3a2   : > { %v1903_v37 = vpop.permute.xlu1 %1902 }
 0x3a3   : > { %v1949_v14 = vsel %vm6871_vm4, %v1903_v37, %v1905_v43 }
 0x3a4   : > { %2003 = vmatpush.bf16.msrb.mxu2 %v1949_v14  ;;  %v2077_v14 = vpop.permute.xlu2 %2076 }
 0x3a7   : > { %2004 = vmatmul.bf16.vlgmr.msrb.gmra.mxu2 %v3935_v22 }
 0x3a8   : > { %v2079_v6 = vpop.permute.xlu0 %2078 }
 0x3a9   : > { %v1590_v26 = vpop.f32.mrf.mxu2 }
 0x3aa   : > { %v1939_v41 = vpop.permute.xlu1 %1938  ;;  %v1591_v53 = vadd.f32 %v1590_v26, %v1576_v13  ;;  %v2118_v13 = vsel %vm6872_vm7, %v2077_v14, %v5838_v19  ;;  %v5930_v26 = vpop.f32.mrf.mxu3 }
 0x3ab   : > { %v1965_v43 = vsel %vm6871_vm4, %v1937_v29, %v1939_v41  ;;  %v1966_v22 = vsel %vm6871_vm4, %v1939_v41, %v5781_v28 }
 0x3ac   : > { %2017 = vmatpush.bf16.msra.mxu3 %v1965_v43  ;;  %2045 = vmatpush.bf16.msrb.mxu1 %v1966_v22  ;;  %v5897_v29 = vadd.f32 %v1591_v53, %v1457_v40  ;;  %v2069_v54 = vpop.permute.xlu2 %2068 }
 0x3af   : > { %3940 = vmatmul.msk.bf16.vlgmr.msra.gmra.mxu3 %vm6870_vm15, %v3939_v24  ;;  %3941 = vmatmul.msk.bf16.vlgmr.msrb.gmra.mxu1 %vm6870_vm15, %v3939_v24 }
 0x3b0   : > { %2162 = vmatpush.bf16.msrb.mxu3 %v2129_v27  ;;  %2190 = vmatpush.bf16.msra.mxu1 %v2130_v23  ;;  %v2113_v2 = vpop.permute.xlu0 %2112  ;;  %v4115_v23 = vld [vmem:[%s6759_s1 + $0x74] sm:$0xf0] }
 0x3b1   : > { %v2135_v52 = vsel %vm6872_vm7, %v2111_v25, %v2113_v2  ;;  %v2136_v40 = vsel %vm6872_vm7, %v2113_v2, %v5838_v19 }
 0x3b2   : > { %v2083_v44 = vpop.permute.xlu1 %2082  ;;  %2181 = vmatpush.bf16.msra.mxu2 %v2135_v52  ;;  %2209 = vmatpush.bf16.msrb.mxu0 %v2136_v40  ;;  %v1618_v42 = vpop.f32.mrf.mxu0 }
 0x3b3   : > { %v1604_v48 = vpop.f32.mrf.mxu1  ;;  %v2121_v43 = vsel %vm6872_vm7, %v2083_v44, %v2085_v63  ;;  %v5932_v63 = vpop.f32.mrf.mxu2 }
 0x3b4   : > { %2163 = vmatpush.bf16.msrb.mxu3 %v2127_v34  ;;  %2191 = vmatpush.bf16.msra.mxu1 %v2128_v12  ;;  %v1619_v21 = vadd.f32 %v1618_v42, %v1604_v48  ;;  %v2244_v34 = vsel %vm1191_vm5, %v5244_v10, %v4797_v45  ;;  %v2105_v40 = vpop.permute.xlu2 %2104  ;;  %v3948_v10 = vld [vmem:[%s6759_s1 + $0x78] sm:$0xf0] }
 0x3b5   : > { %v2132_v42 = vsel %vm6872_vm7, %v2105_v40, %v5838_v19 }
 0x3b6   : > { %v5916_v37 = vadd.f32 %v1619_v21, %v1458_v36 }
 0x3b8   : > { %2164 = vmatpush.bf16.msrb.mxu3 %v2125_v58  ;;  %2192 = vmatpush.bf16.msra.mxu1 %v2126_v61  ;;  %v2107_v41 = vpop.permute.xlu0 %2106  ;;  %v4114_v58 = vld [vmem:[%s6759_s1 + $0x74] sm:$0xf] }
 0x3b9   : > { %v3951_v21 = vor.u32 %v4114_v58, %v3948_v10  ;;  %v7034_v10 = vld [vmem:[#allocation52_spill] sm:$0xff] }
 0x3ba   : > { %v2081_v9 = vpop.permute.xlu1 %2080  ;;  %v5962_v48 = vpop.f32.mrf.mxu0 }
 0x3bb   : > { %v2119_v36 = vsel %vm6872_vm7, %v2079_v6, %v2081_v9  ;;  %v2120_v22 = vsel %vm6872_vm7, %v2081_v9, %v5838_v19  ;;  %v3946_v6 = vld [vmem:[%s6759_s1 + $0x70] sm:$0xf]  ;;  %v5960_v61 = vpop.f32.mrf.mxu1 }
 0x3bc   : > { %2165 = vmatpush.bf16.msrb.mxu3 %v2123_v47  ;;  %2193 = vmatpush.bf16.msra.mxu1 %v2124_v3  ;;  %v3947_v12 = vor.u32 %v4115_v23, %v3946_v6  ;;  %v7027_v23 = vld [vmem:[#allocation30_spill] sm:$0xff] }
 0x3c0   : > { %2166 = vmatpush.bf16.msrb.mxu3 %v2121_v43  ;;  %2194 = vmatpush.bf16.msra.mxu1 %v2122_v4  ;;  %v2071_v27 = vpop.permute.xlu0 %2070 }
 0x3c1   : > { %v2115_v53 = vsel %vm6872_vm7, %v2069_v54, %v2071_v27  ;;  %v2116_v25 = vsel %vm6872_vm7, %v2071_v27, %v5838_v19  ;;  %v7026_v27 = vld [vmem:[#allocation44_spill] sm:$0xff] }
 0x3c2   : > { %v2075_v30 = vpop.permute.xlu1 %2074 }
 0x3c3   : > { %v2117_v24 = vsel %vm6872_vm7, %v2075_v30, %v2077_v14 }
 0x3c4   : > { %2167 = vmatpush.bf16.msrb.mxu3 %v2119_v36  ;;  %2195 = vmatpush.bf16.msra.mxu1 %v2120_v22  ;;  %v7023_v36 = vld [vmem:[#allocation29_spill] sm:$0xff]  ;;  %v7024_v22 = vld [vmem:[#allocation22_spill] sm:$0xff] }
 0x3c5   : > { %v2336_v54 = vsel %vm1031_vm9, %v7024_v22, %v4817_v57  ;;  %v7043_v22 = vld [vmem:[#allocation24_spill] sm:$0xff] }
 0x3c8   : > { %2168 = vmatpush.bf16.msrb.mxu3 %v2117_v24  ;;  %2196 = vmatpush.bf16.msra.mxu1 %v2118_v13  ;;  %v1756_v47 = vpop.f32.mrf.mxu3 }
 0x3ca   : > { %v2109_v2 = vpop.permute.xlu1 %2108 }
 0x3cb   : > { %v2133_v44 = vsel %vm6872_vm7, %v2107_v41, %v2109_v2  ;;  %v2134_v52 = vsel %vm6872_vm7, %v2109_v2, %v5838_v19  ;;  %v7031_v2 = vld [vmem:[#allocation35_spill] sm:$0xff] }
 0x3cc   : > { %2169 = vmatpush.bf16.msrb.mxu3 %v2115_v53  ;;  %2197 = vmatpush.bf16.msra.mxu1 %v2116_v25  ;;  %v7028_v53 = vld [vmem:[#allocation28_spill] sm:$0xff]  ;;  %v7029_v25 = vld [vmem:[#allocation51_spill] sm:$0xff] }
 0x3cd   : > { %2182 = vmatpush.bf16.msra.mxu2 %v2133_v44  ;;  %2210 = vmatpush.bf16.msrb.mxu0 %v2134_v52  ;;  %v7032_v44 = vld [vmem:[#allocation34_spill] sm:$0xff] }
 0x3ce   : > { %v2334_v52 = vsel %vm1031_vm9, %v7032_v44, %v4817_v57 }
 0x3cf   : > { %2170 = vmatmul.bf16.vlgmr.msrb.gmra.mxu3 %v3947_v12  ;;  %2198 = vmatmul.bf16.vlgmr.msra.gmra.mxu1 %v3947_v12  ;;  %v1742_v14 = vpop.f32.mrf.mxu2  ;;  %v7030_v12 = vld [vmem:[#allocation47_spill] sm:$0xff] }
 0x3d0   : > { %2278 = vmatpush.bf16.msra.mxu3 %v5251_v20  ;;  %2306 = vmatpush.bf16.msrb.mxu1 %v2244_v34  ;;  %v2243_v20 = vsel %vm1191_vm5, %v5309_v59, %v4797_v45  ;;  %v2241_v59 = vsel %vm1191_vm5, %v5148_v46, %v4797_v45  ;;  %v1757_v3 = vadd.f32 %v1756_v47, %v1742_v14  ;;  %v6010_v6 = vpop.f32.mrf.mxu3  ;;  %v7036_v14 = vld [vmem:[#allocation37_spill] sm:$0xff] }
 0x3d1   : > { %2211 = vmatpush.bf16.msrb.mxu0 %v2132_v42  ;;  %v2338_v46 = vsel %vm1031_vm9, %v4971_v35, %v4817_v57  ;;  %v4116_v35 = vld [vmem:[%s6759_s1 + $0x84] sm:$0xf]  ;;  %v2237_v34 = vsel %vm1191_vm5, %v7029_v25, %v4797_v45  ;;  %v2333_v47 = vsel %vm1031_vm9, %v7036_v14, %v4817_v57  ;;  %v7054_v14 = vld [vmem:[#allocation31_spill] sm:$0xff] }
 0x3d2   : > { %v2103_v9 = vpop.permute.xlu1 %2102  ;;  %v1789_v41 = vadd.f32 %v1757_v3, %v5897_v29 }
 0x3d3   : > { %v2131_v43 = vsel %vm6872_vm7, %v2103_v9, %v2105_v40  ;;  %v7033_v40 = vld [vmem:[#allocation42_spill] sm:$0xff] }
 0x3d4   : > { %2279 = vmatpush.bf16.msra.mxu3 %v5316_v5  ;;  %2307 = vmatpush.bf16.msrb.mxu1 %v2243_v20  ;;  %v2242_v5 = vsel %vm1191_vm5, %v5211_v33, %v4797_v45  ;;  %v2240_v33 = vsel %vm1191_vm5, %v5169_v62, %v4797_v45  ;;  %v2239_v62 = vsel %vm1191_vm5, %v4815_v56, %v4797_v45  ;;  %v1784_v29 = vpop.f32.mrf.mxu1  ;;  %v7025_v56 = vld [vmem:[#allocation46_spill] sm:$0xff] }
 0x3d5   : > { %2287 = vmatpush.bf16.msra.mxu0 %v2241_v59  ;;  %2183 = vmatpush.bf16.msra.mxu2 %v2131_v43  ;;  %v2238_v13 = vsel %vm1191_vm5, %v7025_v56, %v4797_v45  ;;  %v2236_v58 = vsel %vm1191_vm5, %v7033_v40, %v4797_v45  ;;  %v3958_v43 = vld [vmem:[%s6759_s1 + $0x80] sm:$0xf]  ;;  %v7044_v56 = vld [vmem:[#allocation40_spill] sm:$0xff] }
 0x3d6   : > { %3953 = vmatmul.msk.bf16.vlgmr.msrb.gmra.mxu0 %vm6870_vm15, %v3951_v21 }
 0x3d7   : > { %v6003_v30 = vpop.f32.mrf.mxu2 }
 0x3d8   : > { %2280 = vmatpush.bf16.msra.mxu3 %v5328_v18  ;;  %2308 = vmatpush.bf16.msrb.mxu1 %v2242_v5  ;;  %v3960_v18 = vld [vmem:[%s6759_s1 + $0x88] sm:$0xf0]  ;;  %v7037_v5 = vld [vmem:[#allocation62_spill] sm:$0xff] }
 0x3d9   : > { %2259 = vmatpush.bf16.msrb.mxu2 %v5236_v32  ;;  %2288 = vmatpush.bf16.msra.mxu0 %v2240_v33  ;;  %v1770_v32 = vpop.f32.mrf.mxu0  ;;  %v2235_v9 = vsel %vm1191_vm5, %v7037_v5, %v4797_v45  ;;  %v4117_v33 = vld [vmem:[%s6759_s1 + $0x84] sm:$0xf0] }
 0x3da   : > { %3952 = vmatmul.msk.bf16.vlgmr.msra.gmra.mxu2 %vm6870_vm15, %v3951_v21  ;;  %v1785_v4 = vadd.f32 %v1784_v29, %v1770_v32  ;;  %v7035_v21 = vld [vmem:[#allocation38_spill] sm:$0xff]  ;;  %v7041_v29 = vld [vmem:[#allocation67_spill] sm:$0xff] }
 0x3dc   : > { %2356 = vmatpush.bf16.msrb.mxu3 %v4975_v60  ;;  %2384 = vmatpush.bf16.msra.mxu1 %v2338_v46  ;;  %v2337_v60 = vsel %vm1031_vm9, %v5053_v1, %v4817_v57  ;;  %v3963_v1 = vor.u32 %v4116_v35, %v3960_v18  ;;  %v1790_v24 = vadd.f32 %v1785_v4, %v5916_v37  ;;  %v7038_v46 = vld [vmem:[#allocation54_spill] sm:$0xff]  ;;  %v7039_v18 = vld [vmem:[#allocation39_spill] sm:$0xff] }
 0x3dd   : > { %2289 = vmatpush.bf16.msra.mxu0 %v2239_v62  ;;  %v2335_v37 = vsel %vm1031_vm9, %v7028_v53, %v4817_v57  ;;  %v7040_v62 = vld [vmem:[#allocation32_spill] sm:$0xff]  ;;  %v3959_v4 = vor.u32 %v4117_v33, %v3958_v43  ;;  %v7047_v53 = vld [vmem:[#allocation50_spill] sm:$0xff] }
 0x3de   : > { %v2332_v32 = vsel %vm1031_vm9, %v7040_v62, %v4817_v57  ;;  %v4118_v33 = vld [vmem:[%s6759_s1 + $0x94] sm:$0xf] }
 0x3df   : > { %3964 = vmatmul.msk.bf16.vlgmr.msra.gmra.mxu3 %vm6870_vm15, %v3963_v1  ;;  %3965 = vmatmul.msk.bf16.vlgmr.msrb.gmra.mxu1 %vm6870_vm15, %v3963_v1  ;;  %v3970_v1 = vld [vmem:[%s6759_s1 + $0x90] sm:$0xf] }
 0x3e0   : > { %2357 = vmatpush.bf16.msrb.mxu3 %v5059_v50  ;;  %2385 = vmatpush.bf16.msra.mxu1 %v2337_v60  ;;  %v7022_v50 = vld [vmem:[#allocation43_spill] sm:$0xff]  ;;  %v6046_v60 = vpop.f32.mrf.mxu1 }
 0x3e1   : > { %2260 = vmatpush.bf16.msrb.mxu2 %v7022_v50  ;;  %2290 = vmatpush.bf16.msra.mxu0 %v2238_v13  ;;  %v1853_v20 = vpop.f32.mrf.mxu2  ;;  %v6034_v59 = vpop.f32.mrf.mxu0  ;;  %v2234_v50 = vsel %vm1191_vm5, %v7041_v29, %v4797_v45  ;;  %v7045_v45 = vld [vmem:[#allocation23_spill] sm:$0xff]  ;;  %v2513_v29 = vld [vmem:[%s6760_s2] sm:$0xff] }
 0x3e2   : > { %v2331_v13 = vsel %vm1031_vm9, %v7045_v45, %v4817_v57  ;;  %2517 = vperm.xlu0 %4167, %v2513_v29   ;;  %v7064_v45 = vld [vmem:[#allocation49_spill] sm:$0xff] }
 0x3e4   : > { %2358 = vmatpush.bf16.msrb.mxu3 %v7023_v36  ;;  %2386 = vmatpush.bf16.msra.mxu1 %v2336_v54  ;;  %v7042_v36 = vld [vmem:[#allocation63_spill] sm:$0xff]  ;;  %v2341_v54 = vsel %vm1031_vm9, %v7043_v22, %v4817_v57 }
 0x3e5   : > { %2261 = vmatpush.bf16.msrb.mxu2 %v7026_v27  ;;  %2291 = vmatpush.bf16.msra.mxu0 %v2237_v34  ;;  %v7048_v34 = vld [vmem:[#allocation59_spill] sm:$0xff] }
 0x3e8   : > { %2359 = vmatpush.bf16.msrb.mxu3 %v7027_v23  ;;  %2387 = vmatpush.bf16.msra.mxu1 %v2335_v37  ;;  %v1839_v42 = vpop.f32.mrf.mxu3  ;;  %v7046_v23 = vld [vmem:[#allocation19_spill] sm:$0xff] }
 0x3e9   : > { %2262 = vmatpush.bf16.msrb.mxu2 %v7030_v12  ;;  %2292 = vmatpush.bf16.msra.mxu0 %v2236_v58  ;;  %v1854_v3 = vadd.f32 %v1853_v20, %v1839_v42  ;;  %v2438_v37 = vsel %vm6870_vm15, %v7047_v53, %v7046_v23  ;;  %v1881_v25 = vpop.f32.mrf.mxu0  ;;  %v7049_v12 = vld [vmem:[#allocation25_spill] sm:$0xff]  ;;  %v7051_v58 = vld [vmem:[#allocation26_spill] sm:$0xff]  ;;  %v7052_v20 = vld [vmem:[#allocation60_spill] sm:$0xff] }
 0x3ea   : > { %v7053_v42 = vld [vmem:[#allocation58_spill] sm:$0xff]  ;;  %v7066_v53 = vld [vmem:[#allocation45_spill] sm:$0xff] }
 0x3eb   : > { %v6048_v35 = vadd.f32 %v1854_v3, %v1789_v41  ;;  %v4119_v41 = vld [vmem:[%s6759_s1 + $0x94] sm:$0xf0]  ;;  %v7055_v3 = vld [vmem:[#allocation36_spill] sm:$0xff] }
 0x3ec   : > { %2360 = vmatpush.bf16.msrb.mxu3 %v7031_v2  ;;  %2388 = vmatpush.bf16.msra.mxu1 %v2334_v52  ;;  %v3971_v27 = vor.u32 %v4119_v41, %v3970_v1  ;;  %v2340_v2 = vsel %vm1031_vm9, %v7049_v12, %v4817_v57  ;;  %v7050_v52 = vld [vmem:[#allocation68_spill] sm:$0xff]  ;;  %v2435_v5 = vsel %vm6870_vm15, %v7055_v3, %v7046_v23  ;;  %v4120_v1 = vld [vmem:[%s6759_s1 + $0xa4] sm:$0xf]  ;;  %v3984_v41 = vld [vmem:[%s6759_s1 + $0xa8] sm:$0xf0] }
 0x3ed   : > { %2263 = vmatpush.bf16.msrb.mxu2 %v7034_v10  ;;  %2293 = vmatpush.bf16.msra.mxu0 %v2235_v9  ;;  %v7056_v9 = vld [vmem:[#allocation27_spill] sm:$0xff]  ;;  %v7073_v3 = vld [vmem:[#allocation70_spill] sm:$0xff] }
 0x3f0   : > { %2361 = vmatpush.bf16.msrb.mxu3 %v7035_v21  ;;  %2389 = vmatpush.bf16.msra.mxu1 %v2333_v47  ;;  %v2437_v21 = vsel %vm6870_vm15, %v7053_v42, %v7046_v23  ;;  %v2339_v47 = vsel %vm1031_vm9, %v7054_v14, %v4817_v57  ;;  %v3972_v57 = vld [vmem:[%s6759_s1 + $0x98] sm:$0xf0]  ;;  %v7071_v42 = vld [vmem:[#allocation66_spill] sm:$0xff]  ;;  %vm7081_vm9 = vmpackc.low %vm4387_vm1, %vm4382_vm0 }
 0x3f1   : > { %2264 = vmatpush.bf16.msrb.mxu2 %v7038_v46  ;;  %2294 = vmatpush.bf16.msra.mxu0 %v2234_v50  ;;  %v7058_v46 = vld [vmem:[#allocation61_spill] sm:$0xff]  ;;  %v7061_v50 = vld [vmem:[#allocation48_spill] sm:$0xff] }
 0x3f2   : > { %v2436_v43 = vsel %vm6870_vm15, %v7058_v46, %v7046_v23  ;;  %v6153_v46 = vpop.f32.mrf.mxu2 }
 0x3f4   : > { %2362 = vmatpush.bf16.msrb.mxu3 %v7039_v18  ;;  %2390 = vmatpush.bf16.msra.mxu1 %v2332_v32  ;;  %v1867_v44 = vpop.f32.mrf.mxu1  ;;  %v7059_v18 = vld [vmem:[#allocation41_spill] sm:$0xff] }
 0x3f5   : > { %2265 = vmatpush.bf16.msrb.mxu2 %v7042_v36  ;;  %2403 = vmatpush.bf16.msrb.mxu0 %v2341_v54  ;;  %v1882_v40 = vadd.f32 %v1881_v25, %v1867_v44  ;;  %v2434_v62 = vsel %vm6870_vm15, %v7059_v18, %v7046_v23  ;;  %v7060_v32 = vld [vmem:[#allocation33_spill] sm:$0xff]  ;;  %v7067_v25 = vld [vmem:[#allocation56_spill] sm:$0xff] }
 0x3f6   : > { %2295 = vmatmul.bf16.vlgmr.msra.gmra.mxu0 %v3959_v4  ;;  %v7062_v36 = vld [vmem:[#allocation21_spill] sm:$0xff] }
 0x3f7   : > { %v1887_v10 = vadd.f32 %v1882_v40, %v1790_v24  ;;  %v7057_v24 = vld [vmem:[#allocation64_spill] sm:$0xff]  ;;  %v2433_v22 = vsel %vm6870_vm15, %v7062_v36, %v7046_v23  ;;  %v7063_v54 = vld [vmem:[#allocation53_spill] sm:$0xff]  ;;  %v2514_v40 = vld [vmem:[%s6760_s2 + $0x8] sm:$0xff] }
 0x3f8   : > { %2363 = vmatpush.bf16.msrb.mxu3 %v7044_v56  ;;  %2391 = vmatpush.bf16.msra.mxu1 %v2331_v13  ;;  %v3987_v56 = vor.u32 %v4120_v1, %v3984_v41  ;;  %v2432_v13 = vsel %vm6870_vm15, %v7064_v45, %v7046_v23  ;;  %v7070_v44 = vld [vmem:[#allocation69_spill] sm:$0xff] }
 0x3f9   : > { %2266 = vmatpush.bf16.msrb.mxu2 %v7050_v52  ;;  %2404 = vmatpush.bf16.msrb.mxu0 %v2340_v2  ;;  %v7069_v2 = vld [vmem:[#allocation57_spill] sm:$0xff]  ;;  %v2429_v52 = vsel %vm6870_vm15, %v7070_v44, %v7046_v23 }
 0x3fa   : > { %2522 = vperm.xlu1 %4168, %v2514_v40  }
 0x3fb   : > { %2392 = vmatmul.bf16.vlgmr.msra.gmra.mxu1 %v3971_v27  ;;  %2364 = vmatmul.bf16.vlgmr.msrb.gmra.mxu3 %v3971_v27  ;;  %v7065_v27 = vld [vmem:[#allocation55_spill] sm:$0xff] }
 0x3fc   : > { %2472 = vmatpush.bf16.msra.mxu3 %v7048_v34  ;;  %2500 = vmatpush.bf16.msrb.mxu1 %v2438_v37  ;;  %v2431_v37 = vsel %vm6870_vm15, %v7066_v53, %v7046_v23  ;;  %v7068_v34 = vld [vmem:[#allocation65_spill] sm:$0xff] }
 0x3fd   : > { %2375 = vmatpush.bf16.msra.mxu2 %v7051_v58  ;;  %2405 = vmatpush.bf16.msrb.mxu0 %v2339_v47  ;;  %v2430_v12 = vsel %vm6870_vm15, %v7068_v34, %v7046_v23  ;;  %v3982_v58 = vld [vmem:[%s6759_s1 + $0xa0] sm:$0xf] }
 0x3fe   : > { %2267 = vmatmul.bf16.vlgmr.msrb.gmra.mxu2 %v3959_v4  ;;  %v3975_v4 = vor.u32 %v4118_v33, %v3972_v57 }
 0x400   : > { %2473 = vmatpush.bf16.msra.mxu3 %v7052_v20  ;;  %2501 = vmatpush.bf16.msrb.mxu1 %v2437_v21  ;;  %v4121_v20 = vld [vmem:[%s6759_s1 + $0xa4] sm:$0xf0] }
 0x401   : > { %2376 = vmatpush.bf16.msra.mxu2 %v7056_v9  ;;  %2481 = vmatpush.bf16.msra.mxu0 %v2435_v5  ;;  %v7072_v21 = vld [vmem:[#allocation71_spill] sm:$0xff]  ;;  %v3983_v47 = vor.u32 %v4121_v20, %v3982_v58  ;;  %v7074_v5 = vld [vmem:[#allocation72_spill] sm:$0xff]  ;;  %v1883_v9 = vpop.f32.mrf.mxu0  ;;  %v1134_v20 = vadd.f32 %v5834_v7, %v5853_v0  ;;  %v1427_v7 = vadd.f32 %v5868_v17, %v5875_v38 }
 0x402   : > { %v2428_v14 = vsel %vm6870_vm15, %v7072_v21, %v7046_v23  ;;  %v1759_v38 = vadd.f32 %v6010_v6, %v6003_v30 }
 0x404   : > { %2474 = vmatpush.bf16.msra.mxu3 %v7057_v24  ;;  %2502 = vmatpush.bf16.msrb.mxu1 %v2436_v43  ;;  %v1869_v24 = vpop.f32.mrf.mxu1  ;;  %v6155_v43 = vpop.f32.mrf.mxu3 }
 0x405   : > { %2377 = vmatpush.bf16.msra.mxu2 %v7060_v32  ;;  %2482 = vmatpush.bf16.msra.mxu0 %v2434_v62 }
 0x406   : > { %3977 = vmatmul.msk.bf16.vlgmr.msrb.gmra.mxu0 %vm6870_vm15, %v3975_v4 }
 0x409   : > { %2453 = vmatpush.bf16.msrb.mxu2 %v7061_v50  ;;  %2483 = vmatpush.bf16.msra.mxu0 %v2433_v22 }
 0x40b   : > { %3989 = vmatmul.msk.bf16.vlgmr.msrb.gmra.mxu1 %vm6870_vm15, %v3987_v56  ;;  %3988 = vmatmul.msk.bf16.vlgmr.msra.gmra.mxu3 %vm6870_vm15, %v3987_v56 }
 0x40c   : > { %v2033_v33 = vpop.f32.mrf.mxu0 }
 0x40d   : > { %2454 = vmatpush.bf16.msrb.mxu2 %v7063_v54  ;;  %2484 = vmatpush.bf16.msra.mxu0 %v2432_v13 }
 0x40e   : > { %3976 = vmatmul.msk.bf16.vlgmr.msra.gmra.mxu2 %vm6870_vm15, %v3975_v4 }
 0x411   : > { %2455 = vmatpush.bf16.msrb.mxu2 %v7065_v27  ;;  %2485 = vmatpush.bf16.msra.mxu0 %v2431_v37 }
 0x414   : > { %v2035_v1 = vpop.f32.mrf.mxu0 }
 0x415   : > { %2456 = vmatpush.bf16.msrb.mxu2 %v7067_v25  ;;  %2486 = vmatpush.bf16.msra.mxu0 %v2430_v12 }
 0x419   : > { %2457 = vmatpush.bf16.msrb.mxu2 %v7069_v2  ;;  %2487 = vmatpush.bf16.msra.mxu0 %v2429_v52 }
 0x41d   : > { %2458 = vmatpush.bf16.msrb.mxu2 %v7071_v42  ;;  %2488 = vmatpush.bf16.msra.mxu0 %v2428_v14  ;;  %v1106_v42 = vadd.f32 %v5823_v31, %v5843_v51  ;;  %v1279_v14 = vadd.f32 %v5873_v55, %v1134_v20  ;;  %v1621_v31 = vadd.f32 %v5962_v48, %v5960_v61 }
 0x41e   : > { %v1884_v61 = vadd.f32 %v1883_v9, %v1869_v24 }
 0x420   : > { %2489 = vmatmul.bf16.vlgmr.msra.gmra.mxu0 %v3983_v47 }
 0x421   : > { %2459 = vmatpush.bf16.msrb.mxu2 %v7073_v3 }
 0x425   : > { %2460 = vmatpush.bf16.msrb.mxu2 %v7074_v5 }
 0x428   : > { %2461 = vmatmul.bf16.vlgmr.msrb.gmra.mxu2 %v3983_v47  ;;  %v1251_v47 = vadd.f32 %v5845_v11, %v1106_v42  ;;  %v1593_v11 = vadd.f32 %v5932_v63, %v5930_v26  ;;  %v1856_v26 = vadd.f32 %v6153_v46, %v6155_v43 }
 0x42a   : > { %v2005_v32 = vpop.f32.mrf.mxu2 }
 0x42c   : > { %v2047_v57 = vpop.f32.mrf.mxu1 }
 0x42d   : > { %v2048_v18 = vadd.f32 %v2047_v57, %v2033_v33  ;;  %v1293_v33 = vadd.f32 %v5866_v8, %v1279_v14  ;;  %v1455_v57 = vadd.f32 %v5886_v16, %v5884_v49  ;;  %v1787_v49 = vadd.f32 %v6046_v60, %v6034_v59 }
 0x42f   : > { %v2053_v62 = vadd.f32 %v2048_v18, %v1887_v10  ;;  %v1460_v0 = vadd.f32 %v1455_v57, %v1293_v33 }
 0x432   : > { %v2019_v23 = vpop.f32.mrf.mxu3  ;;  %v2007_v22 = vpop.f32.mrf.mxu2 }
 0x433   : > { %v2020_v29 = vadd.f32 %v2019_v23, %v2005_v32  ;;  %v1265_v32 = vadd.f32 %v5855_v15, %v1251_v47 }
 0x434   : > { %v2049_v4 = vpop.f32.mrf.mxu1 }
 0x435   : > { %v2052_v50 = vadd.f32 %v2020_v29, %v6048_v35  ;;  %v1459_v55 = vadd.f32 %v1427_v7, %v1265_v32  ;;  %v1626_v29 = vadd.f32 %v1621_v31, %v1460_v0  ;;  %v2050_v63 = vadd.f32 %v2049_v4, %v2035_v1 }
 0x437   : > { %v1625_v17 = vadd.f32 %v1593_v11, %v1459_v55  ;;  %v1792_v33 = vadd.f32 %v1787_v49, %v1626_v29 }
 0x439   : > { %v1791_v57 = vadd.f32 %v1759_v38, %v1625_v17 }
 0x43a   : > { %v2021_v41 = vpop.f32.mrf.mxu3 }
 0x43b   : > { %v1888_v6 = vadd.f32 %v1856_v26, %v1791_v57 }
 0x44c   : > { %v2199_v36 = vpop.f32.mrf.mxu1 }
 0x452   : > { %v2171_v56 = vpop.f32.mrf.mxu3 }
 0x453   : > { %v2213_v54 = vpop.f32.mrf.mxu0 }
 0x454   : > { %v2201_v13 = vpop.f32.mrf.mxu1  ;;  %v2214_v23 = vadd.f32 %v2213_v54, %v2199_v36  ;;  %v2518_v46 = vpop.permute.xlu0 %2517 }
 0x456   : > { %v2219_v48 = vadd.f32 %v2214_v23, %v2053_v62 }
 0x45a   : > { %v2173_v53 = vpop.f32.mrf.mxu3 }
 0x45b   : > { %v2215_v27 = vpop.f32.mrf.mxu0 }
 0x45c   : > { %v2310_v37 = vpop.f32.mrf.mxu1 }
 0x45d   : > { %v2185_v45 = vpop.f32.mrf.mxu2 }
 0x45e   : > { %v2186_v20 = vadd.f32 %v2185_v45, %v2171_v56  ;;  %v1889_v56 = vadd.f32 %v1884_v61, %v1792_v33  ;;  %v2022_v45 = vadd.f32 %v2021_v41, %v2007_v22 }
 0x460   : > { %v2218_v36 = vadd.f32 %v2186_v20, %v2052_v50  ;;  %v2055_v9 = vadd.f32 %v2050_v63, %v1889_v56  ;;  %v2054_v50 = vadd.f32 %v2022_v45, %v1888_v6  ;;  %v7083_v56 = vld [vmem:[#allocation12_spill] sm:$0xff] }
 0x461   : > { %vm7084_vm6 = vnez %v7083_v56  ;;  %v7087_v6 = vld [vmem:[#allocation8_spill] sm:$0xff] }
 0x462   : > { %v2282_v10 = vpop.f32.mrf.mxu3  ;;  %vm7088_vm1 = vnez %v7087_v6 }
 0x464   : > { %v2312_v2 = vpop.f32.mrf.mxu1 }
 0x465   : > { %v2187_v25 = vpop.f32.mrf.mxu2 }
 0x466   : > { %v2188_v24 = vadd.f32 %v2187_v25, %v2173_v53 }
 0x468   : > { %v2220_v22 = vadd.f32 %v2188_v24, %v2054_v50 }
 0x46a   : > { %v2284_v52 = vpop.f32.mrf.mxu3 }
 0x46c   : > { %v2523_v29 = vpop.permute.xlu1 %2522 }
 0x473   : > { %v2296_v34 = vpop.f32.mrf.mxu0 }
 0x474   : > { %v2311_v42 = vadd.f32 %v2310_v37, %v2296_v34  ;;  %v2216_v37 = vadd.f32 %v2215_v27, %v2201_v13 }
 0x476   : > { %v2316_v54 = vadd.f32 %v2311_v42, %v2219_v48  ;;  %v2221_v4 = vadd.f32 %v2216_v37, %v2055_v9  ;;  %v7085_v37 = vld [vmem:[#allocation9_spill] sm:$0xff] }
 0x477   : > { %vm7086_vm0 = vnez %v7085_v37 }
 0x478   : > { %v2393_v40 = vpop.f32.mrf.mxu1 }
 0x47b   : > { %v2298_v44 = vpop.f32.mrf.mxu0 }
 0x47c   : > { %v2313_v62 = vadd.f32 %v2312_v2, %v2298_v44 }
 0x47e   : > { %v2365_v21 = vpop.f32.mrf.mxu3  ;;  %v2318_v13 = vadd.f32 %v2313_v62, %v2221_v4 }
 0x480   : > { %v2395_v5 = vpop.f32.mrf.mxu1 }
 0x481   : > { %v2268_v12 = vpop.f32.mrf.mxu2 }
 0x482   : > { %v2283_v14 = vadd.f32 %v2282_v10, %v2268_v12 }
 0x483   : > { %v2407_v58 = vpop.f32.mrf.mxu0 }
 0x484   : > { %v2408_v47 = vadd.f32 %v2407_v58, %v2393_v40  ;;  %v2315_v32 = vadd.f32 %v2283_v14, %v2218_v36 }
 0x486   : > { %v2367_v51 = vpop.f32.mrf.mxu3  ;;  %v2413_v30 = vadd.f32 %v2408_v47, %v2316_v54 }
 0x488   : > { %v2504_v8 = vpop.f32.mrf.mxu1 }
 0x489   : > { %v2270_v35 = vpop.f32.mrf.mxu2 }
 0x48b   : > { %v2409_v18 = vpop.f32.mrf.mxu0 }
 0x48e   : > { %v2476_v34 = vpop.f32.mrf.mxu3 }
 0x490   : > { %v2506_v58 = vpop.f32.mrf.mxu1 }
 0x491   : > { %v2379_v3 = vpop.f32.mrf.mxu2 }
 0x492   : > { %v2380_v59 = vadd.f32 %v2379_v3, %v2365_v21  ;;  %v2285_v21 = vadd.f32 %v2284_v52, %v2270_v35  ;;  %v2410_v3 = vadd.f32 %v2409_v18, %v2395_v5 }
 0x494   : > { %v2412_v12 = vadd.f32 %v2380_v59, %v2315_v32  ;;  %v2317_v53 = vadd.f32 %v2285_v21, %v2220_v22  ;;  %v2415_v25 = vadd.f32 %v2410_v3, %v2318_v13  ;;  %v7090_v21 = vld [vmem:[#allocation7_spill] sm:$0xff]  ;;  %v7092_v13 = vmov 0  }
 0x496   : > { %v2478_v44 = vpop.f32.mrf.mxu3 }
 0x499   : > { %v2381_v16 = vpop.f32.mrf.mxu2 }
 0x49a   : > { %v2382_v27 = vadd.f32 %v2381_v16, %v2367_v51 }
 0x49c   : > { %v2414_v11 = vadd.f32 %v2382_v27, %v2317_v53  ;;  %v7096_v53 = vld [vmem:[#allocation16_spill] sm:$0xff] }
 0x49d   : > { %v2490_v15 = vpop.f32.mrf.mxu0 }
 0x49e   : > { %v2505_v60 = vadd.f32 %v2504_v8, %v2490_v15 }
 0x4a0   : > { %v2510_v40 = vadd.f32 %v2505_v60, %v2413_v30 }
 0x4a2   : > { %v2526_v7 = vadd.f32 %v2518_v46, %v2510_v40 }
 0x4a5   : > { %v2492_v1 = vpop.f32.mrf.mxu0 }
 0x4a6   : > { %v2507_v0 = vadd.f32 %v2506_v58, %v2492_v1 }
 0x4a8   : > { %v2512_v23 = vadd.f32 %v2507_v0, %v2415_v25  ;;  %v7098_v25 = vld [vmem:[#allocation15_spill] sm:$0xff] }
 0x4aa   : > { %v2528_v15 = vadd.f32 %v2523_v29, %v2512_v23 }
 0x4ab   : > { %v2462_v10 = vpop.f32.mrf.mxu2 }
 0x4ac   : > { %v2477_v43 = vadd.f32 %v2476_v34, %v2462_v10 }
 0x4ae   : > { %v2509_v41 = vadd.f32 %v2477_v43, %v2412_v12  ;;  %v7089_v43 = vld [vmem:[#allocation6_spill] sm:$0xff] }
 0x4b0   : > { %v2525_v31 = vadd.f32 %v2518_v46, %v2509_v41 }
 0x4b2   : > { %v2529_v2 = vpack.c.bf16 %v2526_v7, %v2525_v31  ;;  %v7093_v7 = vld [vmem:[#allocation18_spill] sm:$0xff] }
 0x4b3   : > { %v2464_v55 = vpop.f32.mrf.mxu2 }
 0x4b4   : > { %v2479_v8 = vadd.f32 %v2478_v44, %v2464_v55  ;;  %v2533_v5 = vunpack.c.l.b16 %v2529_v2  ;;  %v2534_v18 = vunpack.c.h.b16 %v2529_v2  ;;  %v2545_v54 = vsel %vm4328_vm12, %v2529_v2, 0  ;;  %v7101_v44 = vld [vmem:[#allocation14_spill] sm:$0xff]  ;;  %v7103_v55 = vld [vmem:[#allocation13_spill] sm:$0xff] }
 0x4b5   : > { %v2561_v60 = vunpack.c.l.b16 %v2545_v54  ;;  %v2562_v30 = vunpack.c.h.b16 %v2545_v54  ;;  %vm7102_vm15 = vnez %v7101_v44  ;;  %vm7104_vm4 = vnez %v7103_v55 }
 0x4b6   : > { %v2511_v49 = vadd.f32 %v2479_v8, %v2414_v11  ;;  %vm7105_vm7 = vmpackc.low %vm7102_vm15, %vm7104_vm4 }
 0x4b8   : > { %v2527_v52 = vadd.f32 %v2523_v29, %v2511_v49 }
 0x4ba   : > { %v2530_v35 = vpack.c.bf16 %v2528_v15, %v2527_v52 }
 0x4bc   : > { %v2535_v20 = vunpack.c.l.b16 %v2530_v35  ;;  %v2536_v51 = vunpack.c.h.b16 %v2530_v35  ;;  %v2546_v36 = vsel %vm4328_vm12, %v2530_v35, 0 }
 0x4bd   : > { %v2563_v59 = vunpack.c.l.b16 %v2546_v36  ;;  %v2564_v32 = vunpack.c.h.b16 %v2546_v36 }
 0x4be   : > { %v2538_v16 = vpack.c.b16 %v2536_v51, %v2534_v18  ;;  %v2537_v42 = vpack.c.b16 %v2535_v20, %v2533_v5 }
 0x4bf   : > { %v2565_v57 = vpack.c.b16 %v2563_v59, %v2561_v60  ;;  %v2566_v24 = vpack.c.b16 %v2564_v32, %v2562_v30  ;;  %v3121_v32 = vld [vmem:[%s6762_s4 + $0x10] sm:$0xff]  ;;  %v3122_v30 = vld [vmem:[%s6762_s4 + $0x18] sm:$0xff] }
 0x4c0   : > { %v2550_v61 = vsel %vm7077_vm3, %v2538_v16, 0  ;;  %v2548_v14 = vsel %vm4479_vm8, %v2538_v16, 0  ;;  %v2549_v26 = vsel %vm7081_vm9, %v2537_v42, 0  ;;  %v2543_v45 = vsel %vm7084_vm6, %v2537_v42, 0 }
 0x4c1   : > { %2584 = vrot.lane.b32.xlu1 %v2550_v61, %s4196_s23  ;;  %2576 = vrot.lane.b32.xlu0 %v2548_v14, %s4195_s22  ;;  %v2547_v34 = vsel %vm7086_vm0, %v2537_v42, 0  ;;  %v2544_v9 = vsel %vm7088_vm1, %v2538_v16, 0  ;;  %vm7097_vm3 = vnez %v7096_v53  ;;  %vm7099_vm9 = vnez %v7098_v25 }
 0x4c2   : > { %2582 = vrot.lane.b32.xlu2 %v2549_v26, %s4196_s23  ;;  %v2541_v11 = vsel %vm7105_vm7, %v2537_v42, 0  ;;  %s332_s23 = scalar_lea.vmem %s6767_s9, %s4099_s13 }
 0x4c9   : > { %2567 = vrot.lane.b32.xlu1 %v2565_v57, %s4193_s21  ;;  %2553 = vrot.lane.b32.xlu0 %v2543_v45, %s4191_s19 }
 0x4ca   : > { %2574 = vrot.lane.b32.xlu2 %v2547_v34, %s4195_s22 }
 0x4d1   : > { %2555 = vrot.lane.b32.xlu1 %v2544_v9, %s4191_s19 }
 0x4d2   : > { %2569 = vrot.lane.b32.xlu2 %v2566_v24, %s4193_s21 }
 0x51c   : > { %v2583_v62 = vpop.permute.xlu2 %2582 }
 0x51d   : > { %2614 = vrot.lane.b32.xlu2 %v2583_v62, %s4187_s11 }
 0x524   : > { %v2575_v10 = vpop.permute.xlu2 %2574 }
 0x525   : > { %2608 = vrot.lane.b32.xlu2 %v2575_v10, %s4187_s11 }
 0x52c   : > { %v2570_v12 = vpop.permute.xlu2 %2569 }
 0x52d   : > { %2606 = vrot.lane.b32.xlu1 %v2570_v12, %s4187_s11 }
 0x533   : > { %v2585_v40 = vpop.permute.xlu1 %2584  ;;  %v2577_v4 = vpop.permute.xlu0 %2576 }
 0x534   : > { %v2586_v46 = vsel %vm437_vm10, %v2583_v62, %v2585_v40  ;;  %v2587_v50 = vsel %vm437_vm10, %v2585_v40, %v7089_v43  ;;  %v2578_v58 = vsel %vm475_vm13, %v2575_v10, %v2577_v4  ;;  %v2579_v3 = vsel %vm475_vm13, %v2577_v4, %v7090_v21  ;;  %v3120_v62 = vld [vmem:[%s6762_s4 + $0x8] sm:$0xff] }
 0x535   : > { %2618 = vrot.lane.b32.xlu1 %v2587_v50, %s4187_s11  ;;  %2616 = vrot.lane.b32.xlu0 %v2586_v46, %s4187_s11  ;;  %vm7094_vm10 = vcmask 1039360  }
 0x536   : > { %vm7095_vm13 = vmmov %vm7094_vm10 }
 0x53b   : > { %v2568_v1 = vpop.permute.xlu1 %2567  ;;  %v2554_v27 = vpop.permute.xlu0 %2553 }
 0x53c   : > { %2602 = vrot.lane.b32.xlu2 %v2568_v1, %s4187_s11  ;;  %v2571_v22 = vsel %vm7091_vm11, %v2568_v1, %v2570_v12  ;;  %v2557_v0 = vsel %vm7094_vm10, %v7093_v7, %v2554_v27  ;;  %vm7100_vm11 = vmpackc.low %vm7097_vm3, %vm7099_vm9  ;;  %vm7106_vm10 = vcmask 15360  }
 0x53d   : > { %2612 = vrot.lane.b32.xlu1 %v2579_v3, %s4187_s11  ;;  %2610 = vrot.lane.b32.xlu0 %v2578_v58, %s4187_s11  ;;  %v2542_v2 = vsel %vm7100_vm11, %v2538_v16, 0  ;;  %vm7107_vm15 = vmmov %vm7106_vm10 }
 0x53e   : > { %vm7108_vm4 = vmmov %vm7106_vm10 }
 0x53f   : > { %vm7109_vm7 = vmmov %vm7108_vm4 }
 0x540   : > { %vm7111_vm3 = vmmov %vm7108_vm4 }
 0x541   : > { %vm7112_vm9 = vmmov %vm7111_vm3 }
 0x542   : > { %vm7113_vm11 = vmmov %vm7111_vm3 }
 0x543   : > { %v2556_v41 = vpop.permute.xlu1 %2555 }
 0x544   : > { %2590 = vrot.lane.b32.xlu2 %v7092_v13, %s4187_s11  ;;  %v2558_v31 = vsel %vm7095_vm13, %v2554_v27, %v2556_v41  ;;  %vm7110_vm13 = vmmov %vm7108_vm4 }
 0x545   : > { %2600 = vrot.lane.b32.xlu1 %v2556_v41, %s4187_s11  ;;  %2604 = vrot.lane.b32.xlu0 %v2571_v22, %s4187_s11 }
 0x54c   : > { %2596 = vrot.lane.b32.xlu2 %v2557_v0, %s4187_s11 }
 0x54d   : > { %2594 = vrot.lane.b32.xlu1 %v2542_v2, %s4187_s11  ;;  %2598 = vrot.lane.b32.xlu0 %v2558_v31, %s4187_s11  ;;  %v4124_v2 = vld [vmem:[%s6761_s3 + $0x10] sm:$0xff] }
 0x555   : > { %2592 = vrot.lane.b32.xlu0 %v2541_v11, %s4187_s11 }
 0x577   : > { %v2615_v49 = vpop.permute.xlu2 %2614 }
 0x57f   : > { %v2609_v35 = vpop.permute.xlu2 %2608 }
 0x596   : > { %v2603_v18 = vpop.permute.xlu2 %2602 }
 0x59e   : > { %v2591_v16 = vpop.permute.xlu2 %2590 }
 0x59f   : > { %v2607_v23 = vpop.permute.xlu1 %2606 }
 0x5a6   : > { %v2597_v60 = vpop.permute.xlu2 %2596 }
 0x5a7   : > { %v2617_v8 = vpop.permute.xlu0 %2616  ;;  %v2619_v29 = vpop.permute.xlu1 %2618 }
 0x5a8   : > { %v6259_v14 = vsel %vm7108_vm4, %v2617_v8, %v2619_v29  ;;  %v6271_v33 = vsel %vm7110_vm13, %v2615_v49, %v2617_v8  ;;  %vm7117_vm4 = vcmask 785408   ;;  %vm7119_vm13 = vcmask 916480  }
 0x5af   : > { %v2611_v15 = vpop.permute.xlu0 %2610  ;;  %v2613_v52 = vpop.permute.xlu1 %2612 }
 0x5b0   : > { %v6262_v47 = vsel %vm7109_vm7, %v2609_v35, %v2611_v15  ;;  %v6286_v54 = vsel %vm7113_vm11, %v2611_v15, %v2613_v52  ;;  %vm7118_vm7 = vmmov %vm7117_vm4 }
 0x5b1   : > { %vm7123_vm11 = vmmov %vm7117_vm4 }
 0x5b7   : > { %v2605_v5 = vpop.permute.xlu0 %2604  ;;  %v2601_v20 = vpop.permute.xlu1 %2600 }
 0x5b8   : > { %v6274_v26 = vsel %vm7111_vm3, %v2603_v18, %v2605_v5  ;;  %v6277_v36 = vsel %vm7112_vm9, %v2605_v5, %v2607_v23  ;;  %v7116_v23 = vld [vmem:[#allocation20_spill] sm:$0xff]  ;;  %vm7122_vm9 = vmmov %vm7117_vm4 }
 0x5bf   : > { %v2599_v51 = vpop.permute.xlu0 %2598  ;;  %v2595_v17 = vpop.permute.xlu1 %2594 }
 0x5c7   : > { %v2593_v38 = vpop.permute.xlu0 %2592 }
 0x5c8   : > { %v6247_v61 = vsel %vm7106_vm10, %v2591_v16, %v2593_v38  ;;  %v6250_v42 = vsel %vm7107_vm15, %v2593_v38, %v2595_v17  ;;  %vm7114_vm10 = vmmov %vm7111_vm3 }
 0x5c9   : > { %2746 = vrot.lane.b32.xlu0 %v6250_v42, %s4205_s16  ;;  %2651 = vrot.lane.b32.xlu2 %v6250_v42, %s4207_s25  ;;  %v6289_v59 = vsel %vm7114_vm10, %v2599_v51, %v2601_v20  ;;  %vm7115_vm15 = vmmov %vm7111_vm3 }
 0x5ca   : > { %2649 = vrot.lane.b32.xlu1 %v6247_v61, %s4207_s25  ;;  %v6298_v57 = vsel %vm7115_vm15, %v2597_v60, %v2599_v51  ;;  %v4125_v51 = vld [vmem:[%s6761_s3 + $0x18] sm:$0xff]  ;;  %vm7121_vm3 = vmmov %vm7119_vm13 }
 0x5cb   : > { %vm7124_vm10 = vmmov %vm7121_vm3 }
 0x5cc   : > { %vm7125_vm15 = vmmov %vm7117_vm4 }
 0x5d1   : > { %2667 = vrot.lane.b32.xlu0 %v6259_v14, %s4207_s25  ;;  %2744 = vrot.lane.b32.xlu2 %v6247_v61, %s4205_s16 }
 0x5d2   : > { %2661 = vrot.lane.b32.xlu1 %v6262_v47, %s4207_s25 }
 0x5d9   : > { %2657 = vrot.lane.b32.xlu0 %v6274_v26, %s4207_s25  ;;  %2665 = vrot.lane.b32.xlu2 %v6271_v33, %s4207_s25 }
 0x5da   : > { %2659 = vrot.lane.b32.xlu1 %v6277_v36, %s4207_s25 }
 0x5e1   : > { %2655 = vrot.lane.b32.xlu0 %v6289_v59, %s4207_s25  ;;  %2663 = vrot.lane.b32.xlu2 %v6286_v54, %s4207_s25 }
 0x5e2   : > { %2762 = vrot.lane.b32.xlu1 %v6259_v14, %s4205_s16 }
 0x5e9   : > { %2760 = vrot.lane.b32.xlu0 %v6271_v33, %s4205_s16  ;;  %2653 = vrot.lane.b32.xlu2 %v6298_v57, %s4207_s25 }
 0x5ea   : > { %2752 = vrot.lane.b32.xlu1 %v6274_v26, %s4205_s16 }
 0x5f1   : > { %2758 = vrot.lane.b32.xlu0 %v6286_v54, %s4205_s16  ;;  %3027 = vrot.lane.b32.xlu2 %v6247_v61, %s4209_s17 }
 0x5f2   : > { %2750 = vrot.lane.b32.xlu1 %v6289_v59, %s4205_s16 }
 0x5f9   : > { %2748 = vrot.lane.b32.xlu0 %v6298_v57, %s4205_s16  ;;  %2756 = vrot.lane.b32.xlu2 %v6262_v47, %s4205_s16 }
 0x5fa   : > { %3043 = vrot.lane.b32.xlu1 %v6271_v33, %s4209_s17 }
 0x601   : > { %2936 = vrot.lane.b32.xlu0 %v6271_v33, %s4208_s15  ;;  %2754 = vrot.lane.b32.xlu2 %v6277_v36, %s4205_s16 }
 0x602   : > { %2938 = vrot.lane.b32.xlu1 %v6259_v14, %s4208_s15 }
 0x609   : > { %3041 = vrot.lane.b32.xlu0 %v6286_v54, %s4209_s17  ;;  %3045 = vrot.lane.b32.xlu2 %v6259_v14, %s4209_s17 }
 0x60a   : > { %2932 = vrot.lane.b32.xlu1 %v6262_v47, %s4208_s15 }
 0x611   : > { %3035 = vrot.lane.b32.xlu0 %v6274_v26, %s4209_s17  ;;  %3039 = vrot.lane.b32.xlu2 %v6262_v47, %s4209_s17 }
 0x612   : > { %3037 = vrot.lane.b32.xlu1 %v6277_v36, %s4209_s17 }
 0x619   : > { %2930 = vrot.lane.b32.xlu0 %v6277_v36, %s4208_s15  ;;  %2934 = vrot.lane.b32.xlu2 %v6286_v54, %s4208_s15 }
 0x61a   : > { %3031 = vrot.lane.b32.xlu1 %v6298_v57, %s4209_s17 }
 0x621   : > { %2924 = vrot.lane.b32.xlu0 %v6298_v57, %s4208_s15  ;;  %2928 = vrot.lane.b32.xlu2 %v6274_v26, %s4208_s15 }
 0x622   : > { %2926 = vrot.lane.b32.xlu1 %v6289_v59, %s4208_s15 }
 0x623   : > { %v2652_v45 = vpop.permute.xlu2 %2651 }
 0x629   : > { %3029 = vrot.lane.b32.xlu0 %v6250_v42, %s4209_s17  ;;  %3033 = vrot.lane.b32.xlu2 %v6289_v59, %s4209_s17 }
 0x62a   : > { %2920 = vrot.lane.b32.xlu1 %v6247_v61, %s4208_s15 }
 0x62b   : > { %v6354_v34 = vpop.permute.xlu2 %2744 }
 0x631   : > { %3135 = vperm.xlu0 %4167, %v3121_v32   ;;  %2922 = vrot.lane.b32.xlu2 %v6250_v42, %s4208_s15 }
 0x632   : > { %3140 = vperm.xlu1 %4168, %v3122_v30  }
 0x633   : > { %v2666_v9 = vpop.permute.xlu2 %2665 }
 0x634   : > { %v2677_v24 = vsel %vm1685_vm2, %v5442_v39, %v2666_v9 }
 0x635   : > { %2699 = vmatpush.bf16.msrb.mxu3 %v2677_v24 }
 0x639   : > { %3130 = vperm.xlu0 %4167, %v3120_v62  }
 0x63b   : > { %v6369_v10 = vpop.permute.xlu0 %2746  ;;  %v2664_v12 = vpop.permute.xlu2 %2663 }
 0x63c   : > { %v2650_v40 = vpop.permute.xlu1 %2649 }
 0x63d   : > { %v2669_v53 = vsel %vm1685_vm2, %v5442_v39, %v2650_v40  ;;  %v2670_v44 = vsel %vm1685_vm2, %v2650_v40, %v2652_v45  ;;  %v4126_v45 = vld [vmem:[%s6761_s3 + $0x20] sm:$0xff] }
 0x641   : > { %3257 = vrot.lane.b32.xlu0 %v7092_v13, %s4188_s12 }
 0x643   : > { %v2668_v46 = vpop.permute.xlu0 %2667  ;;  %v2654_v43 = vpop.permute.xlu2 %2653 }
 0x644   : > { %v2678_v50 = vsel %vm1685_vm2, %v2666_v9, %v2668_v46  ;;  %v2662_v4 = vpop.permute.xlu1 %2661  ;;  %v2671_v27 = vsel %vm1685_vm2, %v5442_v39, %v2654_v43  ;;  %v4123_v46 = vld [vmem:[%s6761_s3 + $0x8] sm:$0xff] }
 0x645   : > { %v2675_v1 = vsel %vm1685_vm2, %v5442_v39, %v2662_v4  ;;  %2718 = vmatpush.bf16.msra.mxu2 %v2678_v50  ;;  %v2676_v58 = vsel %vm1685_vm2, %v2662_v4, %v2664_v12  ;;  %v4127_v4 = vld [vmem:[%s6761_s3 + $0x28] sm:$0xff] }
 0x646   : > { %2700 = vmatpush.bf16.msrb.mxu3 %v2675_v1 }
 0x649   : > { %2719 = vmatpush.bf16.msra.mxu2 %v2676_v58 }
 0x64b   : > { %v2658_v21 = vpop.permute.xlu0 %2657  ;;  %v6377_v3 = vpop.permute.xlu2 %3027 }
 0x64c   : > { %v2660_v41 = vpop.permute.xlu1 %2659  ;;  %v2673_v22 = vsel %vm1685_vm2, %v5442_v39, %v2658_v21 }
 0x64d   : > { %2701 = vmatpush.bf16.msrb.mxu3 %v2673_v22  ;;  %v2674_v13 = vsel %vm1685_vm2, %v2658_v21, %v2660_v41 }
 0x64e   : > { %2720 = vmatpush.bf16.msra.mxu2 %v2674_v13 }
 0x651   : > { %2702 = vmatpush.bf16.msrb.mxu3 %v2671_v27 }
 0x653   : > { %v2656_v7 = vpop.permute.xlu0 %2655  ;;  %v2757_v0 = vpop.permute.xlu2 %2756 }
 0x654   : > { %v2763_v31 = vpop.permute.xlu1 %2762  ;;  %v2672_v25 = vsel %vm1685_vm2, %v2654_v43, %v2656_v7  ;;  %v2770_v15 = vsel %vm1519_vm14, %v7116_v23, %v2757_v0 }
 0x655   : > { %2703 = vmatpush.bf16.msrb.mxu3 %v2669_v53  ;;  %2721 = vmatpush.bf16.msra.mxu2 %v2672_v25 }
 0x658   : > { %4002 = vmatmul.msk.bf16.vlgmr.msrb.gmra.mxu3 %vm1191_vm5, %v4124_v2 }
 0x659   : > { %2862 = vmatpush.bf16.msra.mxu3 %v6271_v33  ;;  %2722 = vmatpush.bf16.msra.mxu2 %v2670_v44 }
 0x65b   : > { %v2761_v55 = vpop.permute.xlu0 %2760  ;;  %v2755_v11 = vpop.permute.xlu2 %2754 }
 0x65c   : > { %v2772_v8 = vsel %vm1519_vm14, %v7116_v23, %v2761_v55  ;;  %v2773_v29 = vsel %vm1519_vm14, %v2761_v55, %v2763_v31  ;;  %v2753_v49 = vpop.permute.xlu1 %2752  ;;  %4004 = vmatmul.msk.bf16.vlgmr.msra.gmra.mxu2 %vm1191_vm5, %v4124_v2  ;;  %v3119_v31 = vld [vmem:[%s6762_s4] sm:$0xff] }
 0x65d   : > { %2863 = vmatpush.bf16.msra.mxu3 %v6262_v47  ;;  %2881 = vmatpush.bf16.msrb.mxu2 %v6259_v14  ;;  %v2768_v18 = vsel %vm1519_vm14, %v7116_v23, %v2753_v49  ;;  %v2769_v16 = vsel %vm1519_vm14, %v2753_v49, %v2755_v11 }
 0x65e   : > { %2793 = vmatpush.bf16.msra.mxu1 %v2772_v8  ;;  %2812 = vmatpush.bf16.msrb.mxu0 %v2773_v29 }
 0x65f   : > { %3125 = vperm.xlu2 %4169, %v3119_v31  }
 0x661   : > { %2864 = vmatpush.bf16.msra.mxu3 %v6274_v26  ;;  %2882 = vmatpush.bf16.msrb.mxu2 %v6286_v54  ;;  %v4122_v54 = vld [vmem:[%s6761_s3] sm:$0xff] }
 0x662   : > { %2794 = vmatpush.bf16.msra.mxu1 %v2770_v15 }
 0x663   : > { %v2759_v52 = vpop.permute.xlu0 %2758  ;;  %v3046_v35 = vpop.permute.xlu2 %3045 }
 0x664   : > { %v2751_v5 = vpop.permute.xlu1 %2750  ;;  %v2771_v20 = vsel %vm1519_vm14, %v2757_v0, %v2759_v52  ;;  %v3056_v17 = vsel %vm7117_vm4, %v3046_v35, %v5838_v19  ;;  %v4130_v52 = vld [vmem:[%s6761_s3 + $0x40] sm:$0xff] }
 0x665   : > { %2865 = vmatpush.bf16.msra.mxu3 %v6298_v57  ;;  %2883 = vmatpush.bf16.msrb.mxu2 %v6277_v36  ;;  %v2765_v36 = vsel %vm1519_vm14, %v6354_v34, %v6369_v10 }
 0x666   : > { %2795 = vmatpush.bf16.msra.mxu1 %v2768_v18  ;;  %2813 = vmatpush.bf16.msrb.mxu0 %v2771_v20 }
 0x668   : > { %4003 = vmatmul.msk.bf16.gmra.mxu3 %vm1191_vm5, %v4125_v51 }
 0x669   : > { %2866 = vmatpush.bf16.msra.mxu3 %v6247_v61  ;;  %2884 = vmatpush.bf16.msrb.mxu2 %v6289_v59 }
 0x66a   : > { %2814 = vmatpush.bf16.msrb.mxu0 %v2769_v16 }
 0x66b   : > { %v2749_v38 = vpop.permute.xlu0 %2748  ;;  %v3040_v14 = vpop.permute.xlu2 %3039 }
 0x66c   : > { %v3044_v47 = vpop.permute.xlu1 %3043  ;;  %4005 = vmatmul.msk.bf16.gmra.mxu2 %vm1191_vm5, %v4125_v51  ;;  %v2766_v61 = vsel %vm1519_vm14, %v7116_v23, %v2749_v38  ;;  %v2767_v33 = vsel %vm1519_vm14, %v2749_v38, %v2751_v5 }
 0x66d   : > { %2885 = vmatpush.bf16.msrb.mxu2 %v6250_v42  ;;  %v3055_v26 = vsel %vm7118_vm7, %v3044_v47, %v3046_v35  ;;  %2796 = vmatpush.bf16.msra.mxu1 %v2766_v61  ;;  %v2764_v42 = vsel %vm1519_vm14, %v7116_v23, %v6354_v34  ;;  %vm7120_vm14 = vmmov %vm7119_vm13  ;;  %v4128_v23 = vld [vmem:[%s6761_s3 + $0x30] sm:$0xff] }
 0x66e   : > { %2815 = vmatpush.bf16.msrb.mxu0 %v2767_v33  ;;  %3076 = vmatpush.bf16.msrb.mxu3 %v3055_v26  ;;  %vm7126_vm7 = vmmov %vm7117_vm4 }
 0x671   : > { %3095 = vmatpush.bf16.msra.mxu2 %v3056_v17  ;;  %2797 = vmatpush.bf16.msra.mxu1 %v2764_v42 }
 0x672   : > { %2816 = vmatpush.bf16.msrb.mxu0 %v2765_v36 }
 0x673   : > { %v2937_v59 = vpop.permute.xlu0 %2936  ;;  %v2935_v60 = vpop.permute.xlu2 %2934 }
 0x674   : > { %v2939_v57 = vpop.permute.xlu1 %2938  ;;  %4014 = vmatmul.msk.bf16.vlgmr.msra.gmra.mxu1 %vm1191_vm5, %v4122_v54  ;;  %v2947_v30 = vsel %vm7121_vm3, %v2935_v60, %v5781_v28 }
 0x675   : > { %4016 = vmatmul.msk.bf16.vlgmr.msrb.gmra.mxu0 %vm1191_vm5, %v4122_v54  ;;  %v2948_v32 = vsel %vm7119_vm13, %v2937_v59, %v2939_v57  ;;  %v2949_v34 = vsel %vm7120_vm14, %v2939_v57, %v5781_v28  ;;  %vm7127_vm13 = vmmov %vm7121_vm3 }
 0x676   : > { %2969 = vmatpush.bf16.msrb.mxu1 %v2948_v32  ;;  %2988 = vmatpush.bf16.msra.mxu0 %v2949_v34  ;;  %vm7128_vm14 = vmmov %vm7121_vm3 }
 0x677   : > { %vm7129_vm3 = vmmov %vm7117_vm4 }
 0x678   : > { %4030 = vmatmul.msk.bf16.vlgmr.msra.gmra.mxu3 %vm1191_vm5, %v4126_v45 }
 0x67a   : > { %2989 = vmatpush.bf16.msra.mxu0 %v2947_v30 }
 0x67b   : > { %v3042_v9 = vpop.permute.xlu0 %3041  ;;  %v2929_v24 = vpop.permute.xlu2 %2928 }
 0x67c   : > { %v2933_v62 = vpop.permute.xlu1 %2932  ;;  %4032 = vmatmul.msk.bf16.vlgmr.msrb.gmra.mxu2 %vm1191_vm5, %v4126_v45  ;;  %v3053_v10 = vsel %vm7122_vm9, %v3040_v14, %v3042_v9  ;;  %v3054_v12 = vsel %vm7123_vm11, %v3042_v9, %v5838_v19  ;;  %vm7130_vm9 = vmmov %vm7124_vm10 }
 0x67d   : > { %v2946_v40 = vsel %vm7124_vm10, %v2933_v62, %v2935_v60  ;;  %3077 = vmatpush.bf16.msrb.mxu3 %v3053_v10  ;;  %3096 = vmatpush.bf16.msra.mxu2 %v3054_v12  ;;  %vm7131_vm11 = vmmov %vm7130_vm9 }
 0x67e   : > { %2970 = vmatpush.bf16.msrb.mxu1 %v2946_v40  ;;  %vm7132_vm10 = vmmov %vm7130_vm9 }
 0x683   : > { %v3036_v43 = vpop.permute.xlu0 %3035  ;;  %v3034_v21 = vpop.permute.xlu2 %3033 }
 0x684   : > { %v3038_v50 = vpop.permute.xlu1 %3037  ;;  %4015 = vmatmul.msk.bf16.gmra.mxu1 %vm1191_vm5, %v4123_v46  ;;  %v3050_v41 = vsel %vm7126_vm7, %v3034_v21, %v5838_v19  ;;  %vm7135_vm7 = vmmov %vm7130_vm9 }
 0x685   : > { %4017 = vmatmul.msk.bf16.gmra.mxu0 %vm1191_vm5, %v4123_v46  ;;  %v3051_v1 = vsel %vm7125_vm15, %v3036_v43, %v3038_v50  ;;  %v3052_v58 = vsel %vm7117_vm4, %v3038_v50, %v5838_v19  ;;  %vm7133_vm15 = vmmov %vm7129_vm3 }
 0x686   : > { %3078 = vmatpush.bf16.msrb.mxu3 %v3051_v1  ;;  %3097 = vmatpush.bf16.msra.mxu2 %v3052_v58  ;;  %vm7134_vm4 = vmmov %vm7129_vm3 }
 0x688   : > { %4031 = vmatmul.msk.bf16.gmra.mxu3 %vm1191_vm5, %v4127_v4 }
 0x68a   : > { %3098 = vmatpush.bf16.msra.mxu2 %v3050_v41 }
 0x68b   : > { %v2931_v22 = vpop.permute.xlu0 %2930  ;;  %v2923_v55 = vpop.permute.xlu2 %2922 }
 0x68c   : > { %v3032_v13 = vpop.permute.xlu1 %3031  ;;  %4033 = vmatmul.msk.bf16.gmra.mxu2 %vm1191_vm5, %v4127_v4  ;;  %v2944_v27 = vsel %vm7127_vm13, %v2929_v24, %v2931_v22  ;;  %v2945_v7 = vsel %vm7128_vm14, %v2931_v22, %v5781_v28  ;;  %v2941_v11 = vsel %vm7132_vm10, %v2923_v55, %v5781_v28 }
 0x68d   : > { %2971 = vmatpush.bf16.msrb.mxu1 %v2944_v27  ;;  %2990 = vmatpush.bf16.msra.mxu0 %v2945_v7  ;;  %v3049_v0 = vsel %vm7129_vm3, %v3032_v13, %v3034_v21 }
 0x68e   : > { %3079 = vmatpush.bf16.msrb.mxu3 %v3049_v0 }
 0x693   : > { %v2925_v53 = vpop.permute.xlu0 %2924 }
 0x694   : > { %v2927_v25 = vpop.permute.xlu1 %2926 }
 0x695   : > { %v2942_v2 = vsel %vm7130_vm9, %v2925_v53, %v2927_v25  ;;  %v2943_v44 = vsel %vm7131_vm11, %v2927_v25, %v5781_v28 }
 0x696   : > { %2972 = vmatpush.bf16.msrb.mxu1 %v2942_v2  ;;  %2991 = vmatpush.bf16.msra.mxu0 %v2943_v44 }
 0x69a   : > { %2992 = vmatpush.bf16.msra.mxu0 %v2941_v11 }
 0x69b   : > { %v3030_v8 = vpop.permute.xlu0 %3029 }
 0x69c   : > { %v2921_v29 = vpop.permute.xlu1 %2920  ;;  %v3047_v49 = vsel %vm7133_vm15, %v6377_v3, %v3030_v8  ;;  %v3048_v15 = vsel %vm7134_vm4, %v3030_v8, %v5838_v19  ;;  %v4129_v19 = vld [vmem:[%s6761_s3 + $0x38] sm:$0xff]  ;;  %v4131_v3 = vld [vmem:[%s6761_s3 + $0x48] sm:$0xff]  ;;  %vm7137_vm4 = vcmask 1031168  }
 0x69d   : > { %4048 = vmatmul.msk.bf16.vlgmr.msra.gmra.mxu0 %vm1191_vm5, %v4128_v23  ;;  %v2940_v35 = vsel %vm7135_vm7, %v2921_v29, %v2923_v55  ;;  %3080 = vmatpush.bf16.msrb.mxu3 %v3047_v49  ;;  %vm7138_vm7 = vmmov %vm7137_vm4 }
 0x69e   : > { %2973 = vmatpush.bf16.msrb.mxu1 %v2940_v35  ;;  %3099 = vmatpush.bf16.msra.mxu2 %v3048_v15 }
 0x6a0   : > { %4062 = vmatmul.msk.bf16.vlgmr.msrb.gmra.mxu3 %vm1191_vm5, %v4130_v52 }
 0x6a1   : > { %4046 = vmatmul.msk.bf16.vlgmr.msrb.gmra.mxu1 %vm1191_vm5, %v4128_v23  ;;  %4064 = vmatmul.msk.bf16.vlgmr.msra.gmra.mxu2 %vm1191_vm5, %v4130_v52 }
 0x6a3   : > { %v3136_v50 = vpop.permute.xlu0 %3135 }
 0x6ad   : > { %4049 = vmatmul.msk.bf16.gmra.mxu0 %vm1191_vm5, %v4129_v19 }
 0x6b0   : > { %4063 = vmatmul.msk.bf16.gmra.mxu3 %vm1191_vm5, %v4131_v3 }
 0x6b1   : > { %4047 = vmatmul.msk.bf16.gmra.mxu1 %vm1191_vm5, %v4129_v19  ;;  %4065 = vmatmul.msk.bf16.gmra.mxu2 %vm1191_vm5, %v4131_v3  ;;  %v3131_v3 = vpop.permute.xlu0 %3130 }
 0x6b9   : > { %v3126_v21 = vpop.permute.xlu2 %3125 }
 0x6db   : > { %v2705_v5 = vpop.f32.mrf.mxu3 }
 0x6df   : > { %v2724_v18 = vpop.f32.mrf.mxu2 }
 0x6e3   : > { %v2707_v20 = vpop.f32.mrf.mxu3 }
 0x6e7   : > { %v2726_v51 = vpop.f32.mrf.mxu2 }
 0x6eb   : > { %v2710_v16 = vpop.f32.mrf.mxu3 }
 0x6ef   : > { %v2729_v17 = vpop.f32.mrf.mxu2 }
 0x6f1   : > { %v2799_v61 = vpop.f32.mrf.mxu1 }
 0x6f2   : > { %v2818_v14 = vpop.f32.mrf.mxu0  ;;  %v2800_v10 = vadd.f32 %v2799_v61, %v2705_v5 }
 0x6f3   : > { %v6500_v38 = vpop.f32.mrf.mxu3  ;;  %v2819_v40 = vadd.f32 %v2818_v14, %v2724_v18 }
 0x6f7   : > { %v6502_v47 = vpop.f32.mrf.mxu2 }
 0x6f9   : > { %v2801_v36 = vpop.f32.mrf.mxu1 }
 0x6fa   : > { %v2820_v26 = vpop.f32.mrf.mxu0  ;;  %v2802_v7 = vadd.f32 %v2801_v36, %v2707_v20 }
 0x6fb   : > { %v2868_v33 = vpop.f32.mrf.mxu3  ;;  %v2821_v53 = vadd.f32 %v2820_v26, %v2726_v51 }
 0x6fc   : > { %v2897_v46 = vadd.f32 %v2868_v33, %v2800_v10 }
 0x6ff   : > { %v2887_v42 = vpop.f32.mrf.mxu2 }
 0x700   : > { %v2898_v43 = vadd.f32 %v2887_v42, %v2819_v40 }
 0x701   : > { %v2804_v57 = vpop.f32.mrf.mxu1 }
 0x702   : > { %v2823_v59 = vpop.f32.mrf.mxu0  ;;  %v2805_v18 = vadd.f32 %v2804_v57, %v2710_v16 }
 0x703   : > { %v2870_v54 = vpop.f32.mrf.mxu3  ;;  %v2824_v61 = vadd.f32 %v2823_v59, %v2729_v17 }
 0x704   : > { %v2899_v2 = vadd.f32 %v2870_v54, %v2802_v7 }
 0x707   : > { %v2889_v60 = vpop.f32.mrf.mxu2 }
 0x708   : > { %v2900_v55 = vadd.f32 %v2889_v60, %v2821_v53 }
 0x709   : > { %v2806_v30 = vpop.f32.mrf.mxu1 }
 0x70a   : > { %v6504_v32 = vpop.f32.mrf.mxu0 }
 0x70b   : > { %v2873_v45 = vpop.f32.mrf.mxu3  ;;  %v2826_v59 = vadd.f32 %v6504_v32, %v6502_v47 }
 0x70c   : > { %v2901_v26 = vadd.f32 %v2873_v45, %v2805_v18 }
 0x70f   : > { %v2892_v34 = vpop.f32.mrf.mxu2 }
 0x710   : > { %v2902_v36 = vadd.f32 %v2892_v34, %v2824_v61 }
 0x713   : > { %v6506_v24 = vpop.f32.mrf.mxu3 }
 0x717   : > { %v6508_v62 = vpop.f32.mrf.mxu2 }
 0x718   : > { %v2904_v32 = vadd.f32 %v6508_v62, %v2826_v59 }
 0x71a   : > { %v2994_v9 = vpop.f32.mrf.mxu0 }
 0x71b   : > { %v3005_v1 = vadd.f32 %v2994_v9, %v2898_v43 }
 0x71e   : > { %v2975_v12 = vpop.f32.mrf.mxu1 }
 0x71f   : > { %v3004_v4 = vadd.f32 %v2975_v12, %v2897_v46  ;;  %v2807_v46 = vadd.f32 %v2806_v30, %v6500_v38 }
 0x721   : > { %v2903_v38 = vadd.f32 %v6506_v24, %v2807_v46 }
 0x722   : > { %v2996_v41 = vpop.f32.mrf.mxu0 }
 0x723   : > { %v3082_v58 = vpop.f32.mrf.mxu3  ;;  %v3007_v29 = vadd.f32 %v2996_v41, %v2900_v55 }
 0x724   : > { %v3111_v22 = vadd.f32 %v3082_v58, %v3004_v4  ;;  %v3101_v13 = vpop.f32.mrf.mxu2 }
 0x725   : > { %v3112_v27 = vadd.f32 %v3101_v13, %v3005_v1 }
 0x726   : > { %v3143_v0 = vadd.f32 %v3126_v21, %v3111_v22  ;;  %v2977_v31 = vpop.f32.mrf.mxu1 }
 0x727   : > { %v3144_v25 = vadd.f32 %v3126_v21, %v3112_v27  ;;  %v3006_v8 = vadd.f32 %v2977_v31, %v2899_v2 }
 0x728   : > { %vm3151_vm5 = vcmp.ge.f32.partialorder %v3143_v0, 0.0  ;;  %v3159_v44 = vmul.f32 0.2, %v3143_v0 }
 0x729   : > { %vm3152_vm13 = vcmp.ge.f32.partialorder %v3144_v25, 0.0  ;;  %v3160_v11 = vmul.f32 0.2, %v3144_v25 }
 0x72a   : > { %v3167_v23 = vsel %vm3151_vm5, %v3143_v0, %v3159_v44  ;;  %v2999_v20 = vpop.f32.mrf.mxu0  ;;  %vm7139_vm5 = vcmask 1039360  }
 0x72b   : > { %v3168_v49 = vsel %vm3152_vm13, %v3144_v25, %v3160_v11  ;;  %v3084_v15 = vpop.f32.mrf.mxu3  ;;  %v3009_v10 = vadd.f32 %v2999_v20, %v2902_v36  ;;  %vm7140_vm13 = vmmov %vm7137_vm4 }
 0x72c   : > { %v3175_v52 = vpack.c.bf16 %v3168_v49, %v3167_v23  ;;  %v3113_v35 = vadd.f32 %v3084_v15, %v3006_v8  ;;  %v3103_v19 = vpop.f32.mrf.mxu2  ;;  %v3141_v49 = vpop.permute.xlu1 %3140 }
 0x72d   : > { %v3114_v5 = vadd.f32 %v3103_v19, %v3007_v29 }
 0x72e   : > { %v3145_v51 = vadd.f32 %v3131_v3, %v3113_v35  ;;  %v2980_v14 = vpop.f32.mrf.mxu1  ;;  %v3203_v17 = vsel %vm4328_vm12, %v3175_v52, 0  ;;  %v3184_v34 = vunpack.c.h.b16 %v3175_v52  ;;  %v3183_v4 = vunpack.c.l.b16 %v3175_v52 }
 0x72f   : > { %v3146_v33 = vadd.f32 %v3131_v3, %v3114_v5  ;;  %v3008_v9 = vadd.f32 %v2980_v14, %v2901_v26  ;;  %v3216_v13 = vunpack.c.h.b16 %v3203_v17  ;;  %v3215_v3 = vunpack.c.l.b16 %v3203_v17 }
 0x730   : > { %vm3153_vm14 = vcmp.ge.f32.partialorder %v3145_v51, 0.0  ;;  %v3161_v42 = vmul.f32 0.2, %v3145_v51 }
 0x731   : > { %vm3154_vm3 = vcmp.ge.f32.partialorder %v3146_v33, 0.0  ;;  %v3162_v54 = vmul.f32 0.2, %v3146_v33 }
 0x732   : > { %v3169_v60 = vsel %vm3153_vm14, %v3145_v51, %v3161_v42  ;;  %v3001_v7 = vpop.f32.mrf.mxu0  ;;  %vm7141_vm14 = vmmov %vm7137_vm4 }
 0x733   : > { %v3170_v12 = vsel %vm3154_vm3, %v3146_v33, %v3162_v54  ;;  %v3087_v40 = vpop.f32.mrf.mxu3  ;;  %vm7142_vm3 = vmmov %vm7139_vm5 }
 0x734   : > { %v3176_v43 = vpack.c.bf16 %v3170_v12, %v3169_v60  ;;  %v3115_v16 = vadd.f32 %v3087_v40, %v3008_v9  ;;  %v3106_v57 = vpop.f32.mrf.mxu2 }
 0x735   : > { %v3116_v45 = vadd.f32 %v3106_v57, %v3009_v10 }
 0x736   : > { %v3147_v1 = vadd.f32 %v3136_v50, %v3115_v16  ;;  %v3204_v58 = vsel %vm4328_vm12, %v3176_v43, 0  ;;  %v3186_v21 = vunpack.c.h.b16 %v3176_v43  ;;  %v3185_v41 = vunpack.c.l.b16 %v3176_v43  ;;  %v2982_v22 = vpop.f32.mrf.mxu1 }
 0x737   : > { %v3148_v30 = vadd.f32 %v3136_v50, %v3116_v45  ;;  %v3218_v27 = vunpack.c.h.b16 %v3204_v58  ;;  %v3010_v44 = vadd.f32 %v2982_v22, %v2903_v38  ;;  %v3011_v50 = vadd.f32 %v3001_v7, %v2904_v32 }
 0x738   : > { %vm3155_vm9 = vcmp.ge.f32.partialorder %v3147_v1, 0.0  ;;  %v3163_v0 = vmul.f32 0.2, %v3147_v1  ;;  %v3192_v31 = vpack.c.b16 %v3186_v21, %v3184_v34  ;;  %v3191_v47 = vpack.c.b16 %v3185_v41, %v3183_v4  ;;  %v6552_v21 = vpop.permute.xlu0 %3257 }
 0x739   : > { %vm3156_vm11 = vcmp.ge.f32.partialorder %v3148_v30, 0.0  ;;  %v3164_v53 = vmul.f32 0.2, %v3148_v30  ;;  %v3224_v25 = vpack.c.b16 %v3218_v27, %v3216_v13  ;;  %v3217_v52 = vunpack.c.l.b16 %v3204_v58 }
 0x73a   : > { %v3171_v2 = vsel %vm3155_vm9, %v3147_v1, %v3163_v0  ;;  %v3208_v55 = vsel %vm4479_vm8, %v3192_v31, 0  ;;  %v3207_v24 = vsel %vm7086_vm0, %v3191_v47, 0  ;;  %v3199_v45 = vsel %vm7084_vm6, %v3191_v47, 0 }
 0x73b   : > { %v3172_v11 = vsel %vm3156_vm11, %v3148_v30, %v3164_v53  ;;  %3229 = vrot.lane.b32.xlu2 %v3224_v25, %s4191_s19  ;;  %3243 = vrot.lane.b32.xlu1 %v3208_v55, %s4193_s21  ;;  %v3089_v23 = vpop.f32.mrf.mxu3  ;;  %v3223_v20 = vpack.c.b16 %v3217_v52, %v3215_v3  ;;  %v3200_v34 = vsel %vm7088_vm1, %v3192_v31, 0  ;;  %v7136_v30 = vld [vmem:[#allocation17_spill] sm:$0xff]  ;;  %vm7143_vm9 = vcmask 7168  }
 0x73c   : > { %v3177_v8 = vpack.c.bf16 %v3172_v11, %v3171_v2  ;;  %3241 = vrot.lane.b32.xlu0 %v3207_v24, %s4193_s21  ;;  %v3117_v62 = vadd.f32 %v3089_v23, %v3010_v44  ;;  %v3108_v29 = vpop.f32.mrf.mxu2  ;;  %vm7144_vm11 = vmmov %vm7143_vm9 }
 0x73d   : > { %v3118_v15 = vadd.f32 %v3108_v29, %v3011_v50 }
 0x73e   : > { %v3149_v35 = vadd.f32 %v3141_v49, %v3117_v62  ;;  %v3205_v33 = vsel %vm4328_vm12, %v3177_v8, 0  ;;  %v3188_v26 = vunpack.c.h.b16 %v3177_v8  ;;  %v3187_v54 = vunpack.c.l.b16 %v3177_v8 }
 0x73f   : > { %v3150_v19 = vadd.f32 %v3141_v49, %v3118_v15  ;;  %v3220_v9 = vunpack.c.h.b16 %v3205_v33  ;;  %v3219_v17 = vunpack.c.l.b16 %v3205_v33 }
 0x740   : > { %vm3157_vm10 = vcmp.ge.f32.partialorder %v3149_v35, 0.0  ;;  %v3165_v5 = vmul.f32 0.2, %v3149_v35 }
 0x741   : > { %vm3158_vm15 = vcmp.ge.f32.partialorder %v3150_v19, 0.0  ;;  %v3166_v18 = vmul.f32 0.2, %v3150_v19 }
 0x742   : > { %v3173_v51 = vsel %vm3157_vm10, %v3149_v35, %v3165_v5  ;;  %vm7145_vm10 = vmmov %vm7143_vm9 }
 0x743   : > { %v3174_v14 = vsel %vm3158_vm15, %v3150_v19, %v3166_v18  ;;  %3227 = vrot.lane.b32.xlu1 %v3223_v20, %s4191_s19  ;;  %vm7146_vm15 = vmmov %vm7143_vm9 }
 0x744   : > { %v3178_v61 = vpack.c.bf16 %v3174_v14, %v3173_v51 }
 0x746   : > { %v3206_v42 = vsel %vm4328_vm12, %v3178_v61, 0  ;;  %v3190_v36 = vunpack.c.h.b16 %v3178_v61  ;;  %v3189_v60 = vunpack.c.l.b16 %v3178_v61 }
 0x747   : > { %v3222_v10 = vunpack.c.h.b16 %v3206_v42  ;;  %v3221_v57 = vunpack.c.l.b16 %v3206_v42 }
 0x748   : > { %v3194_v12 = vpack.c.b16 %v3190_v36, %v3188_v26  ;;  %v3193_v40 = vpack.c.b16 %v3189_v60, %v3187_v54 }
 0x749   : > { %v3226_v46 = vpack.c.b16 %v3222_v10, %v3220_v9  ;;  %v3225_v59 = vpack.c.b16 %v3221_v57, %v3219_v17  ;;  %v3532_v10 = vld [vmem:[%s6764_s6] sm:$0xff] }
 0x74a   : > { %v3210_v43 = vsel %vm4479_vm8, %v3194_v12, 0  ;;  %v3209_v16 = vsel %vm7086_vm0, %v3193_v40, 0  ;;  %v3202_v4 = vsel %vm7088_vm1, %v3194_v12, 0  ;;  %v3201_v1 = vsel %vm7084_vm6, %v3193_v40, 0  ;;  %v3533_v12 = vld [vmem:[%s6764_s6 + $0x8] sm:$0xff] }
 0x74b   : > { %3233 = vrot.lane.b32.xlu0 %v3226_v46, %s4191_s19  ;;  %3247 = vrot.lane.b32.xlu2 %v3210_v43, %s4193_s21 }
 0x74c   : > { %3245 = vrot.lane.b32.xlu1 %v3209_v16, %s4193_s21 }
 0x753   : > { %3259 = vrot.lane.b32.xlu0 %v3199_v45, %s4188_s12  ;;  %3231 = vrot.lane.b32.xlu2 %v3225_v59, %s4191_s19 }
 0x754   : > { %3261 = vrot.lane.b32.xlu1 %v3200_v34, %s4188_s12  ;;  %v4133_v34 = vld [vmem:[%s6763_s5 + $0x8] sm:$0xff] }
 0x75b   : > { %3265 = vrot.lane.b32.xlu2 %v3202_v4, %s4188_s12 }
 0x75c   : > { %3263 = vrot.lane.b32.xlu1 %v3201_v1, %s4188_s12 }
 0x795   : > { %v3230_v58 = vpop.permute.xlu2 %3229 }
 0x796   : > { %3271 = vrot.lane.b32.xlu2 %v3230_v58, %s4188_s12 }
 0x7a5   : > { %v3248_v0 = vpop.permute.xlu2 %3247 }
 0x7a6   : > { %v3252_v25 = vsel %vm7141_vm14, %v3248_v0, %v7136_v30 }
 0x7ad   : > { %v3244_v41 = vpop.permute.xlu1 %3243  ;;  %v3232_v53 = vpop.permute.xlu2 %3231 }
 0x7ae   : > { %v3242_v38 = vpop.permute.xlu0 %3241  ;;  %v3250_v22 = vsel %vm7137_vm4, %v3244_v41, %v7136_v30  ;;  %vm7147_vm4 = vmmov %vm7143_vm9 }
 0x7af   : > { %v3249_v13 = vsel %vm7138_vm7, %v3242_v38, %v3244_v41  ;;  %3279 = vrot.lane.b32.xlu0 %v3242_v38, %s4188_s12  ;;  %3283 = vrot.lane.b32.xlu2 %v3250_v22, %s4188_s12  ;;  %vm7148_vm7 = vmmov %vm7147_vm4 }
 0x7b0   : > { %3281 = vrot.lane.b32.xlu1 %v3249_v13, %s4188_s12  ;;  %vm7151_vm14 = vmmov %vm7147_vm4 }
 0x7b5   : > { %v3228_v27 = vpop.permute.xlu1 %3227  ;;  %v3266_v55 = vpop.permute.xlu2 %3265 }
 0x7b6   : > { %v3235_v7 = vsel %vm7139_vm5, %v3228_v27, %v3230_v58  ;;  %vm7149_vm5 = vmmov %vm7147_vm4 }
 0x7b7   : > { %3267 = vrot.lane.b32.xlu0 %v3228_v27, %s4188_s12 }
 0x7b8   : > { %3269 = vrot.lane.b32.xlu1 %v3235_v7, %s4188_s12 }
 0x7bd   : > { %v3234_v31 = vpop.permute.xlu0 %3233 }
 0x7be   : > { %v3246_v47 = vpop.permute.xlu1 %3245  ;;  %3277 = vrot.lane.b32.xlu2 %v3234_v31, %s4188_s12  ;;  %v3236_v44 = vsel %vm7142_vm3, %v3232_v53, %v3234_v31  ;;  %vm7152_vm3 = vmmov %vm7147_vm4 }
 0x7bf   : > { %v3251_v32 = vsel %vm7140_vm13, %v3246_v47, %v3248_v0  ;;  %3285 = vrot.lane.b32.xlu0 %v3246_v47, %s4188_s12  ;;  %vm7150_vm13 = vmmov %vm7147_vm4 }
 0x7c0   : > { %3287 = vrot.lane.b32.xlu1 %v3251_v32, %s4188_s12 }
 0x7c5   : > { %v3260_v8 = vpop.permute.xlu0 %3259 }
 0x7c6   : > { %v3262_v2 = vpop.permute.xlu1 %3261  ;;  %3289 = vrot.lane.b32.xlu2 %v3252_v25, %s4188_s12 }
 0x7c7   : > { %3273 = vrot.lane.b32.xlu0 %v3232_v53, %s4188_s12 }
 0x7c8   : > { %3275 = vrot.lane.b32.xlu1 %v3236_v44, %s4188_s12 }
 0x7ce   : > { %v3264_v24 = vpop.permute.xlu1 %3263 }
 0x7cf   : > { %v3293_v50 = vsel %vm7143_vm9, %v6552_v21, %v3264_v24  ;;  %v3294_v11 = vsel %vm7144_vm11, %v3264_v24, %v3266_v55  ;;  %vm7153_vm9 = vmmov %vm7152_vm3 }
 0x7d0   : > { %3368 = vrot.lane.b32.xlu0 %v3294_v11, %s4207_s25  ;;  %3366 = vrot.lane.b32.xlu2 %v3293_v50, %s4207_s25  ;;  %v3292_v60 = vsel %vm7153_vm9, %v3260_v8, %v3262_v2  ;;  %vm7154_vm11 = vmmov %vm7152_vm3 }
 0x7d1   : > { %v3291_v9 = vsel %vm7154_vm11, %v6552_v21, %v3260_v8 }
 0x7f0   : > { %v3272_v23 = vpop.permute.xlu2 %3271 }
 0x809   : > { %v3284_v62 = vpop.permute.xlu2 %3283 }
 0x818   : > { %v3278_v35 = vpop.permute.xlu2 %3277 }
 0x820   : > { %v3290_v51 = vpop.permute.xlu2 %3289 }
 0x821   : > { %v3280_v29 = vpop.permute.xlu0 %3279 }
 0x822   : > { %v3282_v49 = vpop.permute.xlu1 %3281 }
 0x823   : > { %v3299_v15 = vsel %vm7145_vm10, %v3280_v29, %v3282_v49  ;;  %v3300_v52 = vsel %vm7146_vm15, %v3282_v49, %v3284_v62  ;;  %vm7155_vm10 = vcmask 785408  }
 0x824   : > { %3380 = vrot.lane.b32.xlu2 %v3300_v52, %s4207_s25  ;;  %3465 = vrot.lane.b32.xlu0 %v3299_v15, %s4208_s15  ;;  %vm7156_vm15 = vmmov %vm7155_vm10 }
 0x825   : > { %3378 = vrot.lane.b32.xlu1 %v3299_v15, %s4207_s25  ;;  %vm7163_vm9 = vmmov %vm7155_vm10 }
 0x826   : > { %vm7164_vm11 = vmmov %vm7163_vm9 }
 0x829   : > { %v3268_v19 = vpop.permute.xlu0 %3267 }
 0x82a   : > { %v3270_v3 = vpop.permute.xlu1 %3269  ;;  %v3367_v40 = vpop.permute.xlu2 %3366 }
 0x82b   : > { %v3295_v5 = vsel %vm7147_vm4, %v3268_v19, %v3270_v3  ;;  %v3296_v18 = vsel %vm7148_vm7, %v3270_v3, %v3272_v23  ;;  %vm7157_vm4 = vcmask 916480   ;;  %v3388_v24 = vsel %vm1685_vm2, %v5442_v39, %v3367_v40 }
 0x82c   : > { %3372 = vrot.lane.b32.xlu2 %v3296_v18, %s4207_s25  ;;  %vm7158_vm7 = vmmov %vm7157_vm4 }
 0x82d   : > { %3370 = vrot.lane.b32.xlu1 %v3295_v5, %s4207_s25 }
 0x831   : > { %v3286_v20 = vpop.permute.xlu0 %3285 }
 0x832   : > { %v3288_v14 = vpop.permute.xlu1 %3287 }
 0x833   : > { %v3301_v61 = vsel %vm7149_vm5, %v3286_v20, %v3288_v14  ;;  %v3302_v33 = vsel %vm7150_vm13, %v3288_v14, %v3290_v51  ;;  %vm7159_vm5 = vmmov %vm7157_vm4 }
 0x834   : > { %3384 = vrot.lane.b32.xlu0 %v3302_v33, %s4207_s25  ;;  %3345 = vmatpush.bf16.msrb.mxu0 %v3302_v33  ;;  %vm7160_vm13 = vmmov %vm7157_vm4 }
 0x835   : > { %3467 = vrot.lane.b32.xlu1 %v3300_v52, %s4208_s15  ;;  %3382 = vrot.lane.b32.xlu2 %v3301_v61, %s4207_s25 }
 0x836   : > { %3331 = vmatpush.bf16.msra.mxu1 %v3301_v61 }
 0x838   : > { %3346 = vmatpush.bf16.msrb.mxu0 %v3300_v52  ;;  %v4132_v52 = vld [vmem:[%s6763_s5] sm:$0xff] }
 0x839   : > { %v3274_v26 = vpop.permute.xlu0 %3273 }
 0x83a   : > { %3332 = vmatpush.bf16.msra.mxu1 %v3299_v15  ;;  %v3276_v42 = vpop.permute.xlu1 %3275 }
 0x83b   : > { %v3297_v36 = vsel %vm7151_vm14, %v3274_v26, %v3276_v42  ;;  %v3298_v54 = vsel %vm7152_vm3, %v3276_v42, %v3278_v35  ;;  %vm7161_vm14 = vmmov %vm7157_vm4 }
 0x83c   : > { %3347 = vmatpush.bf16.msrb.mxu0 %v3298_v54  ;;  %3374 = vrot.lane.b32.xlu0 %v3297_v36, %s4207_s25  ;;  %vm7162_vm3 = vmmov %vm7157_vm4 }
 0x83d   : > { %3469 = vrot.lane.b32.xlu2 %v3301_v61, %s4208_s15  ;;  %3376 = vrot.lane.b32.xlu1 %v3298_v54, %s4207_s25 }
 0x83e   : > { %3333 = vmatpush.bf16.msra.mxu1 %v3297_v36 }
 0x840   : > { %3348 = vmatpush.bf16.msrb.mxu0 %v3296_v18 }
 0x842   : > { %3334 = vmatpush.bf16.msra.mxu1 %v3295_v5  ;;  %v3369_v17 = vpop.permute.xlu0 %3368 }
 0x844   : > { %3349 = vmatpush.bf16.msrb.mxu0 %v3294_v11  ;;  %3471 = vrot.lane.b32.xlu0 %v3302_v33, %s4208_s15 }
 0x845   : > { %3457 = vrot.lane.b32.xlu2 %v3295_v5, %s4208_s15  ;;  %3364 = vrot.lane.b32.xlu1 %v3292_v60, %s4207_s25 }
 0x846   : > { %3335 = vmatpush.bf16.msra.mxu1 %v3293_v50 }
 0x848   : > { %3350 = vmatpush.bf16.msrb.mxu0 %v3292_v60 }
 0x84a   : > { %3336 = vmatpush.bf16.msra.mxu1 %v3291_v9 }
 0x84b   : > { %4073 = vmatmul.msk.bf16.vlgmr.msrb.gmra.mxu0 %vm7156_vm15, %v4133_v34  ;;  %vm7166_vm15 = vmmov %vm7162_vm3 }
 0x84c   : > { %3362 = vrot.lane.b32.xlu0 %v3291_v9, %s4207_s25 }
 0x84d   : > { %3463 = vrot.lane.b32.xlu2 %v3298_v54, %s4208_s15  ;;  %3461 = vrot.lane.b32.xlu1 %v3297_v36, %s4208_s15  ;;  %v4134_v54 = vld [vmem:[%s6763_s5 + $0x10] sm:$0xff] }
 0x84e   : > { %4072 = vmatmul.msk.bf16.vlgmr.msra.gmra.mxu1 %vm7155_vm10, %v4133_v34  ;;  %vm7165_vm10 = vmmov %vm7162_vm3 }
 0x854   : > { %3459 = vrot.lane.b32.xlu0 %v3296_v18, %s4208_s15 }
 0x855   : > { %3455 = vrot.lane.b32.xlu2 %v3294_v11, %s4208_s15  ;;  %3453 = vrot.lane.b32.xlu1 %v3293_v50, %s4208_s15  ;;  %v3389_v50 = vsel %vm1685_vm2, %v3367_v40, %v3369_v17 }
 0x85c   : > { %3449 = vrot.lane.b32.xlu0 %v3291_v9, %s4208_s15 }
 0x85d   : > { %3536 = vperm.xlu2 %4169, %v3532_v10   ;;  %3451 = vrot.lane.b32.xlu1 %v3292_v60, %s4208_s15 }
 0x864   : > { %3541 = vperm.xlu0 %4167, %v3533_v12  }
 0x87e   : > { %v3381_v46 = vpop.permute.xlu2 %3380 }
 0x886   : > { %v3373_v43 = vpop.permute.xlu2 %3372 }
 0x88f   : > { %v3383_v16 = vpop.permute.xlu2 %3382 }
 0x890   : > { %v3396_v57 = vsel %vm1685_vm2, %v5442_v39, %v3383_v16 }
 0x891   : > { %3415 = vmatpush.bf16.msra.mxu3 %v3396_v57 }
 0x896   : > { %v3466_v4 = vpop.permute.xlu0 %3465 }
 0x897   : > { %v3379_v59 = vpop.permute.xlu1 %3378  ;;  %v3470_v22 = vpop.permute.xlu2 %3469 }
 0x898   : > { %v3394_v45 = vsel %vm1685_vm2, %v5442_v39, %v3379_v59  ;;  %v3395_v13 = vsel %vm1685_vm2, %v3379_v59, %v3381_v46 }
 0x899   : > { %3416 = vmatpush.bf16.msra.mxu3 %v3394_v45 }
 0x89f   : > { %v3371_v1 = vpop.permute.xlu1 %3370  ;;  %v3458_v47 = vpop.permute.xlu2 %3457 }
 0x8a0   : > { %v3390_v32 = vsel %vm1685_vm2, %v5442_v39, %v3371_v1  ;;  %v3391_v53 = vsel %vm1685_vm2, %v3371_v1, %v3373_v43 }
 0x8a6   : > { %v3385_v58 = vpop.permute.xlu0 %3384 }
 0x8a7   : > { %v3397_v41 = vsel %vm1685_vm2, %v3383_v16, %v3385_v58  ;;  %v3468_v38 = vpop.permute.xlu1 %3467  ;;  %v3464_v8 = vpop.permute.xlu2 %3463 }
 0x8a8   : > { %3429 = vmatpush.bf16.msrb.mxu2 %v3397_v41  ;;  %v3481_v11 = vsel %vm7159_vm5, %v3466_v4, %v3468_v38  ;;  %v3482_v23 = vsel %vm7160_vm13, %v3468_v38, %v5781_v28  ;;  %v3480_v19 = vsel %vm7162_vm3, %v3464_v8, %v5781_v28  ;;  %vm7169_vm5 = vmmov %vm7162_vm3 }
 0x8a9   : > { %vm7170_vm13 = vmmov %vm7162_vm3 }
 0x8ac   : > { %3430 = vmatpush.bf16.msrb.mxu2 %v3395_v13 }
 0x8ae   : > { %v3375_v27 = vpop.permute.xlu0 %3374 }
 0x8af   : > { %v3377_v7 = vpop.permute.xlu1 %3376  ;;  %v3392_v0 = vsel %vm1685_vm2, %v5442_v39, %v3375_v27  ;;  %v3456_v51 = vpop.permute.xlu2 %3455 }
 0x8b0   : > { %3417 = vmatpush.bf16.msra.mxu3 %v3392_v0  ;;  %v3393_v31 = vsel %vm1685_vm2, %v3375_v27, %v3377_v7 }
 0x8b1   : > { %3431 = vmatpush.bf16.msrb.mxu2 %v3393_v31 }
 0x8b4   : > { %3418 = vmatpush.bf16.msra.mxu3 %v3390_v32 }
 0x8b5   : > { %3432 = vmatpush.bf16.msrb.mxu2 %v3391_v53 }
 0x8b6   : > { %v3472_v25 = vpop.permute.xlu0 %3471 }
 0x8b7   : > { %v3483_v2 = vsel %vm7157_vm4, %v3470_v22, %v3472_v25  ;;  %v3484_v44 = vsel %vm7158_vm7, %v3472_v25, %v5781_v28  ;;  %v3365_v55 = vpop.permute.xlu1 %3364  ;;  %vm7167_vm4 = vmmov %vm7162_vm3  ;;  %v3537_v34 = vpop.permute.xlu2 %3536 }
 0x8b8   : > { %3419 = vmatpush.bf16.msra.mxu3 %v3388_v24  ;;  %3502 = vmatpush.bf16.msrb.mxu1 %v3483_v2  ;;  %vm7168_vm7 = vmmov %vm7162_vm3 }
 0x8b9   : > { %3433 = vmatpush.bf16.msrb.mxu2 %v3389_v50  ;;  %3516 = vmatpush.bf16.msra.mxu0 %v3484_v44  ;;  %v3476_v61 = vsel %vm7168_vm7, %v3456_v51, %v5781_v28  ;;  %vm7172_vm3 = vmmov %vm7163_vm9 }
 0x8bc   : > { %3503 = vmatpush.bf16.msrb.mxu1 %v3481_v11 }
 0x8bd   : > { %3517 = vmatpush.bf16.msra.mxu0 %v3482_v23 }
 0x8be   : > { %v3363_v62 = vpop.permute.xlu0 %3362 }
 0x8bf   : > { %v3462_v29 = vpop.permute.xlu1 %3461  ;;  %v3386_v49 = vsel %vm1685_vm2, %v5442_v39, %v3363_v62  ;;  %v3387_v15 = vsel %vm1685_vm2, %v3363_v62, %v3365_v55 }
 0x8c0   : > { %3420 = vmatpush.bf16.msra.mxu3 %v3386_v49  ;;  %3434 = vmatpush.bf16.msrb.mxu2 %v3387_v15  ;;  %v3479_v35 = vsel %vm7161_vm14, %v3462_v29, %v3464_v8  ;;  %vm7171_vm14 = vmmov %vm7163_vm9 }
 0x8c1   : > { %3504 = vmatpush.bf16.msrb.mxu1 %v3479_v35  ;;  %3518 = vmatpush.bf16.msra.mxu0 %v3480_v19 }
 0x8c3   : > { %4078 = vmatmul.msk.bf16.vlgmr.msra.gmra.mxu3 %vm7163_vm9, %v4132_v52  ;;  %4079 = vmatmul.msk.bf16.vlgmr.msrb.gmra.mxu2 %vm7164_vm11, %v4132_v52 }
 0x8c6   : > { %v3460_v3 = vpop.permute.xlu0 %3459 }
 0x8c7   : > { %v3454_v5 = vpop.permute.xlu1 %3453  ;;  %v3477_v18 = vsel %vm7165_vm10, %v3458_v47, %v3460_v3  ;;  %v3478_v20 = vsel %vm7166_vm15, %v3460_v3, %v5781_v28 }
 0x8c8   : > { %3505 = vmatpush.bf16.msrb.mxu1 %v3477_v18  ;;  %3519 = vmatpush.bf16.msra.mxu0 %v3478_v20  ;;  %v3475_v14 = vsel %vm7167_vm4, %v3454_v5, %v3456_v51  ;;  %v3352_v9 = vpop.f32.mrf.mxu0  ;;  %vm7176_vm4 = vcmask 7168  }
 0x8c9   : > { %vm7177_vm7 = vmmov %vm7176_vm4 }
 0x8cb   : > { %v3338_v60 = vpop.f32.mrf.mxu1 }
 0x8cc   : > { %3506 = vmatpush.bf16.msrb.mxu1 %v3475_v14  ;;  %3520 = vmatpush.bf16.msra.mxu0 %v3476_v61 }
 0x8ce   : > { %v3450_v33 = vpop.permute.xlu0 %3449 }
 0x8cf   : > { %v3452_v26 = vpop.permute.xlu1 %3451 }
 0x8d0   : > { %v3473_v42 = vsel %vm7169_vm5, %v3450_v33, %v3452_v26  ;;  %v3474_v36 = vsel %vm7170_vm13, %v3452_v26, %v5781_v28  ;;  %v3354_v12 = vpop.f32.mrf.mxu0 }
 0x8d1   : > { %3507 = vmatpush.bf16.msrb.mxu1 %v3473_v42  ;;  %3521 = vmatpush.bf16.msra.mxu0 %v3474_v36 }
 0x8d3   : > { %v3340_v10 = vpop.f32.mrf.mxu1 }
 0x8d4   : > { %4086 = vmatmul.msk.bf16.vlgmr.msrb.gmra.mxu1 %vm7171_vm14, %v4134_v54  ;;  %4087 = vmatmul.msk.bf16.vlgmr.msra.gmra.mxu0 %vm7172_vm3, %v4134_v54  ;;  %vm7182_vm14 = vcmask 392192  }
 0x8d5   : > { %vm7183_vm3 = vmmov %vm7182_vm14 }
 0x8d6   : > { %v3542_v25 = vpop.permute.xlu0 %3541 }
 0x946   : > { %v3422_v40 = vpop.f32.mrf.mxu3  ;;  %v3436_v46 = vpop.f32.mrf.mxu2 }
 0x947   : > { %v3423_v43 = vadd.f32 %v3422_v40, %v3338_v60  ;;  %v3437_v16 = vadd.f32 %v3436_v46, %v3352_v9 }
 0x94e   : > { %v3424_v58 = vpop.f32.mrf.mxu3  ;;  %v3438_v41 = vpop.f32.mrf.mxu2 }
 0x94f   : > { %v3425_v13 = vadd.f32 %v3424_v58, %v3340_v10  ;;  %v3439_v27 = vadd.f32 %v3438_v41, %v3354_v12 }
 0x951   : > { %v3509_v57 = vpop.f32.mrf.mxu1  ;;  %v3523_v17 = vpop.f32.mrf.mxu0 }
 0x952   : > { %v3528_v59 = vadd.f32 %v3509_v57, %v3423_v43  ;;  %v3529_v45 = vadd.f32 %v3523_v17, %v3437_v16 }
 0x954   : > { %v3544_v4 = vadd.f32 %v3537_v34, %v3528_v59  ;;  %v3545_v1 = vadd.f32 %v3537_v34, %v3529_v45 }
 0x956   : > { %v3552_v38 = vmul.f32 0.2, %v3544_v4  ;;  %v3553_v22 = vmul.f32 0.2, %v3545_v1  ;;  %vm3548_vm9 = vcmp.ge.f32.partialorder %v3544_v4, 0.0  ;;  %vm3549_vm11 = vcmp.ge.f32.partialorder %v3545_v1, 0.0 }
 0x958   : > { %v3556_v31 = vsel %vm3548_vm9, %v3544_v4, %v3552_v38  ;;  %v3557_v47 = vsel %vm3549_vm11, %v3545_v1, %v3553_v22  ;;  %v4088_v1 = vld [vmem:[%s6765_s7 + $0x2] sm:$0x3]  ;;  %vm7184_vm9 = vcmask 916480  }
 0x959   : > { %v3511_v7 = vpop.f32.mrf.mxu1  ;;  %v3525_v0 = vpop.f32.mrf.mxu0  ;;  %v3560_v55 = vpack.c.bf16 %v3557_v47, %v3556_v31  ;;  %vm7185_vm11 = vmmov %vm7184_vm9  ;;  %v4093_v47 = vld [vmem:[%s6765_s7 + $0x4] sm:$0x3] }
 0x95a   : > { %v3530_v32 = vadd.f32 %v3511_v7, %v3425_v13  ;;  %v3531_v53 = vadd.f32 %v3525_v0, %v3439_v27 }
 0x95b   : > { %v3574_v62 = vsel %vm4328_vm12, %v3560_v55, 0  ;;  %v3565_v29 = vunpack.c.h.b16 %v3560_v55  ;;  %v3564_v52 = vunpack.c.l.b16 %v3560_v55 }
 0x95c   : > { %v3546_v2 = vadd.f32 %v3542_v25, %v3530_v32  ;;  %v3547_v44 = vadd.f32 %v3542_v25, %v3531_v53  ;;  %v3580_v19 = vunpack.c.l.b16 %v3574_v62  ;;  %v3581_v61 = vunpack.c.h.b16 %v3574_v62  ;;  %v3623_v62 = vld [vmem:[%s6765_s7] sm:$0x3] }
 0x95e   : > { %vm3550_vm10 = vcmp.ge.f32.partialorder %v3546_v2, 0.0  ;;  %v3554_v24 = vmul.f32 0.2, %v3546_v2  ;;  %vm3551_vm15 = vcmp.ge.f32.partialorder %v3547_v44, 0.0  ;;  %v3555_v50 = vmul.f32 0.2, %v3547_v44 }
 0x960   : > { %v3558_v11 = vsel %vm3550_vm10, %v3546_v2, %v3554_v24  ;;  %v3559_v23 = vsel %vm3551_vm15, %v3547_v44, %v3555_v50  ;;  %vm7186_vm10 = vmmov %vm7184_vm9 }
 0x961   : > { %v3561_v8 = vpack.c.bf16 %v3559_v23, %v3558_v11  ;;  %vm7187_vm15 = vmmov %vm7184_vm9 }
 0x963   : > { %v3575_v49 = vsel %vm4328_vm12, %v3561_v8, 0  ;;  %v3567_v15 = vunpack.c.h.b16 %v3561_v8  ;;  %v3566_v35 = vunpack.c.l.b16 %v3561_v8  ;;  %vm7173_vm12 = vcmask 1031168  }
 0x964   : > { %v3582_v3 = vunpack.c.l.b16 %v3575_v49  ;;  %v3583_v63 = vunpack.c.h.b16 %v3575_v49 }
 0x965   : > { %v3569_v5 = vpack.c.b16 %v3567_v15, %v3565_v29  ;;  %v3568_v18 = vpack.c.b16 %v3566_v35, %v3564_v52 }
 0x966   : > { %v3584_v20 = vpack.c.b16 %v3582_v3, %v3580_v19  ;;  %v3585_v33 = vpack.c.b16 %v3583_v63, %v3581_v61 }
 0x967   : > { %v3577_v51 = vsel %vm4479_vm8, %v3569_v5, 0  ;;  %v3576_v14 = vsel %vm7086_vm0, %v3568_v18, 0  ;;  %vm7174_vm8 = vcmask 1039360   ;;  %vm7175_vm0 = vmmov %vm7173_vm12  ;;  %v3572_v9 = vsel %vm7084_vm6, %v3568_v18, 0 }
 0x968   : > { %3586 = vrot.lane.b32.xlu0 %v3584_v20, %s4191_s19  ;;  %3595 = vrot.lane.b32.xlu2 %v3577_v51, %s4193_s21  ;;  %v3573_v10 = vsel %vm7088_vm1, %v3569_v5, 0  ;;  %vm7178_vm6 = vmmov %vm7176_vm4 }
 0x969   : > { %3593 = vrot.lane.b32.xlu1 %v3576_v14, %s4193_s21  ;;  %vm7179_vm1 = vmmov %vm7176_vm4 }
 0x96a   : > { %vm7180_vm5 = vmmov %vm7179_vm1 }
 0x96b   : > { %vm7181_vm13 = vmmov %vm7179_vm1 }
 0x971   : > { %3588 = vrot.lane.b32.xlu1 %v3585_v33, %s4191_s19 }
 0x9c2   : > { %v3596_v26 = vpop.permute.xlu2 %3595 }
 0x9c3   : > { %v3598_v60 = vsel %vm7175_vm0, %v3596_v26, %v7136_v30  ;;  %vm7190_vm0 = vmmov %vm7183_vm3 }
 0x9da   : > { %v3587_v48 = vpop.permute.xlu0 %3586 }
 0x9db   : > { %v3594_v42 = vpop.permute.xlu1 %3593 }
 0x9dc   : > { %v3597_v36 = vsel %vm7173_vm12, %v3594_v42, %v3596_v26  ;;  %3611 = vrot.lane.b32.xlu1 %v3594_v42, %s4188_s12  ;;  %vm7188_vm12 = vmmov %vm7183_vm3 }
 0x9dd   : > { %3613 = vrot.lane.b32.xlu2 %v3597_v36, %s4188_s12 }
 0x9e3   : > { %v3589_v37 = vpop.permute.xlu1 %3588 }
 0x9e4   : > { %v3590_v54 = vsel %vm7174_vm8, %v3587_v48, %v3589_v37  ;;  %3605 = vrot.lane.b32.xlu1 %v3587_v48, %s4188_s12  ;;  %3609 = vrot.lane.b32.xlu0 %v3589_v37, %s4188_s12  ;;  %vm7189_vm8 = vmmov %vm7184_vm9 }
 0x9e5   : > { %3607 = vrot.lane.b32.xlu2 %v3590_v54, %s4188_s12 }
 0x9ec   : > { %3615 = vrot.lane.b32.xlu0 %v3598_v60, %s4188_s12 }
 0x9ed   : > { %3601 = vrot.lane.b32.xlu2 %v3572_v9, %s4188_s12 }
 0x9f4   : > { %3603 = vrot.lane.b32.xlu0 %v3573_v10, %s4188_s12 }
 0xa37   : > { %v3614_v12 = vpop.permute.xlu2 %3613 }
 0xa3f   : > { %v3608_v40 = vpop.permute.xlu2 %3607 }
 0xa47   : > { %v3602_v17 = vpop.permute.xlu2 %3601 }
 0xa48   : > { %v3617_v6 = vsel %vm7179_vm1, %v6552_v21, %v3602_v17  ;;  %v3771_v21 = vld [vmem:[%s6766_s8] sm:$0x7] }
 0xa4e   : > { %v3612_v46 = vpop.permute.xlu1 %3611 }
 0xa4f   : > { %v3621_v43 = vsel %vm7176_vm4, %v3612_v46, %v3614_v12  ;;  %vm7191_vm4 = vmmov %vm7189_vm8 }
 0xa50   : > { %3640 = vmatpush.bf16.msrb.mxu3 %v3621_v43  ;;  %3724 = vrot.lane.b32.xlu2 %v3621_v43, %s4208_s15 }
 0xa56   : > { %v3610_v30 = vpop.permute.xlu0 %3609  ;;  %v3606_v16 = vpop.permute.xlu1 %3605 }
 0xa57   : > { %v3620_v56 = vsel %vm7177_vm7, %v3608_v40, %v3610_v30  ;;  %v3619_v57 = vsel %vm7178_vm6, %v3606_v16, %v3608_v40  ;;  %vm7192_vm7 = vmmov %vm7190_vm0 }
 0xa58   : > { %3641 = vmatpush.bf16.msrb.mxu3 %v3619_v57  ;;  %3722 = vrot.lane.b32.xlu2 %v3620_v56, %s4208_s15  ;;  %vm7193_vm6 = vmmov %vm7190_vm0 }
 0xa5c   : > { %3642 = vmatpush.bf16.msrb.mxu3 %v3617_v6 }
 0xa5e   : > { %v3616_v59 = vpop.permute.xlu0 %3615 }
 0xa5f   : > { %v3622_v45 = vsel %vm7180_vm5, %v3614_v12, %v3616_v59  ;;  %4089 = vmatmul.msk.bf16.vlgmr.msrb.gmra.mxu3 %vm7183_vm3, %v4088_v1 }
 0xa60   : > { %3726 = vrot.lane.b32.xlu1 %v3622_v45, %s4208_s15  ;;  %3653 = vmatpush.bf16.msra.mxu2 %v3622_v45 }
 0xa61   : > { %3667 = vrot.lane.b32.xlu2 %v3620_v56, %s4207_s25 }
 0xa64   : > { %3654 = vmatpush.bf16.msra.mxu2 %v3620_v56 }
 0xa66   : > { %v3604_v34 = vpop.permute.xlu0 %3603 }
 0xa67   : > { %v3618_v4 = vsel %vm7181_vm13, %v3602_v17, %v3604_v34 }
 0xa68   : > { %3671 = vrot.lane.b32.xlu1 %v3622_v45, %s4207_s25  ;;  %3718 = vrot.lane.b32.xlu0 %v3618_v4, %s4208_s15 }
 0xa69   : > { %3655 = vmatpush.bf16.msra.mxu2 %v3618_v4  ;;  %3661 = vrot.lane.b32.xlu2 %v3617_v6, %s4207_s25 }
 0xa6c   : > { %4090 = vmatmul.msk.bf16.vlgmr.msra.gmra.mxu2 %vm7182_vm14, %v4088_v1 }
 0xa70   : > { %3665 = vrot.lane.b32.xlu1 %v3619_v57, %s4207_s25  ;;  %3669 = vrot.lane.b32.xlu0 %v3621_v43, %s4207_s25 }
 0xa78   : > { %3720 = vrot.lane.b32.xlu0 %v3619_v57, %s4208_s15  ;;  %3716 = vrot.lane.b32.xlu1 %v3617_v6, %s4208_s15 }
 0xa80   : > { %3663 = vrot.lane.b32.xlu0 %v3618_v4, %s4207_s25  ;;  %3774 = vperm.xlu1 %4168, %v3771_v21  }
 0xaaa   : > { %v3725_v58 = vpop.permute.xlu2 %3724 }
 0xab2   : > { %v3723_v13 = vpop.permute.xlu2 %3722 }
 0xab3   : > { %v3731_v27 = vsel %vm7186_vm10, %v3723_v13, %v5781_v28 }
 0xabb   : > { %v3668_v32 = vpop.permute.xlu2 %3667 }
 0xac3   : > { %v3662_v24 = vpop.permute.xlu2 %3661 }
 0xac4   : > { %v3673_v11 = vsel %vm1685_vm2, %v5442_v39, %v3662_v24 }
 0xad2   : > { %v3727_v41 = vpop.permute.xlu1 %3726 }
 0xad3   : > { %v3732_v38 = vsel %vm7184_vm9, %v3725_v58, %v3727_v41  ;;  %v3733_v22 = vsel %vm7185_vm11, %v3727_v41, %v5781_v28 }
 0xad4   : > { %3748 = vmatpush.bf16.msra.mxu3 %v3732_v38  ;;  %3761 = vmatpush.bf16.msrb.mxu2 %v3733_v22 }
 0xad8   : > { %3762 = vmatpush.bf16.msrb.mxu2 %v3731_v27 }
 0xada   : > { %v3672_v7 = vpop.permute.xlu1 %3671  ;;  %v3719_v0 = vpop.permute.xlu0 %3718 }
 0xadb   : > { %v3729_v31 = vsel %vm7187_vm15, %v3719_v0, %v5781_v28 }
 0xadc   : > { %3763 = vmatpush.bf16.msrb.mxu2 %v3729_v31 }
 0xadf   : > { %4095 = vmatmul.msk.bf16.vlgmr.msrb.gmra.mxu2 %vm7188_vm12, %v4093_v47 }
 0xae2   : > { %v3666_v53 = vpop.permute.xlu1 %3665  ;;  %v3670_v25 = vpop.permute.xlu0 %3669 }
 0xae3   : > { %v3677_v2 = vsel %vm1685_vm2, %v5442_v39, %v3670_v25  ;;  %v3678_v44 = vsel %vm1685_vm2, %v3670_v25, %v3672_v7  ;;  %v3675_v28 = vsel %vm1685_vm2, %v5442_v39, %v3666_v53  ;;  %v3676_v55 = vsel %vm1685_vm2, %v3666_v53, %v3668_v32  ;;  %v3644_v52 = vpop.f32.mrf.mxu3 }
 0xae4   : > { %3693 = vmatpush.bf16.msra.mxu1 %v3677_v2  ;;  %3706 = vmatpush.bf16.msrb.mxu0 %v3678_v44 }
 0xae8   : > { %3694 = vmatpush.bf16.msra.mxu1 %v3675_v28  ;;  %3707 = vmatpush.bf16.msrb.mxu0 %v3676_v55 }
 0xaea   : > { %v3721_v50 = vpop.permute.xlu0 %3720  ;;  %v3717_v8 = vpop.permute.xlu1 %3716 }
 0xaeb   : > { %v3730_v23 = vsel %vm7189_vm8, %v3721_v50, %v3723_v13  ;;  %v3728_v29 = vsel %vm7191_vm4, %v3717_v8, %v3719_v0  ;;  %v3646_v19 = vpop.f32.mrf.mxu3 }
 0xaec   : > { %3695 = vmatpush.bf16.msra.mxu1 %v3673_v11  ;;  %3749 = vmatpush.bf16.msra.mxu3 %v3730_v23 }
 0xaef   : > { %4091 = vmatmul.msk.bf16.vlgmr.msra.gmra.mxu1 %vm7190_vm0, %v3623_v62  ;;  %v3657_v39 = vpop.f32.mrf.mxu2 }
 0xaf0   : > { %3750 = vmatpush.bf16.msra.mxu3 %v3728_v29 }
 0xaf2   : > { %v3664_v49 = vpop.permute.xlu0 %3663  ;;  %v3775_v42 = vpop.permute.xlu1 %3774 }
 0xaf3   : > { %4094 = vmatmul.msk.bf16.vlgmr.msra.gmra.mxu3 %vm7192_vm7, %v4093_v47  ;;  %v3674_v15 = vsel %vm1685_vm2, %v3662_v24, %v3664_v49  ;;  %vm3792_vm2 = vcmask 1043456  }
 0xaf4   : > { %3708 = vmatpush.bf16.msrb.mxu0 %v3674_v15 }
 0xaf7   : > { %4092 = vmatmul.msk.bf16.vlgmr.msrb.gmra.mxu0 %vm7193_vm6, %v3623_v62  ;;  %v3659_v35 = vpop.f32.mrf.mxu2 }
 0xb62   : > { %v3765_v3 = vpop.f32.mrf.mxu2 }
 0xb6a   : > { %v3767_v5 = vpop.f32.mrf.mxu2 }
 0xb6c   : > { %v3697_v18 = vpop.f32.mrf.mxu1 }
 0xb6d   : > { %v3698_v14 = vadd.f32 %v3697_v18, %v3644_v52 }
 0xb74   : > { %v3710_v20 = vpop.f32.mrf.mxu0  ;;  %v3699_v51 = vpop.f32.mrf.mxu1 }
 0xb75   : > { %v3711_v63 = vadd.f32 %v3710_v20, %v3657_v39 }
 0xb76   : > { %v3752_v61 = vpop.f32.mrf.mxu3 }
 0xb77   : > { %v3770_v33 = vadd.f32 %v3765_v3, %v3711_v63  ;;  %v3769_v26 = vadd.f32 %v3752_v61, %v3698_v14 }
 0xb79   : > { %v3778_v36 = vadd.f32 %v3775_v42, %v3770_v33  ;;  %v3777_v48 = vadd.f32 %v3775_v42, %v3769_v26 }
 0xb7b   : > { %v3780_v37 = vsub.f32 0.0, %v3778_v36  ;;  %v3779_v54 = vsub.f32 0.0, %v3777_v48 }
 0xb7c   : > { %v3712_v60 = vpop.f32.mrf.mxu0 }
 0xb7d   : > { %v3783_v9 = vmul.f32 1.442695, %v3780_v37  ;;  %v3781_v10 = vmul.f32 1.442695, %v3779_v54 }
 0xb7e   : > { %v3754_v12 = vpop.f32.mrf.mxu3 }
 0xb7f   : > { %4170 = vpow2.f32 %v3783_v9 }
 0xb80   : > { %4172 = vpow2.f32 %v3781_v10 }
 0xb85   : > { %v4171_v40 = vpop.eup %4170 }
 0xb86   : > { %v4173_v46 = vpop.eup %4172  ;;  %v3786_v43 = vadd.f32 1.0, %v4171_v40 }
 0xb87   : > { %v3785_v30 = vadd.f32 1.0, %v4173_v46 }
 0xb88   : > { %4174 = vrcp.f32 %v3786_v43 }
 0xb89   : > { %4176 = vrcp.f32 %v3785_v30 }
 0xb8e   : > { %v4175_v16 = vpop.eup %4174 }
 0xb8f   : > { %v3791_v56 = vrot.slane %v4175_v16, 4  ;;  %v4177_v57 = vpop.eup %4176 }
 0xb91   : > { %v3793_v17 = vsel %vm3792_vm2, %v4177_v57, %v3791_v56 }
 0xb92   : > { %3795 = vst [vmem:[%s332_s23] sm:$0x77] %v3793_v17 }
 0xb93 PF: > { %s19_s30 = sadd.s32 1, %s4184_s30  }
 0xb94   : > { %p16_p4 = scmp.ge.s32.totalorder %s19_s30, 4  }
 0xb96   :  { %18 = sbr.rel (!%p16_p4) target bundleno = 1 (0x1), region = 104 }

</bundles_post_ra>
